<compile_context>
chip_gen: v5e
topology: v5e:2x2
jax: 0.10.0
libtpu: 0.0.40
codegen_flags: <defaults>
</compile_context>

<pallas_src>
import jax
import jax.numpy as jnp
import numpy as np
from jax.experimental import pallas as pl
from jax.experimental.pallas import tpu as pltpu

EPS = 1e-5

LAYER_CFG = [((1, 1), (0, 0)),   # ConvTranspose2d(nz,  4g, (32,1), 1, 0)
             ((2, 2), (1, 1)),   # ConvTranspose2d(4g,  2g,  4,     2, 1)
             ((2, 2), (1, 1)),   # ConvTranspose2d(2g,   g,  4,     2, 1)
             ((2, 2), (1, 1))]   # ConvTranspose2d(g,   nc, (4,3),  2, 1)


# ------------------------- helpers -------------------------------------------

def _full_spec(shape):
    """Whole-array block (block_shape == array shape) for a grid=(1,) call."""
    zeros = (0,) * len(shape)
    return pl.BlockSpec(tuple(int(s) for s in shape), lambda i, _z=zeros: _z)


# ------------------------- host-side weight prep (once) ----------------------

def prep_decoder(params, N):
    """Host-side (numpy) weight prep, run ONCE outside the jitted forward.

    Builds, per ConvTranspose layer, the 0/1 H-scatter matrices D_a and the
    batch-block-diagonal W-tap/channel mixing matrices B_a, plus the BatchNorm
    channel reduce/expand matrices and lane-expanded beta.  B_a depends on the
    batch size N (block-diagonal over batch) — re-run prep if N changes.
    """
    w_list = [np.asarray(w, np.float32) for w in params["w"]]
    g_list = [np.asarray(g, np.float32) for g in params["g"]]
    b_list = [np.asarray(b, np.float32) for b in params["b"]]

    pp = {}

    # Layer 0: ConvTranspose2d over a 1x1 input == plain matmul with reshaped weight.
    w0 = w_list[0]                                     # (nz, C0, H0, W0)
    C0, H0, W0 = w0.shape[1], w0.shape[2], w0.shape[3]
    assert W0 == 1, "layer-0 kernel is (kh, 1) in this module"
    pp["w0"] = jnp.asarray(w0[:, :, :, 0])             # (nz, C0, H0)

    dims = [(H0, W0, C0)]                              # per-layer output (H, W, C)
    Hin, Win, Cin = H0, W0, C0
    for li in (1, 2, 3):
        w = w_list[li]                                 # (Cin, Cout, kh, kw)
        Cout, kh, kw = w.shape[1], w.shape[2], w.shape[3]
        (sh, sw), (ph, pw) = LAYER_CFG[li]
        Hout = (Hin - 1) * sh - 2 * ph + kh
        Wout = (Win - 1) * sw - 2 * pw + kw

        # D_a[oh, ih] = 1  iff  oh == ih*sh - ph + a   (transposed-conv H scatter)
        D = np.zeros((kh, Hout, Hin), np.float32)
        for a in range(kh):
            for ih in range(Hin):
                oh = ih * sh - ph + a
                if 0 <= oh < Hout:
                    D[a, oh, ih] = 1.0

        # B_a[(n,iw,ci),(n,ow,co)] = w[ci, co, a, ow - iw*sw + pw]  (if tap in range)
        B = np.zeros((kh, N * Win * Cin, N * Wout * Cout), np.float32)
        for a in range(kh):
            for n in range(N):
                for iw in range(Win):
                    for ow in range(Wout):
                        kb = ow - iw * sw + pw
                        if 0 <= kb < kw:
                            r0 = (n * Win + iw) * Cin
                            c0 = (n * Wout + ow) * Cout
                            B[a, r0:r0 + Cin, c0:c0 + Cout] = w[:, :, a, kb]

        pp[f"D{li}"] = jnp.asarray(D)
        pp[f"B{li}"] = jnp.asarray(B)
        dims.append((Hout, Wout, Cout))
        Hin, Win, Cin = Hout, Wout, Cout

    # BatchNorm operands (layers 0..2): lanes are (n, w, c) with c fastest.
    for li in range(3):
        _, Wl, Cl = dims[li]
        R = np.tile(np.eye(Cl, dtype=np.float32), (N * Wl, 1))     # lanes -> channels
        pp[f"R{li}"] = jnp.asarray(R)
        pp[f"RT{li}"] = jnp.asarray(np.ascontiguousarray(R.T))     # channels -> lanes
        pp[f"G{li}"] = jnp.asarray(g_list[li].reshape(1, Cl))
        pp[f"BL{li}"] = jnp.asarray(
            np.tile(b_list[li], N * Wl).reshape(1, N * Wl * Cl))
    return pp


# ------------------------- fused Pallas kernel --------------------------------

def _make_decoder_kernel(cnts, khs):
    cnt0, cnt1, cnt2 = cnts
    kh1, kh2, kh3 = khs

    def bn_relu(y, cnt, g, bl, r, rt):
        # Training-mode BatchNorm (batch stats, biased var) + ReLU, exact two-pass.
        inv = 1.0 / float(cnt)
        mean_c = jnp.dot(jnp.sum(y, axis=0, keepdims=True), r,
                         preferred_element_type=jnp.float32) * inv        # [1, C]
        mean_l = jnp.dot(mean_c, rt, preferred_element_type=jnp.float32)  # [1, L]
        d = y - mean_l
        var_c = jnp.dot(jnp.sum(d * d, axis=0, keepdims=True), r,
                        preferred_element_type=jnp.float32) * inv         # [1, C]
        scale_c = g * jax.lax.rsqrt(var_c + EPS)
        scale_l = jnp.dot(scale_c, rt, preferred_element_type=jnp.float32)
        return jnp.maximum(d * scale_l + bl, 0.0)

    def convt(z, d_ref, b_ref, kh):
        # ConvTranspose2d as per-H-tap matmul accumulation (im2col-free):
        #   y[oh, (n,ow,co)] = sum_a D_a[oh, ih] * (z @ B_a)[ih, (n,ow,co)]
        acc = None
        for a in range(kh):
            t = jnp.dot(z, b_ref[a], preferred_element_type=jnp.float32)
            c = jnp.dot(d_ref[a], t, preferred_element_type=jnp.float32)
            acc = c if acc is None else acc + c
        return acc

    def kernel(z0_ref,
               g0_ref, bl0_ref, r0_ref, rt0_ref,
               d1_ref, b1_ref, g1_ref, bl1_ref, r1_ref, rt1_ref,
               d2_ref, b2_ref, g2_ref, bl2_ref, r2_ref, rt2_ref,
               d3_ref, b3_ref,
               out_ref):
        z = bn_relu(z0_ref[...], cnt0,
                    g0_ref[...], bl0_ref[...], r0_ref[...], rt0_ref[...])
        z = bn_relu(convt(z, d1_ref, b1_ref, kh1), cnt1,
                    g1_ref[...], bl1_ref[...], r1_ref[...], rt1_ref[...])
        z = bn_relu(convt(z, d2_ref, b2_ref, kh2), cnt2,
                    g2_ref[...], bl2_ref[...], r2_ref[...], rt2_ref[...])
        out_ref[...] = jax.nn.sigmoid(convt(z, d3_ref, b3_ref, kh3))

    return kernel


# ------------------------- forward (one pallas_call) --------------------------

def decoder_forward(x, pp, *, nc):
    N = x.shape[0]
    w0 = pp["w0"]                                  # (nz, C0, H0)
    C0, H0 = w0.shape[1], w0.shape[2]

    # Layer 0 special case: ConvTranspose over a 1x1 input == plain matmul.
    x2 = x.reshape(N, -1).astype(jnp.float32)
    z0 = jnp.einsum("nc,cdh->hnd", x2, w0,
                    precision=jax.lax.Precision.HIGHEST)     # (H0, N, C0)
    z0 = z0.reshape(H0, N * C0)                              # lanes = (n, c)

    # Static dims baked into the kernel.
    cnts = []
    for li in range(3):
        C = pp[f"G{li}"].shape[1]
        L = pp[f"R{li}"].shape[0]
        H = H0 if li == 0 else pp[f"D{li}"].shape[1]
        cnts.append(H * (L // C))                            # elems/channel for BN stats
    khs = tuple(pp[f"D{li}"].shape[0] for li in (1, 2, 3))
    H3 = pp["D3"].shape[1]
    L3 = pp["B3"].shape[2]                                   # N * W3 * nc

    ins = [z0,
           pp["G0"], pp["BL0"], pp["R0"], pp["RT0"],
           pp["D1"], pp["B1"], pp["G1"], pp["BL1"], pp["R1"], pp["RT1"],
           pp["D2"], pp["B2"], pp["G2"], pp["BL2"], pp["R2"], pp["RT2"],
           pp["D3"], pp["B3"]]

    out = pl.pallas_call(
        _make_decoder_kernel(tuple(cnts), khs),
        out_shape=jax.ShapeDtypeStruct((H3, L3), jnp.float32),
        grid=(1,),
        in_specs=[_full_spec(a.shape) for a in ins],
        out_specs=_full_spec((H3, L3)),
        compiler_params=pltpu.CompilerParams(dimension_semantics=("arbitrary",)),
    )(*ins)

    W3 = L3 // (N * nc)
    return out.reshape(H3, N, W3, nc).transpose(1, 3, 0, 2)   # back to NCHW


# ------------------------- independent pure-JAX reference ---------------------

def decoder_reference(x, params):
    """Same math via lax.conv_general_dilated (lhs_dilation == ConvTranspose)."""
    for li, (stride, pad) in enumerate(LAYER_CFG):
        w = params["w"][li]
        kh, kw = w.shape[2], w.shape[3]
        x = jax.lax.conv_general_dilated(
            x, w[:, :, ::-1, ::-1],
            window_strides=(1, 1),
            padding=[(kh - 1 - pad[0],) * 2, (kw - 1 - pad[1],) * 2],
            lhs_dilation=stride,
            dimension_numbers=("NCHW", "IOHW", "NCHW"),
            precision=jax.lax.Precision.HIGHEST)
        if li < 3:
            mean = x.mean(axis=(0, 2, 3), keepdims=True)
            var = x.var(axis=(0, 2, 3), keepdims=True)   # biased, training-mode BN
            g = params["g"][li].reshape(1, -1, 1, 1)
            b = params["b"][li].reshape(1, -1, 1, 1)
            x = jnp.maximum((x - mean) * jax.lax.rsqrt(var + EPS) * g + b, 0.0)
        else:
            x = jax.nn.sigmoid(x)
    return x


# ------------------------- main ----------------------------------------------

if __name__ == "__main__":
    # Small DCGAN-ish latent decoder shapes implied by the module.
    N, nz, ngf, nc = 2, 16, 8, 1

    key = jax.random.PRNGKey(0)
    ks = jax.random.split(key, 11)
    params = {
        "w": [
            0.02 * jax.random.normal(ks[0], (nz,      ngf * 4, 32, 1), jnp.float32),
            0.02 * jax.random.normal(ks[1], (ngf * 4, ngf * 2,  4, 4), jnp.float32),
            0.02 * jax.random.normal(ks[2], (ngf * 2, ngf,      4, 4), jnp.float32),
            0.02 * jax.random.normal(ks[3], (ngf,     nc,       4, 3), jnp.float32),
        ],
        "g": [
            1.0 + 0.1 * jax.random.normal(ks[4], (ngf * 4,), jnp.float32),
            1.0 + 0.1 * jax.random.normal(ks[5], (ngf * 2,), jnp.float32),
            1.0 + 0.1 * jax.random.normal(ks[6], (ngf,),     jnp.float32),
        ],
        "b": [
            0.1 * jax.random.normal(ks[7], (ngf * 4,), jnp.float32),
            0.1 * jax.random.normal(ks[8], (ngf * 2,), jnp.float32),
            0.1 * jax.random.normal(ks[9], (ngf,),     jnp.float32),
        ],
    }
    x = jax.random.normal(ks[10], (N, nz, 1, 1), jnp.float32)

    pp = prep_decoder(params, N)                 # host-side weight prep, once
    fwd = jax.jit(lambda xx, p: decoder_forward(xx, p, nc=nc))
    out = jax.block_until_ready(fwd(x, pp))

    # Expected output: (N, nc, 256, 7) in NCHW, sigmoid-bounded.
    assert out.shape == (N, nc, 256, 7), out.shape
    assert bool(jnp.all(jnp.isfinite(out)))

    ref = jax.block_until_ready(jax.jit(decoder_reference)(x, params))
    np.testing.assert_allclose(np.asarray(out), np.asarray(ref), atol=5e-2, rtol=5e-2)

    print("KERNEL_OK")
</pallas_src>

<mosaic_0001>
module attributes {stable_mosaic.version = 11 : i64} {
  func.func @kernel(%arg0: i32, %arg1: memref<32x64xf32, #tpu.memory_space<vmem>>, %arg2: memref<1x32xf32, #tpu.memory_space<vmem>>, %arg3: memref<1x64xf32, #tpu.memory_space<vmem>>, %arg4: memref<64x32xf32, #tpu.memory_space<vmem>>, %arg5: memref<32x64xf32, #tpu.memory_space<vmem>>, %arg6: memref<4x64x32xf32, #tpu.memory_space<vmem>>, %arg7: memref<4x64x64xf32, #tpu.memory_space<vmem>>, %arg8: memref<1x16xf32, #tpu.memory_space<vmem>>, %arg9: memref<1x64xf32, #tpu.memory_space<vmem>>, %arg10: memref<64x16xf32, #tpu.memory_space<vmem>>, %arg11: memref<16x64xf32, #tpu.memory_space<vmem>>, %arg12: memref<4x128x64xf32, #tpu.memory_space<vmem>>, %arg13: memref<4x64x64xf32, #tpu.memory_space<vmem>>, %arg14: memref<1x8xf32, #tpu.memory_space<vmem>>, %arg15: memref<1x64xf32, #tpu.memory_space<vmem>>, %arg16: memref<64x8xf32, #tpu.memory_space<vmem>>, %arg17: memref<8x64xf32, #tpu.memory_space<vmem>>, %arg18: memref<4x256x128xf32, #tpu.memory_space<vmem>>, %arg19: memref<4x64x14xf32, #tpu.memory_space<vmem>>, %arg20: memref<256x14xf32, #tpu.memory_space<vmem>>) attributes {dimension_semantics = [#tpu.dimension_semantics<arbitrary>], iteration_bounds = array<i64: 1>, scalar_prefetch = 0 : i64, scratch_operands = 0 : i64, tpu.core_type = #tpu.core_type<tc>, window_params = [{pipeline_mode = #tpu.pipeline_mode<synchronous>, transform_indices = @transform_0, window_bounds = array<i64: 32, 64>}, {pipeline_mode = #tpu.pipeline_mode<synchronous>, transform_indices = @transform_1, window_bounds = array<i64: 1, 32>}, {pipeline_mode = #tpu.pipeline_mode<synchronous>, transform_indices = @transform_2, window_bounds = array<i64: 1, 64>}, {pipeline_mode = #tpu.pipeline_mode<synchronous>, transform_indices = @transform_3, window_bounds = array<i64: 64, 32>}, {pipeline_mode = #tpu.pipeline_mode<synchronous>, transform_indices = @transform_4, window_bounds = array<i64: 32, 64>}, {pipeline_mode = #tpu.pipeline_mode<synchronous>, transform_indices = @transform_5, window_bounds = array<i64: 4, 64, 32>}, {pipeline_mode = #tpu.pipeline_mode<synchronous>, transform_indices = @transform_6, window_bounds = array<i64: 4, 64, 64>}, {pipeline_mode = #tpu.pipeline_mode<synchronous>, transform_indices = @transform_7, window_bounds = array<i64: 1, 16>}, {pipeline_mode = #tpu.pipeline_mode<synchronous>, transform_indices = @transform_8, window_bounds = array<i64: 1, 64>}, {pipeline_mode = #tpu.pipeline_mode<synchronous>, transform_indices = @transform_9, window_bounds = array<i64: 64, 16>}, {pipeline_mode = #tpu.pipeline_mode<synchronous>, transform_indices = @transform_10, window_bounds = array<i64: 16, 64>}, {pipeline_mode = #tpu.pipeline_mode<synchronous>, transform_indices = @transform_11, window_bounds = array<i64: 4, 128, 64>}, {pipeline_mode = #tpu.pipeline_mode<synchronous>, transform_indices = @transform_12, window_bounds = array<i64: 4, 64, 64>}, {pipeline_mode = #tpu.pipeline_mode<synchronous>, transform_indices = @transform_13, window_bounds = array<i64: 1, 8>}, {pipeline_mode = #tpu.pipeline_mode<synchronous>, transform_indices = @transform_14, window_bounds = array<i64: 1, 64>}, {pipeline_mode = #tpu.pipeline_mode<synchronous>, transform_indices = @transform_15, window_bounds = array<i64: 64, 8>}, {pipeline_mode = #tpu.pipeline_mode<synchronous>, transform_indices = @transform_16, window_bounds = array<i64: 8, 64>}, {pipeline_mode = #tpu.pipeline_mode<synchronous>, transform_indices = @transform_17, window_bounds = array<i64: 4, 256, 128>}, {pipeline_mode = #tpu.pipeline_mode<synchronous>, transform_indices = @transform_18, window_bounds = array<i64: 4, 64, 14>}, {pipeline_mode = #tpu.pipeline_mode<synchronous>, transform_indices = @transform_19, window_bounds = array<i64: 256, 14>}]} {
    %c0 = arith.constant 0 : index
    %c0_0 = arith.constant 0 : index
    %0 = vector.load %arg1[%c0, %c0_0] : memref<32x64xf32, #tpu.memory_space<vmem>>, vector<32x64xf32>
    %c0_1 = arith.constant 0 : index
    %c0_2 = arith.constant 0 : index
    %1 = vector.load %arg2[%c0_1, %c0_2] : memref<1x32xf32, #tpu.memory_space<vmem>>, vector<1x32xf32>
    %c0_3 = arith.constant 0 : index
    %c0_4 = arith.constant 0 : index
    %2 = vector.load %arg3[%c0_3, %c0_4] : memref<1x64xf32, #tpu.memory_space<vmem>>, vector<1x64xf32>
    %c0_5 = arith.constant 0 : index
    %c0_6 = arith.constant 0 : index
    %3 = vector.load %arg4[%c0_5, %c0_6] : memref<64x32xf32, #tpu.memory_space<vmem>>, vector<64x32xf32>
    %c0_7 = arith.constant 0 : index
    %c0_8 = arith.constant 0 : index
    %4 = vector.load %arg5[%c0_7, %c0_8] : memref<32x64xf32, #tpu.memory_space<vmem>>, vector<32x64xf32>
    %cst = arith.constant dense<0.000000e+00> : vector<64xf32>
    %5 = vector.multi_reduction <add>, %0, %cst [0] : vector<32x64xf32> to vector<64xf32>
    %6 = vector.shape_cast %5 : vector<64xf32> to vector<1x64xf32>
    %cst_9 = arith.constant dense<0.000000e+00> : vector<1x32xf32>
    %7 = tpu.matmul %6, %3, %cst_9 {dimension_numbers = #tpu.dot_dimension_numbers<[1], [0], [0], [1], [0, 0, 1, 1], [], []>} : vector<1x64xf32>, vector<64x32xf32>, vector<1x32xf32> -> vector<1x32xf32>
    %cst_10 = arith.constant 1.562500e-02 : f32
    %8 = vector.broadcast %cst_10 : f32 to vector<1x32xf32>
    %9 = arith.mulf %7, %8 : vector<1x32xf32>
    %cst_11 = arith.constant dense<0.000000e+00> : vector<1x64xf32>
    %10 = tpu.matmul %9, %4, %cst_11 {dimension_numbers = #tpu.dot_dimension_numbers<[1], [0], [0], [1], [0, 0, 1, 1], [], []>} : vector<1x32xf32>, vector<32x64xf32>, vector<1x64xf32> -> vector<1x64xf32>
    %11 = vector.broadcast %10 : vector<1x64xf32> to vector<32x64xf32>
    %12 = arith.subf %0, %11 : vector<32x64xf32>
    %13 = arith.mulf %12, %12 : vector<32x64xf32>
    %cst_12 = arith.constant dense<0.000000e+00> : vector<64xf32>
    %14 = vector.multi_reduction <add>, %13, %cst_12 [0] : vector<32x64xf32> to vector<64xf32>
    %15 = vector.shape_cast %14 : vector<64xf32> to vector<1x64xf32>
    %cst_13 = arith.constant dense<0.000000e+00> : vector<1x32xf32>
    %16 = tpu.matmul %15, %3, %cst_13 {dimension_numbers = #tpu.dot_dimension_numbers<[1], [0], [0], [1], [0, 0, 1, 1], [], []>} : vector<1x64xf32>, vector<64x32xf32>, vector<1x32xf32> -> vector<1x32xf32>
    %cst_14 = arith.constant 1.562500e-02 : f32
    %17 = vector.broadcast %cst_14 : f32 to vector<1x32xf32>
    %18 = arith.mulf %16, %17 : vector<1x32xf32>
    %cst_15 = arith.constant 9.99999974E-6 : f32
    %19 = vector.broadcast %cst_15 : f32 to vector<1x32xf32>
    %20 = arith.addf %18, %19 : vector<1x32xf32>
    %21 = math.rsqrt %20 : vector<1x32xf32>
    %22 = arith.mulf %1, %21 : vector<1x32xf32>
    %cst_16 = arith.constant dense<0.000000e+00> : vector<1x64xf32>
    %23 = tpu.matmul %22, %4, %cst_16 {dimension_numbers = #tpu.dot_dimension_numbers<[1], [0], [0], [1], [0, 0, 1, 1], [], []>} : vector<1x32xf32>, vector<32x64xf32>, vector<1x64xf32> -> vector<1x64xf32>
    %24 = vector.broadcast %23 : vector<1x64xf32> to vector<32x64xf32>
    %25 = arith.mulf %12, %24 : vector<32x64xf32>
    %26 = vector.broadcast %2 : vector<1x64xf32> to vector<32x64xf32>
    %27 = arith.addf %25, %26 : vector<32x64xf32>
    %cst_17 = arith.constant 0.000000e+00 : f32
    %28 = vector.broadcast %cst_17 : f32 to vector<32x64xf32>
    %29 = arith.maximumf %27, %28 : vector<32x64xf32>
    %c0_18 = arith.constant 0 : index
    %c0_19 = arith.constant 0 : index
    %c0_20 = arith.constant 0 : index
    %30 = vector.load %arg7[%c0_18, %c0_19, %c0_20] : memref<4x64x64xf32, #tpu.memory_space<vmem>>, vector<1x64x64xf32>
    %31 = vector.shape_cast %30 : vector<1x64x64xf32> to vector<64x64xf32>
    %cst_21 = arith.constant dense<0.000000e+00> : vector<32x64xf32>
    %32 = tpu.matmul %29, %31, %cst_21 {dimension_numbers = #tpu.dot_dimension_numbers<[1], [0], [0], [1], [0, 0, 1, 1], [], []>} : vector<32x64xf32>, vector<64x64xf32>, vector<32x64xf32> -> vector<32x64xf32>
    %c0_22 = arith.constant 0 : index
    %c0_23 = arith.constant 0 : index
    %c0_24 = arith.constant 0 : index
    %33 = vector.load %arg6[%c0_22, %c0_23, %c0_24] : memref<4x64x32xf32, #tpu.memory_space<vmem>>, vector<1x64x32xf32>
    %34 = vector.shape_cast %33 : vector<1x64x32xf32> to vector<64x32xf32>
    %cst_25 = arith.constant dense<0.000000e+00> : vector<64x64xf32>
    %35 = tpu.matmul %34, %32, %cst_25 {dimension_numbers = #tpu.dot_dimension_numbers<[1], [0], [0], [1], [0, 0, 1, 1], [], []>} : vector<64x32xf32>, vector<32x64xf32>, vector<64x64xf32> -> vector<64x64xf32>
    %c1 = arith.constant 1 : index
    %c0_26 = arith.constant 0 : index
    %c0_27 = arith.constant 0 : index
    %36 = vector.load %arg7[%c1, %c0_26, %c0_27] : memref<4x64x64xf32, #tpu.memory_space<vmem>>, vector<1x64x64xf32>
    %37 = vector.shape_cast %36 : vector<1x64x64xf32> to vector<64x64xf32>
    %cst_28 = arith.constant dense<0.000000e+00> : vector<32x64xf32>
    %38 = tpu.matmul %29, %37, %cst_28 {dimension_numbers = #tpu.dot_dimension_numbers<[1], [0], [0], [1], [0, 0, 1, 1], [], []>} : vector<32x64xf32>, vector<64x64xf32>, vector<32x64xf32> -> vector<32x64xf32>
    %c1_29 = arith.constant 1 : index
    %c0_30 = arith.constant 0 : index
    %c0_31 = arith.constant 0 : index
    %39 = vector.load %arg6[%c1_29, %c0_30, %c0_31] : memref<4x64x32xf32, #tpu.memory_space<vmem>>, vector<1x64x32xf32>
    %40 = vector.shape_cast %39 : vector<1x64x32xf32> to vector<64x32xf32>
    %cst_32 = arith.constant dense<0.000000e+00> : vector<64x64xf32>
    %41 = tpu.matmul %40, %38, %cst_32 {dimension_numbers = #tpu.dot_dimension_numbers<[1], [0], [0], [1], [0, 0, 1, 1], [], []>} : vector<64x32xf32>, vector<32x64xf32>, vector<64x64xf32> -> vector<64x64xf32>
    %42 = arith.addf %35, %41 : vector<64x64xf32>
    %c2 = arith.constant 2 : index
    %c0_33 = arith.constant 0 : index
    %c0_34 = arith.constant 0 : index
    %43 = vector.load %arg7[%c2, %c0_33, %c0_34] : memref<4x64x64xf32, #tpu.memory_space<vmem>>, vector<1x64x64xf32>
    %44 = vector.shape_cast %43 : vector<1x64x64xf32> to vector<64x64xf32>
    %cst_35 = arith.constant dense<0.000000e+00> : vector<32x64xf32>
    %45 = tpu.matmul %29, %44, %cst_35 {dimension_numbers = #tpu.dot_dimension_numbers<[1], [0], [0], [1], [0, 0, 1, 1], [], []>} : vector<32x64xf32>, vector<64x64xf32>, vector<32x64xf32> -> vector<32x64xf32>
    %c2_36 = arith.constant 2 : index
    %c0_37 = arith.constant 0 : index
    %c0_38 = arith.constant 0 : index
    %46 = vector.load %arg6[%c2_36, %c0_37, %c0_38] : memref<4x64x32xf32, #tpu.memory_space<vmem>>, vector<1x64x32xf32>
    %47 = vector.shape_cast %46 : vector<1x64x32xf32> to vector<64x32xf32>
    %cst_39 = arith.constant dense<0.000000e+00> : vector<64x64xf32>
    %48 = tpu.matmul %47, %45, %cst_39 {dimension_numbers = #tpu.dot_dimension_numbers<[1], [0], [0], [1], [0, 0, 1, 1], [], []>} : vector<64x32xf32>, vector<32x64xf32>, vector<64x64xf32> -> vector<64x64xf32>
    %49 = arith.addf %42, %48 : vector<64x64xf32>
    %c3 = arith.constant 3 : index
    %c0_40 = arith.constant 0 : index
    %c0_41 = arith.constant 0 : index
    %50 = vector.load %arg7[%c3, %c0_40, %c0_41] : memref<4x64x64xf32, #tpu.memory_space<vmem>>, vector<1x64x64xf32>
    %51 = vector.shape_cast %50 : vector<1x64x64xf32> to vector<64x64xf32>
    %cst_42 = arith.constant dense<0.000000e+00> : vector<32x64xf32>
    %52 = tpu.matmul %29, %51, %cst_42 {dimension_numbers = #tpu.dot_dimension_numbers<[1], [0], [0], [1], [0, 0, 1, 1], [], []>} : vector<32x64xf32>, vector<64x64xf32>, vector<32x64xf32> -> vector<32x64xf32>
    %c3_43 = arith.constant 3 : index
    %c0_44 = arith.constant 0 : index
    %c0_45 = arith.constant 0 : index
    %53 = vector.load %arg6[%c3_43, %c0_44, %c0_45] : memref<4x64x32xf32, #tpu.memory_space<vmem>>, vector<1x64x32xf32>
    %54 = vector.shape_cast %53 : vector<1x64x32xf32> to vector<64x32xf32>
    %cst_46 = arith.constant dense<0.000000e+00> : vector<64x64xf32>
    %55 = tpu.matmul %54, %52, %cst_46 {dimension_numbers = #tpu.dot_dimension_numbers<[1], [0], [0], [1], [0, 0, 1, 1], [], []>} : vector<64x32xf32>, vector<32x64xf32>, vector<64x64xf32> -> vector<64x64xf32>
    %56 = arith.addf %49, %55 : vector<64x64xf32>
    %c0_47 = arith.constant 0 : index
    %c0_48 = arith.constant 0 : index
    %57 = vector.load %arg8[%c0_47, %c0_48] : memref<1x16xf32, #tpu.memory_space<vmem>>, vector<1x16xf32>
    %c0_49 = arith.constant 0 : index
    %c0_50 = arith.constant 0 : index
    %58 = vector.load %arg9[%c0_49, %c0_50] : memref<1x64xf32, #tpu.memory_space<vmem>>, vector<1x64xf32>
    %c0_51 = arith.constant 0 : index
    %c0_52 = arith.constant 0 : index
    %59 = vector.load %arg10[%c0_51, %c0_52] : memref<64x16xf32, #tpu.memory_space<vmem>>, vector<64x16xf32>
    %c0_53 = arith.constant 0 : index
    %c0_54 = arith.constant 0 : index
    %60 = vector.load %arg11[%c0_53, %c0_54] : memref<16x64xf32, #tpu.memory_space<vmem>>, vector<16x64xf32>
    %cst_55 = arith.constant dense<0.000000e+00> : vector<64xf32>
    %61 = vector.multi_reduction <add>, %56, %cst_55 [0] : vector<64x64xf32> to vector<64xf32>
    %62 = vector.shape_cast %61 : vector<64xf32> to vector<1x64xf32>
    %cst_56 = arith.constant dense<0.000000e+00> : vector<1x16xf32>
    %63 = tpu.matmul %62, %59, %cst_56 {dimension_numbers = #tpu.dot_dimension_numbers<[1], [0], [0], [1], [0, 0, 1, 1], [], []>} : vector<1x64xf32>, vector<64x16xf32>, vector<1x16xf32> -> vector<1x16xf32>
    %cst_57 = arith.constant 3.906250e-03 : f32
    %64 = vector.broadcast %cst_57 : f32 to vector<1x16xf32>
    %65 = arith.mulf %63, %64 : vector<1x16xf32>
    %cst_58 = arith.constant dense<0.000000e+00> : vector<1x64xf32>
    %66 = tpu.matmul %65, %60, %cst_58 {dimension_numbers = #tpu.dot_dimension_numbers<[1], [0], [0], [1], [0, 0, 1, 1], [], []>} : vector<1x16xf32>, vector<16x64xf32>, vector<1x64xf32> -> vector<1x64xf32>
    %67 = vector.broadcast %66 : vector<1x64xf32> to vector<64x64xf32>
    %68 = arith.subf %56, %67 : vector<64x64xf32>
    %69 = arith.mulf %68, %68 : vector<64x64xf32>
    %cst_59 = arith.constant dense<0.000000e+00> : vector<64xf32>
    %70 = vector.multi_reduction <add>, %69, %cst_59 [0] : vector<64x64xf32> to vector<64xf32>
    %71 = vector.shape_cast %70 : vector<64xf32> to vector<1x64xf32>
    %cst_60 = arith.constant dense<0.000000e+00> : vector<1x16xf32>
    %72 = tpu.matmul %71, %59, %cst_60 {dimension_numbers = #tpu.dot_dimension_numbers<[1], [0], [0], [1], [0, 0, 1, 1], [], []>} : vector<1x64xf32>, vector<64x16xf32>, vector<1x16xf32> -> vector<1x16xf32>
    %cst_61 = arith.constant 3.906250e-03 : f32
    %73 = vector.broadcast %cst_61 : f32 to vector<1x16xf32>
    %74 = arith.mulf %72, %73 : vector<1x16xf32>
    %cst_62 = arith.constant 9.99999974E-6 : f32
    %75 = vector.broadcast %cst_62 : f32 to vector<1x16xf32>
    %76 = arith.addf %74, %75 : vector<1x16xf32>
    %77 = math.rsqrt %76 : vector<1x16xf32>
    %78 = arith.mulf %57, %77 : vector<1x16xf32>
    %cst_63 = arith.constant dense<0.000000e+00> : vector<1x64xf32>
    %79 = tpu.matmul %78, %60, %cst_63 {dimension_numbers = #tpu.dot_dimension_numbers<[1], [0], [0], [1], [0, 0, 1, 1], [], []>} : vector<1x16xf32>, vector<16x64xf32>, vector<1x64xf32> -> vector<1x64xf32>
    %80 = vector.broadcast %79 : vector<1x64xf32> to vector<64x64xf32>
    %81 = arith.mulf %68, %80 : vector<64x64xf32>
    %82 = vector.broadcast %58 : vector<1x64xf32> to vector<64x64xf32>
    %83 = arith.addf %81, %82 : vector<64x64xf32>
    %cst_64 = arith.constant 0.000000e+00 : f32
    %84 = vector.broadcast %cst_64 : f32 to vector<64x64xf32>
    %85 = arith.maximumf %83, %84 : vector<64x64xf32>
    %c0_65 = arith.constant 0 : index
    %c0_66 = arith.constant 0 : index
    %c0_67 = arith.constant 0 : index
    %86 = vector.load %arg13[%c0_65, %c0_66, %c0_67] : memref<4x64x64xf32, #tpu.memory_space<vmem>>, vector<1x64x64xf32>
    %87 = vector.shape_cast %86 : vector<1x64x64xf32> to vector<64x64xf32>
    %cst_68 = arith.constant dense<0.000000e+00> : vector<64x64xf32>
    %88 = tpu.matmul %85, %87, %cst_68 {dimension_numbers = #tpu.dot_dimension_numbers<[1], [0], [0], [1], [0, 0, 1, 1], [], []>} : vector<64x64xf32>, vector<64x64xf32>, vector<64x64xf32> -> vector<64x64xf32>
    %c0_69 = arith.constant 0 : index
    %c0_70 = arith.constant 0 : index
    %c0_71 = arith.constant 0 : index
    %89 = vector.load %arg12[%c0_69, %c0_70, %c0_71] : memref<4x128x64xf32, #tpu.memory_space<vmem>>, vector<1x128x64xf32>
    %90 = vector.shape_cast %89 : vector<1x128x64xf32> to vector<128x64xf32>
    %cst_72 = arith.constant dense<0.000000e+00> : vector<128x64xf32>
    %91 = tpu.matmul %90, %88, %cst_72 {dimension_numbers = #tpu.dot_dimension_numbers<[1], [0], [0], [1], [0, 0, 1, 1], [], []>} : vector<128x64xf32>, vector<64x64xf32>, vector<128x64xf32> -> vector<128x64xf32>
    %c1_73 = arith.constant 1 : index
    %c0_74 = arith.constant 0 : index
    %c0_75 = arith.constant 0 : index
    %92 = vector.load %arg13[%c1_73, %c0_74, %c0_75] : memref<4x64x64xf32, #tpu.memory_space<vmem>>, vector<1x64x64xf32>
    %93 = vector.shape_cast %92 : vector<1x64x64xf32> to vector<64x64xf32>
    %cst_76 = arith.constant dense<0.000000e+00> : vector<64x64xf32>
    %94 = tpu.matmul %85, %93, %cst_76 {dimension_numbers = #tpu.dot_dimension_numbers<[1], [0], [0], [1], [0, 0, 1, 1], [], []>} : vector<64x64xf32>, vector<64x64xf32>, vector<64x64xf32> -> vector<64x64xf32>
    %c1_77 = arith.constant 1 : index
    %c0_78 = arith.constant 0 : index
    %c0_79 = arith.constant 0 : index
    %95 = vector.load %arg12[%c1_77, %c0_78, %c0_79] : memref<4x128x64xf32, #tpu.memory_space<vmem>>, vector<1x128x64xf32>
    %96 = vector.shape_cast %95 : vector<1x128x64xf32> to vector<128x64xf32>
    %cst_80 = arith.constant dense<0.000000e+00> : vector<128x64xf32>
    %97 = tpu.matmul %96, %94, %cst_80 {dimension_numbers = #tpu.dot_dimension_numbers<[1], [0], [0], [1], [0, 0, 1, 1], [], []>} : vector<128x64xf32>, vector<64x64xf32>, vector<128x64xf32> -> vector<128x64xf32>
    %98 = arith.addf %91, %97 : vector<128x64xf32>
    %c2_81 = arith.constant 2 : index
    %c0_82 = arith.constant 0 : index
    %c0_83 = arith.constant 0 : index
    %99 = vector.load %arg13[%c2_81, %c0_82, %c0_83] : memref<4x64x64xf32, #tpu.memory_space<vmem>>, vector<1x64x64xf32>
    %100 = vector.shape_cast %99 : vector<1x64x64xf32> to vector<64x64xf32>
    %cst_84 = arith.constant dense<0.000000e+00> : vector<64x64xf32>
    %101 = tpu.matmul %85, %100, %cst_84 {dimension_numbers = #tpu.dot_dimension_numbers<[1], [0], [0], [1], [0, 0, 1, 1], [], []>} : vector<64x64xf32>, vector<64x64xf32>, vector<64x64xf32> -> vector<64x64xf32>
    %c2_85 = arith.constant 2 : index
    %c0_86 = arith.constant 0 : index
    %c0_87 = arith.constant 0 : index
    %102 = vector.load %arg12[%c2_85, %c0_86, %c0_87] : memref<4x128x64xf32, #tpu.memory_space<vmem>>, vector<1x128x64xf32>
    %103 = vector.shape_cast %102 : vector<1x128x64xf32> to vector<128x64xf32>
    %cst_88 = arith.constant dense<0.000000e+00> : vector<128x64xf32>
    %104 = tpu.matmul %103, %101, %cst_88 {dimension_numbers = #tpu.dot_dimension_numbers<[1], [0], [0], [1], [0, 0, 1, 1], [], []>} : vector<128x64xf32>, vector<64x64xf32>, vector<128x64xf32> -> vector<128x64xf32>
    %105 = arith.addf %98, %104 : vector<128x64xf32>
    %c3_89 = arith.constant 3 : index
    %c0_90 = arith.constant 0 : index
    %c0_91 = arith.constant 0 : index
    %106 = vector.load %arg13[%c3_89, %c0_90, %c0_91] : memref<4x64x64xf32, #tpu.memory_space<vmem>>, vector<1x64x64xf32>
    %107 = vector.shape_cast %106 : vector<1x64x64xf32> to vector<64x64xf32>
    %cst_92 = arith.constant dense<0.000000e+00> : vector<64x64xf32>
    %108 = tpu.matmul %85, %107, %cst_92 {dimension_numbers = #tpu.dot_dimension_numbers<[1], [0], [0], [1], [0, 0, 1, 1], [], []>} : vector<64x64xf32>, vector<64x64xf32>, vector<64x64xf32> -> vector<64x64xf32>
    %c3_93 = arith.constant 3 : index
    %c0_94 = arith.constant 0 : index
    %c0_95 = arith.constant 0 : index
    %109 = vector.load %arg12[%c3_93, %c0_94, %c0_95] : memref<4x128x64xf32, #tpu.memory_space<vmem>>, vector<1x128x64xf32>
    %110 = vector.shape_cast %109 : vector<1x128x64xf32> to vector<128x64xf32>
    %cst_96 = arith.constant dense<0.000000e+00> : vector<128x64xf32>
    %111 = tpu.matmul %110, %108, %cst_96 {dimension_numbers = #tpu.dot_dimension_numbers<[1], [0], [0], [1], [0, 0, 1, 1], [], []>} : vector<128x64xf32>, vector<64x64xf32>, vector<128x64xf32> -> vector<128x64xf32>
    %112 = arith.addf %105, %111 : vector<128x64xf32>
    %c0_97 = arith.constant 0 : index
    %c0_98 = arith.constant 0 : index
    %113 = vector.load %arg14[%c0_97, %c0_98] : memref<1x8xf32, #tpu.memory_space<vmem>>, vector<1x8xf32>
    %c0_99 = arith.constant 0 : index
    %c0_100 = arith.constant 0 : index
    %114 = vector.load %arg15[%c0_99, %c0_100] : memref<1x64xf32, #tpu.memory_space<vmem>>, vector<1x64xf32>
    %c0_101 = arith.constant 0 : index
    %c0_102 = arith.constant 0 : index
    %115 = vector.load %arg16[%c0_101, %c0_102] : memref<64x8xf32, #tpu.memory_space<vmem>>, vector<64x8xf32>
    %c0_103 = arith.constant 0 : index
    %c0_104 = arith.constant 0 : index
    %116 = vector.load %arg17[%c0_103, %c0_104] : memref<8x64xf32, #tpu.memory_space<vmem>>, vector<8x64xf32>
    %cst_105 = arith.constant dense<0.000000e+00> : vector<64xf32>
    %117 = vector.multi_reduction <add>, %112, %cst_105 [0] : vector<128x64xf32> to vector<64xf32>
    %118 = vector.shape_cast %117 : vector<64xf32> to vector<1x64xf32>
    %cst_106 = arith.constant dense<0.000000e+00> : vector<1x8xf32>
    %119 = tpu.matmul %118, %115, %cst_106 {dimension_numbers = #tpu.dot_dimension_numbers<[1], [0], [0], [1], [0, 0, 1, 1], [], []>} : vector<1x64xf32>, vector<64x8xf32>, vector<1x8xf32> -> vector<1x8xf32>
    %cst_107 = arith.constant 9.765625E-4 : f32
    %120 = vector.broadcast %cst_107 : f32 to vector<1x8xf32>
    %121 = arith.mulf %119, %120 : vector<1x8xf32>
    %cst_108 = arith.constant dense<0.000000e+00> : vector<1x64xf32>
    %122 = tpu.matmul %121, %116, %cst_108 {dimension_numbers = #tpu.dot_dimension_numbers<[1], [0], [0], [1], [0, 0, 1, 1], [], []>} : vector<1x8xf32>, vector<8x64xf32>, vector<1x64xf32> -> vector<1x64xf32>
    %123 = vector.broadcast %122 : vector<1x64xf32> to vector<128x64xf32>
    %124 = arith.subf %112, %123 : vector<128x64xf32>
    %125 = arith.mulf %124, %124 : vector<128x64xf32>
    %cst_109 = arith.constant dense<0.000000e+00> : vector<64xf32>
    %126 = vector.multi_reduction <add>, %125, %cst_109 [0] : vector<128x64xf32> to vector<64xf32>
    %127 = vector.shape_cast %126 : vector<64xf32> to vector<1x64xf32>
    %cst_110 = arith.constant dense<0.000000e+00> : vector<1x8xf32>
    %128 = tpu.matmul %127, %115, %cst_110 {dimension_numbers = #tpu.dot_dimension_numbers<[1], [0], [0], [1], [0, 0, 1, 1], [], []>} : vector<1x64xf32>, vector<64x8xf32>, vector<1x8xf32> -> vector<1x8xf32>
    %cst_111 = arith.constant 9.765625E-4 : f32
    %129 = vector.broadcast %cst_111 : f32 to vector<1x8xf32>
    %130 = arith.mulf %128, %129 : vector<1x8xf32>
    %cst_112 = arith.constant 9.99999974E-6 : f32
    %131 = vector.broadcast %cst_112 : f32 to vector<1x8xf32>
    %132 = arith.addf %130, %131 : vector<1x8xf32>
    %133 = math.rsqrt %132 : vector<1x8xf32>
    %134 = arith.mulf %113, %133 : vector<1x8xf32>
    %cst_113 = arith.constant dense<0.000000e+00> : vector<1x64xf32>
    %135 = tpu.matmul %134, %116, %cst_113 {dimension_numbers = #tpu.dot_dimension_numbers<[1], [0], [0], [1], [0, 0, 1, 1], [], []>} : vector<1x8xf32>, vector<8x64xf32>, vector<1x64xf32> -> vector<1x64xf32>
    %136 = vector.broadcast %135 : vector<1x64xf32> to vector<128x64xf32>
    %137 = arith.mulf %124, %136 : vector<128x64xf32>
    %138 = vector.broadcast %114 : vector<1x64xf32> to vector<128x64xf32>
    %139 = arith.addf %137, %138 : vector<128x64xf32>
    %cst_114 = arith.constant 0.000000e+00 : f32
    %140 = vector.broadcast %cst_114 : f32 to vector<128x64xf32>
    %141 = arith.maximumf %139, %140 : vector<128x64xf32>
    %c0_115 = arith.constant 0 : index
    %c0_116 = arith.constant 0 : index
    %c0_117 = arith.constant 0 : index
    %142 = vector.load %arg19[%c0_115, %c0_116, %c0_117] : memref<4x64x14xf32, #tpu.memory_space<vmem>>, vector<1x64x14xf32>
    %143 = vector.shape_cast %142 : vector<1x64x14xf32> to vector<64x14xf32>
    %cst_118 = arith.constant dense<0.000000e+00> : vector<128x14xf32>
    %144 = tpu.matmul %141, %143, %cst_118 {dimension_numbers = #tpu.dot_dimension_numbers<[1], [0], [0], [1], [0, 0, 1, 1], [], []>} : vector<128x64xf32>, vector<64x14xf32>, vector<128x14xf32> -> vector<128x14xf32>
    %c0_119 = arith.constant 0 : index
    %c0_120 = arith.constant 0 : index
    %c0_121 = arith.constant 0 : index
    %145 = vector.load %arg18[%c0_119, %c0_120, %c0_121] : memref<4x256x128xf32, #tpu.memory_space<vmem>>, vector<1x256x128xf32>
    %146 = vector.shape_cast %145 : vector<1x256x128xf32> to vector<256x128xf32>
    %cst_122 = arith.constant dense<0.000000e+00> : vector<256x14xf32>
    %147 = tpu.matmul %146, %144, %cst_122 {dimension_numbers = #tpu.dot_dimension_numbers<[1], [0], [0], [1], [0, 0, 1, 1], [], []>} : vector<256x128xf32>, vector<128x14xf32>, vector<256x14xf32> -> vector<256x14xf32>
    %c1_123 = arith.constant 1 : index
    %c0_124 = arith.constant 0 : index
    %c0_125 = arith.constant 0 : index
    %148 = vector.load %arg19[%c1_123, %c0_124, %c0_125] : memref<4x64x14xf32, #tpu.memory_space<vmem>>, vector<1x64x14xf32>
    %149 = vector.shape_cast %148 : vector<1x64x14xf32> to vector<64x14xf32>
    %cst_126 = arith.constant dense<0.000000e+00> : vector<128x14xf32>
    %150 = tpu.matmul %141, %149, %cst_126 {dimension_numbers = #tpu.dot_dimension_numbers<[1], [0], [0], [1], [0, 0, 1, 1], [], []>} : vector<128x64xf32>, vector<64x14xf32>, vector<128x14xf32> -> vector<128x14xf32>
    %c1_127 = arith.constant 1 : index
    %c0_128 = arith.constant 0 : index
    %c0_129 = arith.constant 0 : index
    %151 = vector.load %arg18[%c1_127, %c0_128, %c0_129] : memref<4x256x128xf32, #tpu.memory_space<vmem>>, vector<1x256x128xf32>
    %152 = vector.shape_cast %151 : vector<1x256x128xf32> to vector<256x128xf32>
    %cst_130 = arith.constant dense<0.000000e+00> : vector<256x14xf32>
    %153 = tpu.matmul %152, %150, %cst_130 {dimension_numbers = #tpu.dot_dimension_numbers<[1], [0], [0], [1], [0, 0, 1, 1], [], []>} : vector<256x128xf32>, vector<128x14xf32>, vector<256x14xf32> -> vector<256x14xf32>
    %154 = arith.addf %147, %153 : vector<256x14xf32>
    %c2_131 = arith.constant 2 : index
    %c0_132 = arith.constant 0 : index
    %c0_133 = arith.constant 0 : index
    %155 = vector.load %arg19[%c2_131, %c0_132, %c0_133] : memref<4x64x14xf32, #tpu.memory_space<vmem>>, vector<1x64x14xf32>
    %156 = vector.shape_cast %155 : vector<1x64x14xf32> to vector<64x14xf32>
    %cst_134 = arith.constant dense<0.000000e+00> : vector<128x14xf32>
    %157 = tpu.matmul %141, %156, %cst_134 {dimension_numbers = #tpu.dot_dimension_numbers<[1], [0], [0], [1], [0, 0, 1, 1], [], []>} : vector<128x64xf32>, vector<64x14xf32>, vector<128x14xf32> -> vector<128x14xf32>
    %c2_135 = arith.constant 2 : index
    %c0_136 = arith.constant 0 : index
    %c0_137 = arith.constant 0 : index
    %158 = vector.load %arg18[%c2_135, %c0_136, %c0_137] : memref<4x256x128xf32, #tpu.memory_space<vmem>>, vector<1x256x128xf32>
    %159 = vector.shape_cast %158 : vector<1x256x128xf32> to vector<256x128xf32>
    %cst_138 = arith.constant dense<0.000000e+00> : vector<256x14xf32>
    %160 = tpu.matmul %159, %157, %cst_138 {dimension_numbers = #tpu.dot_dimension_numbers<[1], [0], [0], [1], [0, 0, 1, 1], [], []>} : vector<256x128xf32>, vector<128x14xf32>, vector<256x14xf32> -> vector<256x14xf32>
    %161 = arith.addf %154, %160 : vector<256x14xf32>
    %c3_139 = arith.constant 3 : index
    %c0_140 = arith.constant 0 : index
    %c0_141 = arith.constant 0 : index
    %162 = vector.load %arg19[%c3_139, %c0_140, %c0_141] : memref<4x64x14xf32, #tpu.memory_space<vmem>>, vector<1x64x14xf32>
    %163 = vector.shape_cast %162 : vector<1x64x14xf32> to vector<64x14xf32>
    %cst_142 = arith.constant dense<0.000000e+00> : vector<128x14xf32>
    %164 = tpu.matmul %141, %163, %cst_142 {dimension_numbers = #tpu.dot_dimension_numbers<[1], [0], [0], [1], [0, 0, 1, 1], [], []>} : vector<128x64xf32>, vector<64x14xf32>, vector<128x14xf32> -> vector<128x14xf32>
    %c3_143 = arith.constant 3 : index
    %c0_144 = arith.constant 0 : index
    %c0_145 = arith.constant 0 : index
    %165 = vector.load %arg18[%c3_143, %c0_144, %c0_145] : memref<4x256x128xf32, #tpu.memory_space<vmem>>, vector<1x256x128xf32>
    %166 = vector.shape_cast %165 : vector<1x256x128xf32> to vector<256x128xf32>
    %cst_146 = arith.constant dense<0.000000e+00> : vector<256x14xf32>
    %167 = tpu.matmul %166, %164, %cst_146 {dimension_numbers = #tpu.dot_dimension_numbers<[1], [0], [0], [1], [0, 0, 1, 1], [], []>} : vector<256x128xf32>, vector<128x14xf32>, vector<256x14xf32> -> vector<256x14xf32>
    %168 = arith.addf %161, %167 : vector<256x14xf32>
    %169 = arith.negf %168 : vector<256x14xf32>
    %170 = math.exp %169 : vector<256x14xf32>
    %cst_147 = arith.constant 1.000000e+00 : f32
    %171 = vector.broadcast %cst_147 : f32 to vector<256x14xf32>
    %172 = arith.addf %171, %170 : vector<256x14xf32>
    %173 = arith.divf %171, %172 : vector<256x14xf32>
    %c0_148 = arith.constant 0 : index
    %c0_149 = arith.constant 0 : index
    %174 = vector.load %arg20[%c0_148, %c0_149] : memref<256x14xf32, #tpu.memory_space<vmem>>, vector<256x14xf32>
    tpu.vector_store %arg20[%c0_148, %c0_149], %173 {strides = array<i32>} : memref<256x14xf32, #tpu.memory_space<vmem>>, vector<256x14xf32>,
    return
  }
  func.func @transform_0(%arg0: i32) -> (i32, i32) {
    %c0_i32 = arith.constant 0 : i32
    %c0_i32_0 = arith.constant 0 : i32
    %c0_i32_1 = arith.constant 0 : i32
    return %c0_i32, %c0_i32_0 : i32, i32
  }
  func.func @transform_1(%arg0: i32) -> (i32, i32) {
    %c0_i32 = arith.constant 0 : i32
    %c0_i32_0 = arith.constant 0 : i32
    %c0_i32_1 = arith.constant 0 : i32
    return %c0_i32, %c0_i32_0 : i32, i32
  }
  func.func @transform_2(%arg0: i32) -> (i32, i32) {
    %c0_i32 = arith.constant 0 : i32
    %c0_i32_0 = arith.constant 0 : i32
    %c0_i32_1 = arith.constant 0 : i32
    return %c0_i32, %c0_i32_0 : i32, i32
  }
  func.func @transform_3(%arg0: i32) -> (i32, i32) {
    %c0_i32 = arith.constant 0 : i32
    %c0_i32_0 = arith.constant 0 : i32
    %c0_i32_1 = arith.constant 0 : i32
    return %c0_i32, %c0_i32_0 : i32, i32
  }
  func.func @transform_4(%arg0: i32) -> (i32, i32) {
    %c0_i32 = arith.constant 0 : i32
    %c0_i32_0 = arith.constant 0 : i32
    %c0_i32_1 = arith.constant 0 : i32
    return %c0_i32, %c0_i32_0 : i32, i32
  }
  func.func @transform_5(%arg0: i32) -> (i32, i32, i32) {
    %c0_i32 = arith.constant 0 : i32
    %c0_i32_0 = arith.constant 0 : i32
    %c0_i32_1 = arith.constant 0 : i32
    %c0_i32_2 = arith.constant 0 : i32
    return %c0_i32, %c0_i32_0, %c0_i32_1 : i32, i32, i32
  }
  func.func @transform_6(%arg0: i32) -> (i32, i32, i32) {
    %c0_i32 = arith.constant 0 : i32
    %c0_i32_0 = arith.constant 0 : i32
    %c0_i32_1 = arith.constant 0 : i32
    %c0_i32_2 = arith.constant 0 : i32
    return %c0_i32, %c0_i32_0, %c0_i32_1 : i32, i32, i32
  }
  func.func @transform_7(%arg0: i32) -> (i32, i32) {
    %c0_i32 = arith.constant 0 : i32
    %c0_i32_0 = arith.constant 0 : i32
    %c0_i32_1 = arith.constant 0 : i32
    return %c0_i32, %c0_i32_0 : i32, i32
  }
  func.func @transform_8(%arg0: i32) -> (i32, i32) {
    %c0_i32 = arith.constant 0 : i32
    %c0_i32_0 = arith.constant 0 : i32
    %c0_i32_1 = arith.constant 0 : i32
    return %c0_i32, %c0_i32_0 : i32, i32
  }
  func.func @transform_9(%arg0: i32) -> (i32, i32) {
    %c0_i32 = arith.constant 0 : i32
    %c0_i32_0 = arith.constant 0 : i32
    %c0_i32_1 = arith.constant 0 : i32
    return %c0_i32, %c0_i32_0 : i32, i32
  }
  func.func @transform_10(%arg0: i32) -> (i32, i32) {
    %c0_i32 = arith.constant 0 : i32
    %c0_i32_0 = arith.constant 0 : i32
    %c0_i32_1 = arith.constant 0 : i32
    return %c0_i32, %c0_i32_0 : i32, i32
  }
  func.func @transform_11(%arg0: i32) -> (i32, i32, i32) {
    %c0_i32 = arith.constant 0 : i32
    %c0_i32_0 = arith.constant 0 : i32
    %c0_i32_1 = arith.constant 0 : i32
    %c0_i32_2 = arith.constant 0 : i32
    return %c0_i32, %c0_i32_0, %c0_i32_1 : i32, i32, i32
  }
  func.func @transform_12(%arg0: i32) -> (i32, i32, i32) {
    %c0_i32 = arith.constant 0 : i32
    %c0_i32_0 = arith.constant 0 : i32
    %c0_i32_1 = arith.constant 0 : i32
    %c0_i32_2 = arith.constant 0 : i32
    return %c0_i32, %c0_i32_0, %c0_i32_1 : i32, i32, i32
  }
  func.func @transform_13(%arg0: i32) -> (i32, i32) {
    %c0_i32 = arith.constant 0 : i32
    %c0_i32_0 = arith.constant 0 : i32
    %c0_i32_1 = arith.constant 0 : i32
    return %c0_i32, %c0_i32_0 : i32, i32
  }
  func.func @transform_14(%arg0: i32) -> (i32, i32) {
    %c0_i32 = arith.constant 0 : i32
    %c0_i32_0 = arith.constant 0 : i32
    %c0_i32_1 = arith.constant 0 : i32
    return %c0_i32, %c0_i32_0 : i32, i32
  }
  func.func @transform_15(%arg0: i32) -> (i32, i32) {
    %c0_i32 = arith.constant 0 : i32
    %c0_i32_0 = arith.constant 0 : i32
    %c0_i32_1 = arith.constant 0 : i32
    return %c0_i32, %c0_i32_0 : i32, i32
  }
  func.func @transform_16(%arg0: i32) -> (i32, i32) {
    %c0_i32 = arith.constant 0 : i32
    %c0_i32_0 = arith.constant 0 : i32
    %c0_i32_1 = arith.constant 0 : i32
    return %c0_i32, %c0_i32_0 : i32, i32
  }
  func.func @transform_17(%arg0: i32) -> (i32, i32, i32) {
    %c0_i32 = arith.constant 0 : i32
    %c0_i32_0 = arith.constant 0 : i32
    %c0_i32_1 = arith.constant 0 : i32
    %c0_i32_2 = arith.constant 0 : i32
    return %c0_i32, %c0_i32_0, %c0_i32_1 : i32, i32, i32
  }
  func.func @transform_18(%arg0: i32) -> (i32, i32, i32) {
    %c0_i32 = arith.constant 0 : i32
    %c0_i32_0 = arith.constant 0 : i32
    %c0_i32_1 = arith.constant 0 : i32
    %c0_i32_2 = arith.constant 0 : i32
    return %c0_i32, %c0_i32_0, %c0_i32_1 : i32, i32, i32
  }
  func.func @transform_19(%arg0: i32) -> (i32, i32) {
    %c0_i32 = arith.constant 0 : i32
    %c0_i32_0 = arith.constant 0 : i32
    %c0_i32_1 = arith.constant 0 : i32
    return %c0_i32, %c0_i32_0 : i32, i32
  }
}

</mosaic_0001>

<bundles_post_ra>
// kernel: _lambda_.1
= control target key start
LH: loop header
LB: loop body
LE: loop exit
PB: predicated region body
PF: predicated region fallthrough
CT: control target
= control target key end

     0   :  { %s6261_s0 = inlined_call_operand.vmem [shape: f32[32,64], index: 0, kind: input, shape index: {}]   ;;  %s6262_s1 = inlined_call_operand.vmem [shape: f32[1,32], index: 1, kind: input, shape index: {}]   ;;  %s6263_s2 = inlined_call_operand.vmem [shape: f32[1,64], index: 2, kind: input, shape index: {}]   ;;  %s6264_s3 = inlined_call_operand.vmem [shape: f32[64,32], index: 3, kind: input, shape index: {}]   ;;  %s6265_s4 = inlined_call_operand.vmem [shape: f32[32,64], index: 4, kind: input, shape index: {}]   ;;  %s6266_s5 = inlined_call_operand.vmem [shape: f32[4,64,32], index: 5, kind: input, shape index: {}]   ;;  %s6267_s6 = inlined_call_operand.vmem [shape: f32[4,64,64], index: 6, kind: input, shape index: {}]   ;;  %s6268_s7 = inlined_call_operand.vmem [shape: f32[1,16], index: 7, kind: input, shape index: {}]   ;;  %s6269_s8 = inlined_call_operand.vmem [shape: f32[1,64], index: 8, kind: input, shape index: {}]   ;;  %s6270_s9 = inlined_call_operand.vmem [shape: f32[64,16], index: 9, kind: input, shape index: {}]   ;;  %s6271_s10 = inlined_call_operand.vmem [shape: f32[16,64], index: 10, kind: input, shape index: {}]   ;;  %s6272_s11 = inlined_call_operand.vmem [shape: f32[4,128,64], index: 11, kind: input, shape index: {}]   ;;  %s6273_s12 = inlined_call_operand.vmem [shape: f32[4,64,64], index: 12, kind: input, shape index: {}]   ;;  %s6274_s13 = inlined_call_operand.vmem [shape: f32[1,8], index: 13, kind: input, shape index: {}]   ;;  %s6275_s14 = inlined_call_operand.vmem [shape: f32[1,64], index: 14, kind: input, shape index: {}]   ;;  %s6276_s15 = inlined_call_operand.vmem [shape: f32[64,8], index: 15, kind: input, shape index: {}]   ;;  %s6277_s16 = inlined_call_operand.vmem [shape: f32[8,64], index: 16, kind: input, shape index: {}]   ;;  %s6278_s17 = inlined_call_operand.hbm [shape: f32[4,256,128], index: 17, kind: input, shape index: {}]   ;;  %s6279_s18 = inlined_call_operand.vmem [shape: f32[4,64,14], index: 18, kind: input, shape index: {}]   ;;  %s6280_s19 = inlined_call_operand.vmem [shape: f32[256,14], index: 19, kind: output, shape index: {}]  }
   0x1   :  { %6283 = sst [smem:[#allocation5_spill]] %s6261_s0 }
   0x2   :  { %6284 = sst [smem:[#allocation6_spill]] %s6262_s1 }
   0x3   :  { %6285 = sst [smem:[#allocation7_spill]] %s6263_s2 }
   0x4   :  { %6286 = sst [smem:[#allocation8_spill]] %s6264_s3 }
   0x5   :  { %24 = vsyncpa [#allocation3], 0  ;;  %s63_s20 = sshll.u32 %s6278_s17, 4  ;;  %s4204_s21 = smov [#allocation2]   ;;  %s64_s20 = int_to_ptr.hbm [resolvable:$true] %s63_s20 }
   0x6   :  { %s65_s1 = sshll.u32 %s4204_s21, 4  ;;  %s4205_s22 = smov 128   ;;  %s66_s1 = int_to_ptr.vmem [resolvable:$true] %s65_s1 }
   0x7   :  { %s4206_s2 = smov 8  }
   0x8   :  { %71 = dma.hbm_to_vmem [thread:$0]  %s64_s20, 16384, %s66_s1, [#allocation3], %s4205_s22, %s4205_s22, %s4206_s2  }
   0x9   :  { %4202 = dma.done.wait [#allocation3], 16384  }
   0xa   :  { %4203 = vsyncadd [#allocation3], 4294950912  ;;  %s6287_s25 = sld [smem:[#allocation8_spill]]  ;;  %vm96_vm0 = vcmask 523264   ;;  %v95_v11 = vld [vmem:[%s6265_s4 + $0x18] sm:$0xff]  ;;  %v94_v12 = vld [vmem:[%s6265_s4 + $0x10] sm:$0xff] }
   0xb   :  { %s6288_s0 = sld [smem:[#allocation5_spill]]  ;;  %150 = vmatpush.msra.mxu1 %v95_v11  ;;  %231 = vmatpush.msra.mxu3 %v95_v11  ;;  %v93_v27 = vld [vmem:[%s6265_s4 + $0x8] sm:$0xff]  ;;  %v92_v28 = vld [vmem:[%s6265_s4] sm:$0xff]  ;;  %vm134_vm1 = vcmask 261120   ;;  %v262_v54 = vld [vmem:[%s6267_s6 + $0x38] sm:$0xff]  ;;  %vm786_vm5 = vcmask 130048  }
   0xc   :  { %v3637_v55 = vld [vmem:[%s6267_s6 + $0x78] sm:$0xff]  ;;  %v261_v56 = vld [vmem:[%s6267_s6 + $0x30] sm:$0xff]  ;;  %v260_v58 = vld [vmem:[%s6267_s6 + $0x28] sm:$0xff]  ;;  %s6289_s23 = sld [smem:[#allocation6_spill]]  ;;  %vm1781_vm9 = vcmask 64512  }
   0xd   :  { %151 = vmatpush.msra.mxu1 %v94_v12  ;;  %232 = vmatpush.msra.mxu3 %v94_v12  ;;  %v3636_v57 = vld [vmem:[%s6267_s6 + $0x70] sm:$0xff]  ;;  %v3635_v59 = vld [vmem:[%s6267_s6 + $0x68] sm:$0xff]  ;;  %v3633_v11 = vld [vmem:[%s6267_s6 + $0x58] sm:$0xff]  ;;  %s6290_s26 = sld [smem:[#allocation7_spill]] }
   0xe   :  { %v257_v12 = vld [vmem:[%s6267_s6 + $0x10] sm:$0xff] }
   0xf   :  { %152 = vmatpush.msra.mxu1 %v93_v27  ;;  %233 = vmatpush.msra.mxu3 %v93_v27 }
  0x10   :  { %v91_v0 = vld [vmem:[%s6287_s25 + $0x38] sm:$0xff]  ;;  %v90_v1 = vld [vmem:[%s6287_s25 + $0x30] sm:$0xff]  ;;  %v89_v2 = vld [vmem:[%s6287_s25 + $0x28] sm:$0xff] }
  0x11   :  { %121 = vmatpush.msra.mxu0 %v91_v0  ;;  %191 = vmatpush.msra.mxu2 %v91_v0  ;;  %v78_v3 = vld [vmem:[%s6288_s0] sm:$0xff]  ;;  %v79_v4 = vld [vmem:[%s6288_s0 + $0x8] sm:$0xff]  ;;  %v80_v5 = vld [vmem:[%s6288_s0 + $0x10] sm:$0xff] }
  0x12   :  { %v81_v6 = vld [vmem:[%s6288_s0 + $0x18] sm:$0xff]  ;;  %v97_v7 = vsel %vm96_vm0, %v78_v3, 0.0  ;;  %v88_v8 = vld [vmem:[%s6287_s25 + $0x20] sm:$0xff]  ;;  %v98_v9 = vsel %vm96_vm0, %v79_v4, 0.0  ;;  %v100_v10 = vsel %vm96_vm0, %v80_v5, 0.0  ;;  %v86_v17 = vld [vmem:[%s6287_s25 + $0x10] sm:$0xff]  ;;  %153 = vmatpush.msra.mxu1 %v92_v28  ;;  %234 = vmatpush.msra.mxu3 %v92_v28 }
  0x13   :  { %122 = vmatpush.msra.mxu0 %v90_v1  ;;  %192 = vmatpush.msra.mxu2 %v90_v1  ;;  %v99_v13 = vadd.f32 %v98_v9, %v97_v7  ;;  %v87_v14 = vld [vmem:[%s6287_s25 + $0x18] sm:$0xff]  ;;  %v102_v15 = vsel %vm96_vm0, %v81_v6, 0.0  ;;  %v85_v19 = vld [vmem:[%s6287_s25 + $0x8] sm:$0xff]  ;;  %v84_v21 = vld [vmem:[%s6287_s25] sm:$0xff] }
  0x14   :  { %283 = vmatpush.msrb.mxu1 %v262_v54  ;;  %329 = vmatpush.msrb.mxu3 %v3637_v55  ;;  %v3634_v9 = vld [vmem:[%s6267_s6 + $0x60] sm:$0xff] }
  0x15   :  { %123 = vmatpush.msra.mxu0 %v89_v2  ;;  %193 = vmatpush.msra.mxu2 %v89_v2  ;;  %v101_v16 = vadd.f32 %v100_v10, %v99_v13  ;;  %v258_v10 = vld [vmem:[%s6267_s6 + $0x18] sm:$0xff]  ;;  %v3632_v13 = vld [vmem:[%s6267_s6 + $0x50] sm:$0xff]  ;;  %v4041_v28 = vld [vmem:[%s6290_s26] ss:$0 sm:$0xff] }
  0x16   :  { %284 = vmatpush.msrb.mxu1 %v261_v56  ;;  %330 = vmatpush.msrb.mxu3 %v3636_v57  ;;  %v3646_v55 = vld [vmem:[%s6266_s5 + $0x60] sm:$0xff]  ;;  %v3701_v57 = vld [vmem:[%s6267_s6 + $0xf8] sm:$0xff] }
  0x17   :  { %124 = vmatpush.msra.mxu0 %v88_v8  ;;  %194 = vmatpush.msra.mxu2 %v88_v8  ;;  %v103_v18 = vadd.f32 %v102_v15, %v101_v16  ;;  %v259_v8 = vld [vmem:[%s6267_s6 + $0x20] sm:$0xff]  ;;  %v3631_v15 = vld [vmem:[%s6267_s6 + $0x48] sm:$0xff] }
  0x18   :  { %285 = vmatpush.msrb.mxu1 %v260_v58  ;;  %331 = vmatpush.msrb.mxu3 %v3635_v59  ;;  %v255_v16 = vld [vmem:[%s6267_s6] sm:$0xff] }
  0x19   :  { %125 = vmatpush.msra.mxu0 %v87_v14  ;;  %195 = vmatpush.msra.mxu2 %v87_v14  ;;  %v104_v20 = vrot.slane %v103_v18, 4  ;;  %v256_v14 = vld [vmem:[%s6267_s6 + $0x8] sm:$0xff] }
  0x1a   :  { %286 = vmatpush.msrb.mxu1 %v259_v8  ;;  %332 = vmatpush.msrb.mxu3 %v3634_v9  ;;  %v3678_v9 = vld [vmem:[%s6266_s5 + $0x80] sm:$0xff] }
  0x1b   :  { %126 = vmatpush.msra.mxu0 %v86_v17  ;;  %196 = vmatpush.msra.mxu2 %v86_v17  ;;  %v105_v22 = vadd.f32 %v104_v20, %v103_v18  ;;  %v3630_v17 = vld [vmem:[%s6267_s6 + $0x40] sm:$0xff]  ;;  %v3673_v18 = vld [vmem:[%s6267_s6 + $0xb8] sm:$0xff]  ;;  %v3671_v20 = vld [vmem:[%s6267_s6 + $0xa8] sm:$0xff] }
  0x1c   :  { %287 = vmatpush.msrb.mxu1 %v258_v10  ;;  %333 = vmatpush.msrb.mxu3 %v3633_v11  ;;  %v3680_v11 = vld [vmem:[%s6266_s5 + $0x90] sm:$0xff] }
  0x1d   :  { %127 = vmatpush.msra.mxu0 %v85_v19  ;;  %197 = vmatpush.msra.mxu2 %v85_v19  ;;  %v106_v23 = vrot.slane %v105_v22, 2  ;;  %v3672_v19 = vld [vmem:[%s6267_s6 + $0xb0] sm:$0xff] }
  0x1e   :  { %288 = vmatpush.msrb.mxu1 %v257_v12  ;;  %334 = vmatpush.msrb.mxu3 %v3632_v13  ;;  %v308_v13 = vld [vmem:[%s6266_s5 + $0x20] sm:$0xff] }
  0x1f   :  { %128 = vmatpush.msra.mxu0 %v84_v21  ;;  %198 = vmatpush.msra.mxu2 %v84_v21  ;;  %v107_v24 = vadd.f32 %v106_v23, %v105_v22  ;;  %v3670_v21 = vld [vmem:[%s6267_s6 + $0xa0] sm:$0xff]  ;;  %v3669_v22 = vld [vmem:[%s6267_s6 + $0x98] sm:$0xff]  ;;  %v3668_v23 = vld [vmem:[%s6267_s6 + $0x90] sm:$0xff] }
  0x20   :  { %289 = vmatpush.msrb.mxu1 %v256_v14  ;;  %335 = vmatpush.msrb.mxu3 %v3631_v15  ;;  %v309_v15 = vld [vmem:[%s6266_s5 + $0x28] sm:$0xff] }
  0x21   :  { %v108_v25 = vrot.slane %v107_v24, 1  ;;  %4018 = vmatpush.msrb.mxu2 %v262_v54  ;;  %v3642_v54 = vld [vmem:[%s6266_s5 + $0x40] sm:$0xff] }
  0x22   :  { %290 = vmatpush.msrb.mxu1 %v255_v16  ;;  %336 = vmatpush.msrb.mxu3 %v3630_v17  ;;  %v3683_v17 = vld [vmem:[%s6266_s5 + $0xa8] sm:$0xff] }
  0x23   :  { %v109_v26 = vadd.f32 %v108_v25, %v107_v24  ;;  %4019 = vmatpush.msrb.mxu2 %v261_v56  ;;  %v3667_v24 = vld [vmem:[%s6267_s6 + $0x88] sm:$0xff]  ;;  %v3666_v25 = vld [vmem:[%s6267_s6 + $0x80] sm:$0xff]  ;;  %v306_v56 = vld [vmem:[%s6266_s5 + $0x10] sm:$0xff] }
  0x25   :  { %3622 = vmatmul.msk.f32.vlgmr.msra.gmra.mxu0 %vm96_vm0, %v109_v26  ;;  %4020 = vmatpush.msrb.mxu2 %v260_v58  ;;  %v3700_v58 = vld [vmem:[%s6267_s6 + $0xf0] sm:$0xff] }
  0x27   :  { %4021 = vmatpush.msrb.mxu2 %v259_v8  ;;  %v3649_v8 = vld [vmem:[%s6266_s5 + $0x78] sm:$0xff] }
  0x29   :  { %4022 = vmatpush.msrb.mxu2 %v258_v10  ;;  %v3679_v10 = vld [vmem:[%s6266_s5 + $0x88] sm:$0xff] }
  0x2b   :  { %4023 = vmatpush.msrb.mxu2 %v257_v12  ;;  %v3681_v12 = vld [vmem:[%s6266_s5 + $0x98] sm:$0xff] }
  0x2d   :  { %4024 = vmatpush.msrb.mxu2 %v256_v14  ;;  %v3682_v14 = vld [vmem:[%s6266_s5 + $0xa0] sm:$0xff] }
  0x2f   :  { %4025 = vmatpush.msrb.mxu2 %v255_v16 }
  0xa2   :  { %v130_v29 = vpop.f32.mrf.mxu0 }
  0xa3   :  { %v133_v30 = vmul.f32 0.015625, %v130_v29 }
  0xa5   :  { %3623 = vmatmul.msk.f32.vlgmr.msra.gmra.mxu1 %vm134_vm1, %v133_v30 }
  0xa6   :  { %506 = vmatpush.msra.mxu1 %v3673_v18  ;;  %v310_v18 = vld [vmem:[%s6266_s5 + $0x30] sm:$0xff] }
  0xa8   :  { %507 = vmatpush.msra.mxu1 %v3672_v19 }
  0xaa   :  { %508 = vmatpush.msra.mxu1 %v3671_v20  ;;  %v3684_v20 = vld [vmem:[%s6266_s5 + $0xb0] sm:$0xff] }
  0xac   :  { %509 = vmatpush.msra.mxu1 %v3670_v21  ;;  %v311_v21 = vld [vmem:[%s6266_s5 + $0x38] sm:$0xff] }
  0xae   :  { %510 = vmatpush.msra.mxu1 %v3669_v22 }
  0xb0   :  { %511 = vmatpush.msra.mxu1 %v3668_v23  ;;  %v3685_v23 = vld [vmem:[%s6266_s5 + $0xb8] sm:$0xff] }
  0xb2   :  { %512 = vmatpush.msra.mxu1 %v3667_v24 }
  0xb4   :  { %513 = vmatpush.msra.mxu1 %v3666_v25 }
 0x122   :  { %v155_v31 = vpop.f32.mrf.mxu1 }
 0x123   :  { %v158_v32 = vperm.slane %v155_v31, 0 }
 0x125   :  { %v4364_v33 = vsub.f32 %v78_v3, %v158_v32  ;;  %v4366_v34 = vsub.f32 %v79_v4, %v158_v32  ;;  %v4368_v35 = vsub.f32 %v80_v5, %v158_v32  ;;  %v4370_v36 = vsub.f32 %v81_v6, %v158_v32  ;;  %v82_v4 = vld [vmem:[%s6289_s23] sm:$0x1] }
 0x127   :  { %v163_v37 = vmul.f32 %v4364_v33, %v4364_v33  ;;  %v164_v38 = vmul.f32 %v4366_v34, %v4366_v34  ;;  %v165_v39 = vmul.f32 %v4368_v35, %v4368_v35  ;;  %v166_v40 = vmul.f32 %v4370_v36, %v4370_v36 }
 0x129   :  { %v167_v41 = vsel %vm96_vm0, %v163_v37, 0.0  ;;  %v168_v42 = vsel %vm96_vm0, %v164_v38, 0.0  ;;  %v170_v44 = vsel %vm96_vm0, %v165_v39, 0.0  ;;  %v172_v46 = vsel %vm96_vm0, %v166_v40, 0.0 }
 0x12a   :  { %v169_v43 = vadd.f32 %v168_v42, %v167_v41 }
 0x12c   :  { %v171_v45 = vadd.f32 %v170_v44, %v169_v43 }
 0x12e   :  { %v173_v47 = vadd.f32 %v172_v46, %v171_v45 }
 0x130   :  { %v174_v48 = vrot.slane %v173_v47, 4 }
 0x132   :  { %v175_v49 = vadd.f32 %v174_v48, %v173_v47  ;;  %v304_v48 = vld [vmem:[%s6266_s5] sm:$0xff] }
 0x134   :  { %v176_v50 = vrot.slane %v175_v49, 2 }
 0x136   :  { %v177_v51 = vadd.f32 %v176_v50, %v175_v49 }
 0x138   :  { %v178_v52 = vrot.slane %v177_v51, 1 }
 0x13a   :  { %v179_v53 = vadd.f32 %v178_v52, %v177_v51  ;;  %v305_v51 = vld [vmem:[%s6266_s5 + $0x8] sm:$0xff] }
 0x13c   :  { %3624 = vmatmul.msk.f32.vlgmr.msra.gmra.mxu2 %vm96_vm0, %v179_v53 }
 0x1bf   :  { %v200_v60 = vpop.f32.mrf.mxu2 }
 0x1c0   :  { %v203_v61 = vmul.f32 0.015625, %v200_v60  ;;  %v3699_v60 = vld [vmem:[%s6267_s6 + $0xe8] sm:$0xff] }
 0x1c2   :  { %v204_v62 = vadd.f32 1e-05, %v203_v61  ;;  %v3698_v61 = vld [vmem:[%s6267_s6 + $0xe0] sm:$0xff] }
 0x1c4   :  { %4044 = vrsqrt.f32 %v204_v62  ;;  %vm211_vm3 = vweird.f32 %v204_v62 }
 0x1ca   :  { %v4045_v63 = vpop.eup %4044 }
 0x1cb   :  { %v206_v0 = vmul.f32 %v4045_v63, %v204_v62  ;;  %vm212_vm2 = vweird.f32 %v4045_v63  ;;  %v3643_v62 = vld [vmem:[%s6266_s5 + $0x48] sm:$0xff] }
 0x1cc   :  { %vm213_vm4 = vmor %vm211_vm3, %vm212_vm2 }
 0x1cd   :  { %v207_v1 = vmul.f32 %v4045_v63, %v206_v0  ;;  %v307_v0 = vld [vmem:[%s6266_s5 + $0x18] sm:$0xff] }
 0x1cf   :  { %v208_v2 = vmul.f32 0.5, %v207_v1  ;;  %v3697_v1 = vld [vmem:[%s6267_s6 + $0xd8] sm:$0xff] }
 0x1d1   :  { %v209_v3 = vsub.f32 1.5, %v208_v2  ;;  %v3696_v2 = vld [vmem:[%s6267_s6 + $0xd0] sm:$0xff] }
 0x1d3   :  { %v210_v5 = vmul.f32 %v4045_v63, %v209_v3  ;;  %v3695_v3 = vld [vmem:[%s6267_s6 + $0xc8] sm:$0xff] }
 0x1d5   :  { %v214_v6 = vsel %vm213_vm4, %v4045_v63, %v210_v5  ;;  %v3647_v63 = vld [vmem:[%s6266_s5 + $0x68] sm:$0xff]  ;;  %v3648_v5 = vld [vmem:[%s6266_s5 + $0x70] sm:$0xff] }
 0x1d6   :  { %v215_v7 = vmul.f32 %v214_v6, %v82_v4  ;;  %v3644_v4 = vld [vmem:[%s6266_s5 + $0x50] sm:$0xff]  ;;  %v3694_v6 = vld [vmem:[%s6267_s6 + $0xc0] sm:$0xff] }
 0x1d8   :  { %3625 = vmatmul.msk.f32.vlgmr.msra.gmra.mxu3 %vm134_vm1, %v215_v7  ;;  %v3645_v7 = vld [vmem:[%s6266_s5 + $0x58] sm:$0xff] }
 0x25b   :  { %v236_v26 = vpop.f32.mrf.mxu3 }
 0x25c   :  { %v239_v27 = vperm.slane %v236_v26, 0 }
 0x25e   :  { %v240_v29 = vmul.f32 %v239_v27, %v4364_v33  ;;  %v242_v30 = vmul.f32 %v239_v27, %v4368_v35  ;;  %v241_v37 = vmul.f32 %v239_v27, %v4366_v34  ;;  %v243_v38 = vmul.f32 %v239_v27, %v4370_v36 }
 0x260   :  { %v247_v31 = vadd.f32 %v4041_v28, %v240_v29  ;;  %v249_v32 = vadd.f32 %v4041_v28, %v242_v30  ;;  %v248_v33 = vadd.f32 %v4041_v28, %v241_v37  ;;  %v250_v35 = vadd.f32 %v4041_v28, %v243_v38  ;;  %v3706_v29 = vld [vmem:[%s6266_s5 + $0xc0] sm:$0xff]  ;;  %v3707_v30 = vld [vmem:[%s6266_s5 + $0xc8] sm:$0xff] }
 0x261   :  { %v3710_v37 = vld [vmem:[%s6266_s5 + $0xe0] sm:$0xff]  ;;  %v3711_v38 = vld [vmem:[%s6266_s5 + $0xe8] sm:$0xff] }
 0x262   :  { %v4468_v39 = vmax.f32 %v247_v31, 0.0  ;;  %v4470_v40 = vmax.f32 %v249_v32, 0.0  ;;  %v4478_v41 = vmax.f32 %v248_v33, 0.0  ;;  %v4480_v34 = vmax.f32 %v250_v35, 0.0  ;;  %v3708_v31 = vld [vmem:[%s6266_s5 + $0xd0] sm:$0xff]  ;;  %v3709_v32 = vld [vmem:[%s6266_s5 + $0xd8] sm:$0xff] }
 0x264   :  { %3626 = vmatmul.msk.f32.vlgmr.msrb.gmra.mxu1 %vm96_vm0, %v4468_v39  ;;  %3628 = vmatmul.msk.f32.vlgmr.msrb.gmra.mxu2 %vm96_vm0, %v4470_v40 }
 0x265   :  { %3638 = vmatmul.msk.f32.vlgmr.msrb.gmra.mxu3 %vm96_vm0, %v4468_v39 }
 0x26c   :  { %3627 = vmatmul.msk.f32.gmra.mxu1 %vm96_vm0, %v4478_v41  ;;  %3629 = vmatmul.msk.f32.gmra.mxu2 %vm96_vm0, %v4480_v34 }
 0x26d   :  { %3639 = vmatmul.msk.f32.gmra.mxu3 %vm96_vm0, %v4478_v41 }
 0x274   :  { %3674 = vmatmul.msk.f32.vlgmr.msra.gmra.mxu1 %vm96_vm0, %v4468_v39 }
 0x275   :  { %3640 = vmatmul.msk.f32.gmra.mxu3 %vm96_vm0, %v4470_v40 }
 0x27c   :  { %3675 = vmatmul.msk.f32.gmra.mxu1 %vm96_vm0, %v4478_v41 }
 0x27d   :  { %3641 = vmatmul.msk.f32.gmra.mxu3 %vm96_vm0, %v4480_v34 }
 0x284   :  { %3676 = vmatmul.msk.f32.gmra.mxu1 %vm96_vm0, %v4470_v40 }
 0x28c   :  { %3677 = vmatmul.msk.f32.gmra.mxu1 %vm96_vm0, %v4480_v34 }
 0x2e1   :  { %v292_v36 = vpop.f32.mrf.mxu1 }
 0x2e7   :  { %v298_v42 = vpop.f32.mrf.mxu2 }
 0x2e8   :  { %v338_v43 = vpop.f32.mrf.mxu3 }
 0x2e9   :  { %v295_v44 = vpop.f32.mrf.mxu1 }
 0x2ef   :  { %v301_v45 = vpop.f32.mrf.mxu2 }
 0x2f0   :  { %v341_v46 = vpop.f32.mrf.mxu3  ;;  %460 = vmatpush.msra.mxu2 %v301_v45 }
 0x2f1   :  { %v515_v47 = vpop.f32.mrf.mxu1 }
 0x2f2   :  { %461 = vmatpush.msra.mxu2 %v298_v42 }
 0x2f4   :  { %462 = vmatpush.msra.mxu2 %v295_v44 }
 0x2f6   :  { %463 = vmatpush.msra.mxu2 %v292_v36 }
 0x2f7   :  { %3658 = vmatmul.msk.f32.vlgmr.msra.gmra.mxu2 %vm134_vm1, %v304_v48 }
 0x2f8   :  { %v344_v49 = vpop.f32.mrf.mxu3 }
 0x2f9   :  { %v518_v50 = vpop.f32.mrf.mxu1 }
 0x2ff   :  { %3659 = vmatmul.msk.f32.gmra.mxu2 %vm134_vm1, %v305_v51 }
 0x300   :  { %v347_v52 = vpop.f32.mrf.mxu3 }
 0x301   :  { %395 = vmatpush.msrb.mxu0 %v347_v52  ;;  %4026 = vmatpush.msra.mxu3 %v347_v52  ;;  %v521_v53 = vpop.f32.mrf.mxu1 }
 0x303   :  { %396 = vmatpush.msrb.mxu0 %v344_v49  ;;  %4027 = vmatpush.msra.mxu3 %v344_v49 }
 0x305   :  { %397 = vmatpush.msrb.mxu0 %v341_v46  ;;  %4028 = vmatpush.msra.mxu3 %v341_v46 }
 0x307   :  { %398 = vmatpush.msrb.mxu0 %v338_v43  ;;  %4029 = vmatpush.msra.mxu3 %v338_v43 }
 0x308   :  { %3650 = vmatmul.msk.f32.vlgmr.msrb.gmra.mxu0 %vm134_vm1, %v3642_v54  ;;  %3654 = vmatmul.msk.f32.vlgmr.msra.gmra.mxu3 %vm134_vm1, %v3646_v55  ;;  %v4673_v55 = vld [vmem:[%s6270_s9 + $0x38] sm:$0xff] }
 0x309   :  { %v524_v59 = vpop.f32.mrf.mxu1  ;;  %3660 = vmatmul.msk.f32.gmra.mxu2 %vm134_vm1, %v306_v56  ;;  %626 = vmatpush.msra.mxu0 %v3701_v57  ;;  %v4679_v57 = vld [vmem:[%s6270_s9 + $0x30] sm:$0xff] }
 0x30a   :  { %572 = vmatpush.msrb.mxu3 %v524_v59  ;;  %773 = vmatpush.msrb.mxu2 %v4673_v55 }
 0x30b   :  { %627 = vmatpush.msra.mxu0 %v3700_v58  ;;  %v4685_v58 = vld [vmem:[%s6270_s9 + $0x28] sm:$0xff] }
 0x30c   :  { %573 = vmatpush.msrb.mxu3 %v521_v53  ;;  %774 = vmatpush.msrb.mxu2 %v4679_v57 }
 0x30d   :  { %628 = vmatpush.msra.mxu0 %v3699_v60 }
 0x30e   :  { %574 = vmatpush.msrb.mxu3 %v518_v50  ;;  %775 = vmatpush.msrb.mxu2 %v4685_v58 }
 0x30f   :  { %629 = vmatpush.msra.mxu0 %v3698_v61  ;;  %v4691_v61 = vld [vmem:[%s6270_s9 + $0x20] sm:$0xff] }
 0x310   :  { %3651 = vmatmul.msk.f32.gmra.mxu0 %vm134_vm1, %v3643_v62  ;;  %3655 = vmatmul.msk.f32.gmra.mxu3 %vm134_vm1, %v3647_v63  ;;  %v4697_v62 = vld [vmem:[%s6270_s9 + $0x18] sm:$0xff]  ;;  %v4703_v63 = vld [vmem:[%s6270_s9 + $0x10] sm:$0xff] }
 0x311   :  { %575 = vmatpush.msrb.mxu3 %v515_v47  ;;  %3661 = vmatmul.msk.f32.gmra.mxu2 %vm134_vm1, %v307_v0 }
 0x312   :  { %630 = vmatpush.msra.mxu0 %v3697_v1  ;;  %776 = vmatpush.msrb.mxu2 %v4691_v61 }
 0x314   :  { %631 = vmatpush.msra.mxu0 %v3696_v2  ;;  %777 = vmatpush.msrb.mxu2 %v4697_v62  ;;  %v4710_v2 = vld [vmem:[%s6270_s9 + $0x8] sm:$0xff] }
 0x316   :  { %632 = vmatpush.msra.mxu0 %v3695_v3  ;;  %778 = vmatpush.msrb.mxu2 %v4703_v63 }
 0x318   :  { %3652 = vmatmul.msk.f32.gmra.mxu0 %vm134_vm1, %v3644_v4  ;;  %3656 = vmatmul.msk.f32.gmra.mxu3 %vm134_vm1, %v3648_v5 }
 0x319   :  { %633 = vmatpush.msra.mxu0 %v3694_v6  ;;  %3662 = vmatmul.msk.f32.gmra.mxu2 %vm134_vm1, %v308_v13 }
 0x31a   :  { %779 = vmatpush.msrb.mxu2 %v4710_v2 }
 0x320   :  { %3653 = vmatmul.msk.f32.gmra.mxu0 %vm134_vm1, %v3645_v7  ;;  %3657 = vmatmul.msk.f32.gmra.mxu3 %vm134_vm1, %v3649_v8  ;;  %v731_v8 = vld [vmem:[%s6270_s9] sm:$0xff] }
 0x321   :  { %3663 = vmatmul.msk.f32.gmra.mxu2 %vm134_vm1, %v309_v15 }
 0x322   :  { %780 = vmatpush.msrb.mxu2 %v731_v8 }
 0x328   :  { %3686 = vmatmul.msk.f32.vlgmr.msrb.gmra.mxu3 %vm134_vm1, %v3678_v9  ;;  %3702 = vmatmul.msk.f32.vlgmr.msra.gmra.mxu0 %vm96_vm0, %v4468_v39  ;;  %v3712_v39 = vld [vmem:[%s6266_s5 + $0xf0] sm:$0xff] }
 0x329   :  { %3664 = vmatmul.msk.f32.gmra.mxu2 %vm134_vm1, %v310_v18 }
 0x330   :  { %3687 = vmatmul.msk.f32.gmra.mxu3 %vm134_vm1, %v3679_v10  ;;  %3703 = vmatmul.msk.f32.gmra.mxu0 %vm96_vm0, %v4478_v41 }
 0x331   :  { %3665 = vmatmul.msk.f32.gmra.mxu2 %vm134_vm1, %v311_v21 }
 0x338   :  { %3688 = vmatmul.msk.f32.gmra.mxu3 %vm134_vm1, %v3680_v11  ;;  %3704 = vmatmul.msk.f32.gmra.mxu0 %vm96_vm0, %v4470_v40  ;;  %v3713_v40 = vld [vmem:[%s6266_s5 + $0xf8] sm:$0xff] }
 0x340   :  { %3689 = vmatmul.msk.f32.gmra.mxu3 %vm134_vm1, %v3681_v12  ;;  %3705 = vmatmul.msk.f32.gmra.mxu0 %vm96_vm0, %v4480_v34 }
 0x348   :  { %3690 = vmatmul.msk.f32.gmra.mxu3 %vm134_vm1, %v3682_v14 }
 0x350   :  { %3691 = vmatmul.msk.f32.gmra.mxu3 %vm134_vm1, %v3683_v17 }
 0x358   :  { %3692 = vmatmul.msk.f32.gmra.mxu3 %vm134_vm1, %v3684_v20 }
 0x360   :  { %3693 = vmatmul.msk.f32.gmra.mxu3 %vm134_vm1, %v3685_v23 }
 0x37a   :  { %v465_v36 = vpop.f32.mrf.mxu2 }
 0x382   :  { %v468_v43 = vpop.f32.mrf.mxu2 }
 0x385   :  { %v4607_v16 = vpop.f32.mrf.mxu0 }
 0x386   :  { %v466_v3 = vadd.f32 %v465_v36, %v4607_v16 }
 0x38b   :  { %v412_v33 = vpop.f32.mrf.mxu3 }
 0x38c   :  { %v471_v45 = vpop.f32.mrf.mxu2 }
 0x38d   :  { %v4617_v19 = vpop.f32.mrf.mxu0 }
 0x38e   :  { %v469_v0 = vadd.f32 %v468_v43, %v4617_v19 }
 0x393   :  { %v415_v35 = vpop.f32.mrf.mxu3 }
 0x394   :  { %v474_v49 = vpop.f32.mrf.mxu2 }
 0x395   :  { %v4627_v22 = vpop.f32.mrf.mxu0 }
 0x396   :  { %v472_v4 = vadd.f32 %v471_v45, %v4627_v22 }
 0x39b   :  { %v418_v41 = vpop.f32.mrf.mxu3 }
 0x39c   :  { %v477_v52 = vpop.f32.mrf.mxu2 }
 0x39d   :  { %v4634_v24 = vpop.f32.mrf.mxu0  ;;  %v478_v11 = vadd.f32 %v477_v52, %v412_v33 }
 0x39e   :  { %v475_v6 = vadd.f32 %v474_v49, %v4634_v24 }
 0x3a3   :  { %v4668_v34 = vpop.f32.mrf.mxu3 }
 0x3a4   :  { %v480_v56 = vpop.f32.mrf.mxu2 }
 0x3a5   :  { %v635_v25 = vpop.f32.mrf.mxu0  ;;  %v481_v15 = vadd.f32 %v480_v56, %v415_v35  ;;  %v739_v56 = vld [vmem:[%s6271_s10] sm:$0xff] }
 0x3ab   :  { %v577_v42 = vpop.f32.mrf.mxu3 }
 0x3ac   :  { %v483_v1 = vpop.f32.mrf.mxu2  ;;  %v601_v9 = vadd.f32 %v577_v42, %v466_v3 }
 0x3ad   :  { %v638_v26 = vpop.f32.mrf.mxu0  ;;  %v484_v19 = vadd.f32 %v483_v1, %v418_v41 }
 0x3b3   :  { %v580_v44 = vpop.f32.mrf.mxu3 }
 0x3b4   :  { %v602_v5 = vadd.f32 %v580_v44, %v469_v0 }
 0x3b5   :  { %v641_v27 = vpop.f32.mrf.mxu0 }
 0x3bb   :  { %v583_v47 = vpop.f32.mrf.mxu3 }
 0x3bc   :  { %v603_v10 = vadd.f32 %v583_v47, %v472_v4 }
 0x3bd   :  { %v644_v28 = vpop.f32.mrf.mxu0 }
 0x3be   :  { %692 = vmatpush.msrb.mxu1 %v644_v28 }
 0x3c0   :  { %693 = vmatpush.msrb.mxu1 %v641_v27 }
 0x3c2   :  { %694 = vmatpush.msrb.mxu1 %v638_v26  ;;  %v486_v26 = vpop.f32.mrf.mxu2 }
 0x3c3   :  { %v586_v50 = vpop.f32.mrf.mxu3 }
 0x3c4   :  { %695 = vmatpush.msrb.mxu1 %v635_v25  ;;  %v604_v14 = vadd.f32 %v586_v50, %v475_v6 }
 0x3c5   :  { %3714 = vmatmul.msk.f32.vlgmr.msrb.gmra.mxu1 %vm134_vm1, %v3706_v29 }
 0x3cb   :  { %v589_v53 = vpop.f32.mrf.mxu3 }
 0x3cc   :  { %v605_v18 = vadd.f32 %v589_v53, %v478_v11 }
 0x3cd   :  { %3715 = vmatmul.msk.f32.gmra.mxu1 %vm134_vm1, %v3707_v30 }
 0x3d3   :  { %v592_v59 = vpop.f32.mrf.mxu3 }
 0x3d4   :  { %v606_v22 = vadd.f32 %v592_v59, %v481_v15 }
 0x3d5   :  { %3716 = vmatmul.msk.f32.gmra.mxu1 %vm134_vm1, %v3708_v31 }
 0x3db   :  { %v595_v13 = vpop.f32.mrf.mxu3 }
 0x3dc   :  { %v607_v29 = vadd.f32 %v595_v13, %v484_v19 }
 0x3dd   :  { %3717 = vmatmul.msk.f32.gmra.mxu1 %vm134_vm1, %v3709_v32 }
 0x3e5   :  { %3718 = vmatmul.msk.f32.gmra.mxu1 %vm134_vm1, %v3710_v37  ;;  %v487_v37 = vadd.f32 %v486_v26, %v4668_v34 }
 0x3ed   :  { %3719 = vmatmul.msk.f32.gmra.mxu1 %vm134_vm1, %v3711_v38 }
 0x3f5   :  { %3720 = vmatmul.msk.f32.gmra.mxu1 %vm134_vm1, %v3712_v39 }
 0x3fd   :  { %3721 = vmatmul.msk.f32.gmra.mxu1 %vm134_vm1, %v3713_v40  ;;  %v598_v40 = vpop.f32.mrf.mxu3 }
 0x3fe   :  { %v608_v36 = vadd.f32 %v598_v40, %v487_v37  ;;  %v942_v37 = vld [vmem:[%s6273_s12 + $0x38] sm:$0xff]  ;;  %v3740_v40 = vld [vmem:[%s6273_s12 + $0x70] sm:$0xff] }
 0x3ff   :  { %975 = vmatpush.msra.mxu3 %v942_v37 }
 0x442   :  { %v697_v46 = vpop.f32.mrf.mxu1 }
 0x443   :  { %v721_v16 = vadd.f32 %v697_v46, %v601_v9 }
 0x445   :  { %v741_v23 = vsel %vm96_vm0, %v721_v16, 0.0 }
 0x44a   :  { %v700_v48 = vpop.f32.mrf.mxu1 }
 0x44b   :  { %v4719_v12 = vadd.f32 %v700_v48, %v602_v5 }
 0x44d   :  { %v742_v20 = vsel %vm96_vm0, %v4719_v12, 0.0 }
 0x44e   :  { %v743_v27 = vadd.f32 %v742_v20, %v741_v23 }
 0x452   :  { %v703_v51 = vpop.f32.mrf.mxu1 }
 0x453   :  { %v723_v17 = vadd.f32 %v703_v51, %v603_v10 }
 0x455   :  { %v744_v24 = vsel %vm96_vm0, %v723_v17, 0.0 }
 0x456   :  { %v745_v32 = vadd.f32 %v744_v24, %v743_v27 }
 0x45a   :  { %v706_v54 = vpop.f32.mrf.mxu1 }
 0x45b   :  { %v724_v21 = vadd.f32 %v706_v54, %v604_v14  ;;  %v740_v54 = vld [vmem:[%s6271_s10 + $0x8] sm:$0xff] }
 0x45c   :  { %804 = vmatpush.msra.mxu2 %v740_v54  ;;  %901 = vmatpush.msrb.mxu0 %v740_v54  ;;  %v3737_v54 = vld [vmem:[%s6273_s12 + $0x58] sm:$0xff] }
 0x45d   :  { %v746_v30 = vsel %vm96_vm0, %v724_v21, 0.0 }
 0x45e   :  { %v747_v33 = vadd.f32 %v746_v30, %v745_v32  ;;  %805 = vmatpush.msra.mxu2 %v739_v56  ;;  %902 = vmatpush.msrb.mxu0 %v739_v56  ;;  %v937_v56 = vld [vmem:[%s6273_s12 + $0x10] sm:$0xff] }
 0x462   :  { %v709_v60 = vpop.f32.mrf.mxu1 }
 0x463   :  { %v725_v25 = vadd.f32 %v709_v60, %v605_v18 }
 0x465   :  { %v748_v38 = vsel %vm96_vm0, %v725_v25, 0.0 }
 0x466   :  { %v749_v41 = vadd.f32 %v748_v38, %v747_v33  ;;  %v3741_v38 = vld [vmem:[%s6273_s12 + $0x78] sm:$0xff]  ;;  %v940_v33 = vld [vmem:[%s6273_s12 + $0x28] sm:$0xff] }
 0x46a   :  { %v712_v7 = vpop.f32.mrf.mxu1 }
 0x46b   :  { %v726_v31 = vadd.f32 %v712_v7, %v606_v22 }
 0x46d   :  { %v750_v35 = vsel %vm96_vm0, %v726_v31, 0.0 }
 0x46e   :  { %v751_v43 = vadd.f32 %v750_v35, %v749_v41  ;;  %v3739_v35 = vld [vmem:[%s6273_s12 + $0x68] sm:$0xff] }
 0x472   :  { %v715_v28 = vpop.f32.mrf.mxu1 }
 0x473   :  { %v727_v39 = vadd.f32 %v715_v28, %v607_v29 }
 0x475   :  { %v752_v42 = vsel %vm96_vm0, %v727_v39, 0.0 }
 0x476   :  { %v753_v46 = vadd.f32 %v752_v42, %v751_v43 }
 0x47a   :  { %v718_v44 = vpop.f32.mrf.mxu1 }
 0x47b   :  { %v728_v45 = vadd.f32 %v718_v44, %v608_v36 }
 0x47d   :  { %v754_v47 = vsel %vm96_vm0, %v728_v45, 0.0 }
 0x47e   :  { %v755_v48 = vadd.f32 %v754_v47, %v753_v46 }
 0x480   :  { %v756_v49 = vrot.slane %v755_v48, 4 }
 0x482   :  { %v757_v34 = vadd.f32 %v756_v49, %v755_v48  ;;  %v729_v48 = vld [vmem:[%s6268_s7] sm:$0x1] }
 0x484   :  { %v758_v50 = vrot.slane %v757_v34, 2 }
 0x486   :  { %v759_v51 = vadd.f32 %v758_v50, %v757_v34 }
 0x488   :  { %v760_v52 = vrot.slane %v759_v51, 1 }
 0x48a   :  { %v761_v53 = vadd.f32 %v760_v52, %v759_v51  ;;  %v939_v51 = vld [vmem:[%s6273_s12 + $0x20] sm:$0xff] }
 0x48b   :  { %v3738_v52 = vld [vmem:[%s6273_s12 + $0x60] sm:$0xff] }
 0x48c   :  { %3722 = vmatmul.msk.f32.vlgmr.msrb.gmra.mxu2 %vm96_vm0, %v761_v53  ;;  %v938_v53 = vld [vmem:[%s6273_s12 + $0x18] sm:$0xff] }
 0x48d   :  { %859 = vmatpush.msrb.mxu2 %v4673_v55 }
 0x48f   :  { %860 = vmatpush.msrb.mxu2 %v4679_v57 }
 0x491   :  { %861 = vmatpush.msrb.mxu2 %v4685_v58 }
 0x493   :  { %862 = vmatpush.msrb.mxu2 %v4691_v61 }
 0x495   :  { %863 = vmatpush.msrb.mxu2 %v4697_v62 }
 0x497   :  { %864 = vmatpush.msrb.mxu2 %v4703_v63 }
 0x499   :  { %865 = vmatpush.msrb.mxu2 %v4710_v2 }
 0x49b   :  { %866 = vmatpush.msrb.mxu2 %v731_v8 }
 0x50f   :  { %v782_v59 = vpop.f32.mrf.mxu2 }
 0x510   :  { %v785_v60 = vmul.f32 0.00390625, %v782_v59  ;;  %v3736_v59 = vld [vmem:[%s6273_s12 + $0x50] sm:$0xff] }
 0x512   :  { %3723 = vmatmul.msk.f32.vlgmr.msra.gmra.mxu2 %vm786_vm5, %v785_v60  ;;  %v936_v60 = vld [vmem:[%s6273_s12 + $0x8] sm:$0xff] }
 0x513   :  { %1041 = vmatpush.msra.mxu2 %v3741_v38  ;;  %v3851_v38 = vld [vmem:[%s6273_s12 + $0xe8] sm:$0xff] }
 0x515   :  { %1042 = vmatpush.msra.mxu2 %v3740_v40  ;;  %v3849_v40 = vld [vmem:[%s6273_s12 + $0xd8] sm:$0xff] }
 0x517   :  { %1043 = vmatpush.msra.mxu2 %v3739_v35  ;;  %v3847_v35 = vld [vmem:[%s6273_s12 + $0xc8] sm:$0xff] }
 0x519   :  { %1044 = vmatpush.msra.mxu2 %v3738_v52 }
 0x51b   :  { %1045 = vmatpush.msra.mxu2 %v3737_v54 }
 0x51d   :  { %1046 = vmatpush.msra.mxu2 %v3736_v59 }
 0x595   :  { %v807_v0 = vpop.f32.mrf.mxu2 }
 0x596   :  { %v810_v55 = vperm.slane %v807_v0, 0  ;;  %v3735_v0 = vld [vmem:[%s6273_s12 + $0x48] sm:$0xff] }
 0x597   :  { %1047 = vmatpush.msra.mxu2 %v3735_v0 }
 0x598   :  { %v4746_v1 = vsub.f32 %v721_v16, %v810_v55  ;;  %v4749_v57 = vsub.f32 %v4719_v12, %v810_v55  ;;  %v4751_v58 = vsub.f32 %v723_v17, %v810_v55  ;;  %v4753_v61 = vsub.f32 %v724_v21, %v810_v55 }
 0x599   :  { %v4755_v62 = vsub.f32 %v725_v25, %v810_v55  ;;  %v4763_v4 = vsub.f32 %v726_v31, %v810_v55  ;;  %v4769_v9 = vsub.f32 %v727_v39, %v810_v55  ;;  %v4774_v13 = vsub.f32 %v728_v45, %v810_v55  ;;  %v941_v39 = vld [vmem:[%s6273_s12 + $0x30] sm:$0xff]  ;;  %v935_v55 = vld [vmem:[%s6273_s12] sm:$0xff] }
 0x59a   :  { %v819_v63 = vmul.f32 %v4746_v1, %v4746_v1  ;;  %v820_v2 = vmul.f32 %v4749_v57, %v4749_v57  ;;  %v821_v3 = vmul.f32 %v4751_v58, %v4751_v58  ;;  %v822_v5 = vmul.f32 %v4753_v61, %v4753_v61  ;;  %976 = vmatpush.msra.mxu3 %v941_v39  ;;  %v3850_v39 = vld [vmem:[%s6273_s12 + $0xe0] sm:$0xff] }
 0x59b   :  { %v823_v10 = vmul.f32 %v4755_v62, %v4755_v62  ;;  %v824_v14 = vmul.f32 %v4763_v4, %v4763_v4  ;;  %v825_v17 = vmul.f32 %v4769_v9, %v4769_v9  ;;  %v826_v20 = vmul.f32 %v4774_v13, %v4774_v13 }
 0x59c   :  { %v827_v6 = vsel %vm96_vm0, %v819_v63, 0.0  ;;  %v828_v7 = vsel %vm96_vm0, %v820_v2, 0.0  ;;  %v830_v11 = vsel %vm96_vm0, %v821_v3, 0.0  ;;  %v832_v15 = vsel %vm96_vm0, %v822_v5, 0.0  ;;  %977 = vmatpush.msra.mxu3 %v940_v33  ;;  %v3734_v63 = vld [vmem:[%s6273_s12 + $0x40] sm:$0xff]  ;;  %v3848_v33 = vld [vmem:[%s6273_s12 + $0xd0] sm:$0xff] }
 0x59d   :  { %v829_v8 = vadd.f32 %v828_v7, %v827_v6  ;;  %v834_v18 = vsel %vm96_vm0, %v823_v10, 0.0  ;;  %v836_v21 = vsel %vm96_vm0, %v824_v14, 0.0  ;;  %v838_v23 = vsel %vm96_vm0, %v825_v17, 0.0  ;;  %1048 = vmatpush.msra.mxu2 %v3734_v63  ;;  %v4042_v5 = vld [vmem:[%s6269_s8] ss:$0 sm:$0xff] }
 0x59e   :  { %v840_v25 = vsel %vm96_vm0, %v826_v20, 0.0  ;;  %978 = vmatpush.msra.mxu3 %v939_v51 }
 0x59f   :  { %v831_v12 = vadd.f32 %v830_v11, %v829_v8 }
 0x5a0   :  { %979 = vmatpush.msra.mxu3 %v938_v53 }
 0x5a1   :  { %v833_v16 = vadd.f32 %v832_v15, %v831_v12 }
 0x5a2   :  { %980 = vmatpush.msra.mxu3 %v937_v56 }
 0x5a3   :  { %v835_v19 = vadd.f32 %v834_v18, %v833_v16  ;;  %v3804_v16 = vld [vmem:[%s6273_s12 + $0xb0] sm:$0xff]  ;;  %v3802_v18 = vld [vmem:[%s6273_s12 + $0xa0] sm:$0xff] }
 0x5a4   :  { %981 = vmatpush.msra.mxu3 %v936_v60  ;;  %v3750_v60 = vld [vmem:[%s6272_s11 + $0x80] sm:$0xff] }
 0x5a5   :  { %v837_v22 = vadd.f32 %v836_v21, %v835_v19  ;;  %v3801_v21 = vld [vmem:[%s6273_s12 + $0x98] sm:$0xff] }
 0x5a6   :  { %982 = vmatpush.msra.mxu3 %v935_v55  ;;  %v3751_v55 = vld [vmem:[%s6272_s11 + $0x88] sm:$0xff] }
 0x5a7   :  { %v839_v24 = vadd.f32 %v838_v23, %v837_v22  ;;  %v3800_v22 = vld [vmem:[%s6273_s12 + $0x90] sm:$0xff] }
 0x5a9   :  { %v841_v26 = vadd.f32 %v840_v25, %v839_v24  ;;  %v3798_v24 = vld [vmem:[%s6273_s12 + $0x80] sm:$0xff] }
 0x5ab   :  { %v842_v27 = vrot.slane %v841_v26, 4 }
 0x5ad   :  { %v843_v28 = vadd.f32 %v842_v27, %v841_v26 }
 0x5af   :  { %v844_v29 = vrot.slane %v843_v28, 2 }
 0x5b1   :  { %v845_v30 = vadd.f32 %v844_v29, %v843_v28 }
 0x5b3   :  { %v846_v31 = vrot.slane %v845_v30, 1 }
 0x5b5   :  { %v847_v32 = vadd.f32 %v846_v31, %v845_v30 }
 0x5b7   :  { %3724 = vmatmul.msk.f32.vlgmr.msrb.gmra.mxu2 %vm96_vm0, %v847_v32 }
 0x63a   :  { %v868_v41 = vpop.f32.mrf.mxu2 }
 0x63b   :  { %v871_v36 = vmul.f32 0.00390625, %v868_v41  ;;  %v3846_v41 = vld [vmem:[%s6273_s12 + $0xc0] sm:$0xff] }
 0x63d   :  { %v872_v42 = vadd.f32 1e-05, %v871_v36 }
 0x63f   :  { %4046 = vrsqrt.f32 %v872_v42  ;;  %vm879_vm7 = vweird.f32 %v872_v42 }
 0x645   :  { %v4047_v43 = vpop.eup %4046 }
 0x646   :  { %v874_v44 = vmul.f32 %v4047_v43, %v872_v42  ;;  %vm880_vm6 = vweird.f32 %v4047_v43 }
 0x647   :  { %vm881_vm8 = vmor %vm879_vm7, %vm880_vm6 }
 0x648   :  { %v875_v45 = vmul.f32 %v4047_v43, %v874_v44 }
 0x64a   :  { %v876_v46 = vmul.f32 0.5, %v875_v45 }
 0x64c   :  { %v877_v47 = vsub.f32 1.5, %v876_v46 }
 0x64e   :  { %v878_v49 = vmul.f32 %v4047_v43, %v877_v47 }
 0x650   :  { %v882_v34 = vsel %vm881_vm8, %v4047_v43, %v878_v49 }
 0x651   :  { %v883_v50 = vmul.f32 %v882_v34, %v729_v48 }
 0x653   :  { %3725 = vmatmul.msk.f32.vlgmr.msrb.gmra.mxu0 %vm786_vm5, %v883_v50 }
 0x6d0   :  { %v904_v2 = vpop.f32.mrf.mxu0 }
 0x6d1   :  { %v907_v3 = vperm.slane %v904_v2, 0  ;;  %v3752_v2 = vld [vmem:[%s6272_s11 + $0x90] sm:$0xff] }
 0x6d3   :  { %v908_v6 = vmul.f32 %v907_v3, %v4746_v1  ;;  %v909_v10 = vmul.f32 %v907_v3, %v4749_v57  ;;  %v910_v14 = vmul.f32 %v907_v3, %v4751_v58  ;;  %v911_v57 = vmul.f32 %v907_v3, %v4753_v61  ;;  %v3805_v58 = vld [vmem:[%s6273_s12 + $0xb8] sm:$0xff]  ;;  %v3803_v61 = vld [vmem:[%s6273_s12 + $0xa8] sm:$0xff] }
 0x6d4   :  { %1334 = vmatpush.msrb.mxu3 %v3805_v58  ;;  %v912_v20 = vmul.f32 %v907_v3, %v4755_v62  ;;  %v3799_v62 = vld [vmem:[%s6273_s12 + $0x88] sm:$0xff]  ;;  %v913_v26 = vmul.f32 %v907_v3, %v4763_v4  ;;  %v914_v29 = vmul.f32 %v907_v3, %v4769_v9  ;;  %v915_v32 = vmul.f32 %v907_v3, %v4774_v13  ;;  %v3853_v9 = vld [vmem:[%s6273_s12 + $0xf8] sm:$0xff]  ;;  %v3852_v13 = vld [vmem:[%s6273_s12 + $0xf0] sm:$0xff] }
 0x6d5   :  { %v919_v7 = vadd.f32 %v4042_v5, %v908_v6  ;;  %v920_v11 = vadd.f32 %v4042_v5, %v909_v10  ;;  %v921_v1 = vadd.f32 %v4042_v5, %v910_v14  ;;  %v922_v17 = vadd.f32 %v4042_v5, %v911_v57  ;;  %v3755_v10 = vld [vmem:[%s6272_s11 + $0xa8] sm:$0xff]  ;;  %v3758_v57 = vld [vmem:[%s6272_s11 + $0xc0] sm:$0xff] }
 0x6d6   :  { %1335 = vmatpush.msrb.mxu3 %v3804_v16  ;;  %v923_v23 = vadd.f32 %v4042_v5, %v912_v20  ;;  %v924_v27 = vadd.f32 %v4042_v5, %v913_v26  ;;  %v925_v30 = vadd.f32 %v4042_v5, %v914_v29  ;;  %v926_v4 = vadd.f32 %v4042_v5, %v915_v32  ;;  %v3753_v5 = vld [vmem:[%s6272_s11 + $0x98] sm:$0xff]  ;;  %v3814_v58 = vld [vmem:[%s6272_s11 + $0x100] sm:$0xff]  ;;  %v3816_v20 = vld [vmem:[%s6272_s11 + $0x110] sm:$0xff] }
 0x6d7   :  { %v4844_v8 = vmax.f32 %v919_v7, 0.0  ;;  %v4851_v12 = vmax.f32 %v920_v11, 0.0  ;;  %v4858_v15 = vmax.f32 %v921_v1, 0.0  ;;  %v4877_v19 = vmax.f32 %v922_v17, 0.0  ;;  %v3754_v7 = vld [vmem:[%s6272_s11 + $0xa0] sm:$0xff]  ;;  %v3757_v1 = vld [vmem:[%s6272_s11 + $0xb8] sm:$0xff] }
 0x6d8   :  { %1336 = vmatpush.msrb.mxu3 %v3803_v61  ;;  %v931_v25 = vmax.f32 %v923_v23, 0.0  ;;  %v932_v28 = vmax.f32 %v924_v27, 0.0  ;;  %v933_v31 = vmax.f32 %v925_v30, 0.0  ;;  %v934_v37 = vmax.f32 %v926_v4, 0.0  ;;  %v3759_v17 = vld [vmem:[%s6272_s11 + $0xc8] sm:$0xff]  ;;  %v3761_v23 = vld [vmem:[%s6272_s11 + $0xd8] sm:$0xff] }
 0x6d9   :  { %3726 = vmatmul.msk.f32.vlgmr.msra.gmra.mxu3 %vm96_vm0, %v4844_v8  ;;  %3742 = vmatmul.msk.f32.vlgmr.msra.gmra.mxu2 %vm96_vm0, %v4844_v8  ;;  %v3815_v61 = vld [vmem:[%s6272_s11 + $0x108] sm:$0xff]  ;;  %v3762_v26 = vld [vmem:[%s6272_s11 + $0xe0] sm:$0xff]  ;;  %v3764_v32 = vld [vmem:[%s6272_s11 + $0xf0] sm:$0xff] }
 0x6da   :  { %1337 = vmatpush.msrb.mxu3 %v3802_v18  ;;  %v3818_v27 = vld [vmem:[%s6272_s11 + $0x120] sm:$0xff]  ;;  %v3763_v29 = vld [vmem:[%s6272_s11 + $0xe8] sm:$0xff]  ;;  %v3820_v4 = vld [vmem:[%s6272_s11 + $0x130] sm:$0xff] }
 0x6db   :  { %v3819_v30 = vld [vmem:[%s6272_s11 + $0x128] sm:$0xff] }
 0x6dc   :  { %1338 = vmatpush.msrb.mxu3 %v3801_v21 }
 0x6de   :  { %1339 = vmatpush.msrb.mxu3 %v3800_v22  ;;  %v1022_v22 = vld [vmem:[%s6272_s11 + $0x70] sm:$0xff] }
 0x6e0   :  { %1340 = vmatpush.msrb.mxu3 %v3799_v62  ;;  %v3817_v62 = vld [vmem:[%s6272_s11 + $0x118] sm:$0xff] }
 0x6e1   :  { %3727 = vmatmul.msk.f32.gmra.mxu3 %vm96_vm0, %v4851_v12  ;;  %3743 = vmatmul.msk.f32.gmra.mxu2 %vm96_vm0, %v4851_v12 }
 0x6e2   :  { %1341 = vmatpush.msrb.mxu3 %v3798_v24 }
 0x6e4   :  { %1530 = vmatpush.msra.mxu3 %v3853_v9  ;;  %v3765_v9 = vld [vmem:[%s6272_s11 + $0xf8] sm:$0xff] }
 0x6e6   :  { %1531 = vmatpush.msra.mxu3 %v3852_v13  ;;  %v3821_v13 = vld [vmem:[%s6272_s11 + $0x138] sm:$0xff] }
 0x6e8   :  { %1532 = vmatpush.msra.mxu3 %v3851_v38 }
 0x6e9   :  { %3728 = vmatmul.msk.f32.gmra.mxu3 %vm96_vm0, %v4858_v15  ;;  %3744 = vmatmul.msk.f32.gmra.mxu2 %vm96_vm0, %v4858_v15 }
 0x6ea   :  { %1533 = vmatpush.msra.mxu3 %v3850_v39  ;;  %v1008_v39 = vld [vmem:[%s6272_s11] sm:$0xff] }
 0x6ec   :  { %1534 = vmatpush.msra.mxu3 %v3849_v40  ;;  %v3822_v40 = vld [vmem:[%s6272_s11 + $0x140] sm:$0xff] }
 0x6ee   :  { %1535 = vmatpush.msra.mxu3 %v3848_v33 }
 0x6f0   :  { %1536 = vmatpush.msra.mxu3 %v3847_v35  ;;  %v1009_v35 = vld [vmem:[%s6272_s11 + $0x8] sm:$0xff] }
 0x6f1   :  { %3729 = vmatmul.msk.f32.gmra.mxu3 %vm96_vm0, %v4877_v19  ;;  %3745 = vmatmul.msk.f32.gmra.mxu2 %vm96_vm0, %v4877_v19 }
 0x6f2   :  { %1537 = vmatpush.msra.mxu3 %v3846_v41  ;;  %v3823_v41 = vld [vmem:[%s6272_s11 + $0x148] sm:$0xff] }
 0x6f9   :  { %3730 = vmatmul.msk.f32.gmra.mxu3 %vm96_vm0, %v931_v25  ;;  %3746 = vmatmul.msk.f32.gmra.mxu2 %vm96_vm0, %v931_v25 }
 0x701   :  { %3731 = vmatmul.msk.f32.gmra.mxu3 %vm96_vm0, %v932_v28  ;;  %3747 = vmatmul.msk.f32.gmra.mxu2 %vm96_vm0, %v932_v28 }
 0x709   :  { %3732 = vmatmul.msk.f32.gmra.mxu3 %vm96_vm0, %v933_v31  ;;  %3748 = vmatmul.msk.f32.gmra.mxu2 %vm96_vm0, %v933_v31 }
 0x711   :  { %3733 = vmatmul.msk.f32.gmra.mxu3 %vm96_vm0, %v934_v37  ;;  %3749 = vmatmul.msk.f32.gmra.mxu2 %vm96_vm0, %v934_v37 }
 0x719   :  { %3806 = vmatmul.msk.f32.vlgmr.msrb.gmra.mxu3 %vm96_vm0, %v4844_v8 }
 0x721   :  { %3807 = vmatmul.msk.f32.gmra.mxu3 %vm96_vm0, %v4851_v12 }
 0x729   :  { %3808 = vmatmul.msk.f32.gmra.mxu3 %vm96_vm0, %v4858_v15 }
 0x731   :  { %3809 = vmatmul.msk.f32.gmra.mxu3 %vm96_vm0, %v4877_v19 }
 0x739   :  { %3810 = vmatmul.msk.f32.gmra.mxu3 %vm96_vm0, %v931_v25 }
 0x741   :  { %3811 = vmatmul.msk.f32.gmra.mxu3 %vm96_vm0, %v932_v28 }
 0x749   :  { %3812 = vmatmul.msk.f32.gmra.mxu3 %vm96_vm0, %v933_v31 }
 0x751   :  { %3813 = vmatmul.msk.f32.gmra.mxu3 %vm96_vm0, %v934_v37 }
 0x759   :  { %3854 = vmatmul.msk.f32.vlgmr.msra.gmra.mxu3 %vm96_vm0, %v4844_v8 }
 0x75c   :  { %v984_v36 = vpop.f32.mrf.mxu3  ;;  %v1050_v42 = vpop.f32.mrf.mxu2 }
 0x761   :  { %3855 = vmatmul.msk.f32.gmra.mxu3 %vm96_vm0, %v4851_v12  ;;  %v3756_v12 = vld [vmem:[%s6272_s11 + $0xb0] sm:$0xff] }
 0x764   :  { %v987_v43 = vpop.f32.mrf.mxu3  ;;  %v1053_v44 = vpop.f32.mrf.mxu2 }
 0x769   :  { %3856 = vmatmul.msk.f32.gmra.mxu3 %vm96_vm0, %v4858_v15 }
 0x76c   :  { %v990_v45 = vpop.f32.mrf.mxu3  ;;  %v1056_v46 = vpop.f32.mrf.mxu2 }
 0x771   :  { %3857 = vmatmul.msk.f32.gmra.mxu3 %vm96_vm0, %v4877_v19  ;;  %v3760_v19 = vld [vmem:[%s6272_s11 + $0xd0] sm:$0xff] }
 0x774   :  { %v993_v47 = vpop.f32.mrf.mxu3  ;;  %v1059_v48 = vpop.f32.mrf.mxu2 }
 0x779   :  { %3858 = vmatmul.msk.f32.gmra.mxu3 %vm96_vm0, %v931_v25  ;;  %v1023_v25 = vld [vmem:[%s6272_s11 + $0x78] sm:$0xff] }
 0x77c   :  { %v996_v49 = vpop.f32.mrf.mxu3  ;;  %v1062_v34 = vpop.f32.mrf.mxu2 }
 0x781   :  { %3859 = vmatmul.msk.f32.gmra.mxu3 %vm96_vm0, %v932_v28 }
 0x784   :  { %v999_v50 = vpop.f32.mrf.mxu3  ;;  %v1065_v51 = vpop.f32.mrf.mxu2 }
 0x789   :  { %3860 = vmatmul.msk.f32.gmra.mxu3 %vm96_vm0, %v933_v31 }
 0x78c   :  { %v1002_v52 = vpop.f32.mrf.mxu3  ;;  %v1068_v53 = vpop.f32.mrf.mxu2 }
 0x791   :  { %3861 = vmatmul.msk.f32.gmra.mxu3 %vm96_vm0, %v934_v37 }
 0x794   :  { %v1005_v54 = vpop.f32.mrf.mxu3  ;;  %v1071_v56 = vpop.f32.mrf.mxu2 }
 0x795   :  { %1147 = vmatpush.msra.mxu0 %v1071_v56  ;;  %4030 = vmatpush.msra.mxu1 %v1005_v54 }
 0x797   :  { %1148 = vmatpush.msra.mxu0 %v1068_v53  ;;  %4031 = vmatpush.msra.mxu1 %v1002_v52  ;;  %v1014_v53 = vld [vmem:[%s6272_s11 + $0x30] sm:$0xff] }
 0x799   :  { %1149 = vmatpush.msra.mxu0 %v1065_v51  ;;  %4032 = vmatpush.msra.mxu1 %v999_v50  ;;  %v3827_v51 = vld [vmem:[%s6272_s11 + $0x168] sm:$0xff] }
 0x79b   :  { %1150 = vmatpush.msra.mxu0 %v1062_v34  ;;  %4033 = vmatpush.msra.mxu1 %v996_v49 }
 0x79c   :  { %v1343_v59 = vpop.f32.mrf.mxu3 }
 0x79d   :  { %1151 = vmatpush.msra.mxu0 %v1059_v48  ;;  %4034 = vmatpush.msra.mxu1 %v993_v47  ;;  %v1012_v48 = vld [vmem:[%s6272_s11 + $0x20] sm:$0xff] }
 0x79f   :  { %1152 = vmatpush.msra.mxu0 %v1056_v46  ;;  %4035 = vmatpush.msra.mxu1 %v990_v45  ;;  %v3825_v46 = vld [vmem:[%s6272_s11 + $0x158] sm:$0xff] }
 0x7a1   :  { %1153 = vmatpush.msra.mxu0 %v1053_v44  ;;  %4036 = vmatpush.msra.mxu1 %v987_v43 }
 0x7a3   :  { %1154 = vmatpush.msra.mxu0 %v1050_v42  ;;  %4037 = vmatpush.msra.mxu1 %v984_v36  ;;  %v1010_v42 = vld [vmem:[%s6272_s11 + $0x10] sm:$0xff] }
 0x7a4   :  { %3766 = vmatmul.msk.f32.vlgmr.msra.gmra.mxu0 %vm96_vm0, %v3750_v60  ;;  %v1346_v0 = vpop.f32.mrf.mxu3  ;;  %3796 = vmatmul.msk.f32.vlgmr.msra.gmra.mxu1 %vm96_vm0, %v1022_v22  ;;  %v3829_v60 = vld [vmem:[%s6272_s11 + $0x178] sm:$0xff] }
 0x7a5   :  { %1260 = vmatpush.msrb.mxu0 %v1005_v54  ;;  %v3828_v54 = vld [vmem:[%s6272_s11 + $0x170] sm:$0xff] }
 0x7a7   :  { %1261 = vmatpush.msrb.mxu0 %v1002_v52 }
 0x7a9   :  { %1262 = vmatpush.msrb.mxu0 %v999_v50  ;;  %v1013_v50 = vld [vmem:[%s6272_s11 + $0x28] sm:$0xff] }
 0x7ab   :  { %1263 = vmatpush.msrb.mxu0 %v996_v49  ;;  %v3826_v49 = vld [vmem:[%s6272_s11 + $0x160] sm:$0xff] }
 0x7ac   :  { %3767 = vmatmul.msk.f32.gmra.mxu0 %vm96_vm0, %v3751_v55  ;;  %v1349_v63 = vpop.f32.mrf.mxu3  ;;  %3797 = vmatmul.msk.f32.gmra.mxu1 %vm96_vm0, %v1023_v25  ;;  %v1016_v55 = vld [vmem:[%s6272_s11 + $0x40] sm:$0xff] }
 0x7ad   :  { %1264 = vmatpush.msrb.mxu0 %v993_v47 }
 0x7af   :  { %1265 = vmatpush.msrb.mxu0 %v990_v45  ;;  %v1011_v45 = vld [vmem:[%s6272_s11 + $0x18] sm:$0xff] }
 0x7b1   :  { %1266 = vmatpush.msrb.mxu0 %v987_v43  ;;  %v3824_v43 = vld [vmem:[%s6272_s11 + $0x150] sm:$0xff] }
 0x7b3   :  { %1267 = vmatpush.msrb.mxu0 %v984_v36 }
 0x7b4   :  { %3768 = vmatmul.msk.f32.gmra.mxu0 %vm96_vm0, %v3752_v2  ;;  %v1352_v3 = vpop.f32.mrf.mxu3  ;;  %v1017_v2 = vld [vmem:[%s6272_s11 + $0x48] sm:$0xff] }
 0x7bc   :  { %3769 = vmatmul.msk.f32.gmra.mxu0 %vm96_vm0, %v3753_v5  ;;  %v1355_v6 = vpop.f32.mrf.mxu3  ;;  %v1018_v5 = vld [vmem:[%s6272_s11 + $0x50] sm:$0xff] }
 0x7c4   :  { %3770 = vmatmul.msk.f32.gmra.mxu0 %vm96_vm0, %v3754_v7  ;;  %v1358_v8 = vpop.f32.mrf.mxu3  ;;  %v1019_v7 = vld [vmem:[%s6272_s11 + $0x58] sm:$0xff] }
 0x7cc   :  { %3771 = vmatmul.msk.f32.gmra.mxu0 %vm96_vm0, %v3755_v10  ;;  %v1361_v11 = vpop.f32.mrf.mxu3  ;;  %v1020_v10 = vld [vmem:[%s6272_s11 + $0x60] sm:$0xff] }
 0x7d4   :  { %3772 = vmatmul.msk.f32.gmra.mxu0 %vm96_vm0, %v3756_v12  ;;  %v1364_v14 = vpop.f32.mrf.mxu3  ;;  %v1021_v12 = vld [vmem:[%s6272_s11 + $0x68] sm:$0xff] }
 0x7d5   :  { %1440 = vmatpush.msrb.mxu2 %v1364_v14 }
 0x7d7   :  { %1441 = vmatpush.msrb.mxu2 %v1361_v11 }
 0x7d9   :  { %1442 = vmatpush.msrb.mxu2 %v1358_v8 }
 0x7db   :  { %1443 = vmatpush.msrb.mxu2 %v1355_v6 }
 0x7dc   :  { %3773 = vmatmul.msk.f32.gmra.mxu0 %vm96_vm0, %v3757_v1  ;;  %v1539_v15 = vpop.f32.mrf.mxu3  ;;  %v3862_v1 = vld [vmem:[%s6272_s11 + $0x180] sm:$0xff] }
 0x7dd   :  { %1444 = vmatpush.msrb.mxu2 %v1352_v3 }
 0x7df   :  { %1445 = vmatpush.msrb.mxu2 %v1349_v63 }
 0x7e1   :  { %1446 = vmatpush.msrb.mxu2 %v1346_v0 }
 0x7e3   :  { %1447 = vmatpush.msrb.mxu2 %v1343_v59  ;;  %v1015_v59 = vld [vmem:[%s6272_s11 + $0x38] sm:$0xff] }
 0x7e4   :  { %3774 = vmatmul.msk.f32.gmra.mxu0 %vm96_vm0, %v3758_v57  ;;  %3830 = vmatmul.msk.f32.vlgmr.msrb.gmra.mxu2 %vm96_vm0, %v3814_v58  ;;  %v1542_v16 = vpop.f32.mrf.mxu3  ;;  %v3863_v57 = vld [vmem:[%s6272_s11 + $0x188] sm:$0xff] }
 0x7ec   :  { %3775 = vmatmul.msk.f32.gmra.mxu0 %vm96_vm0, %v3759_v17  ;;  %3831 = vmatmul.msk.f32.gmra.mxu2 %vm96_vm0, %v3815_v61  ;;  %v1545_v18 = vpop.f32.mrf.mxu3  ;;  %v3865_v61 = vld [vmem:[%s6272_s11 + $0x198] sm:$0xff] }
 0x7f4   :  { %3776 = vmatmul.msk.f32.gmra.mxu0 %vm96_vm0, %v3760_v19  ;;  %3832 = vmatmul.msk.f32.gmra.mxu2 %vm96_vm0, %v3816_v20  ;;  %v1548_v21 = vpop.f32.mrf.mxu3  ;;  %v3866_v19 = vld [vmem:[%s6272_s11 + $0x1a0] sm:$0xff] }
 0x7fc   :  { %3777 = vmatmul.msk.f32.gmra.mxu0 %vm96_vm0, %v3761_v23  ;;  %3833 = vmatmul.msk.f32.gmra.mxu2 %vm96_vm0, %v3817_v62  ;;  %v1551_v24 = vpop.f32.mrf.mxu3  ;;  %v3868_v23 = vld [vmem:[%s6272_s11 + $0x1b0] sm:$0xff] }
 0x804   :  { %3778 = vmatmul.msk.f32.gmra.mxu0 %vm96_vm0, %v3762_v26  ;;  %3834 = vmatmul.msk.f32.gmra.mxu2 %vm96_vm0, %v3818_v27  ;;  %v1554_v28 = vpop.f32.mrf.mxu3  ;;  %v3870_v26 = vld [vmem:[%s6272_s11 + $0x1c0] sm:$0xff] }
 0x80c   :  { %3779 = vmatmul.msk.f32.gmra.mxu0 %vm96_vm0, %v3763_v29  ;;  %3835 = vmatmul.msk.f32.gmra.mxu2 %vm96_vm0, %v3819_v30  ;;  %v1557_v31 = vpop.f32.mrf.mxu3  ;;  %v3872_v30 = vld [vmem:[%s6272_s11 + $0x1d0] sm:$0xff] }
 0x814   :  { %3780 = vmatmul.msk.f32.gmra.mxu0 %vm96_vm0, %v3764_v32  ;;  %3836 = vmatmul.msk.f32.gmra.mxu2 %vm96_vm0, %v3820_v4  ;;  %v1560_v37 = vpop.f32.mrf.mxu3  ;;  %v3873_v32 = vld [vmem:[%s6272_s11 + $0x1d8] sm:$0xff] }
 0x815   :  { %1636 = vmatpush.msra.mxu0 %v1560_v37 }
 0x817   :  { %1637 = vmatpush.msra.mxu0 %v1557_v31 }
 0x819   :  { %1638 = vmatpush.msra.mxu0 %v1554_v28  ;;  %v3871_v28 = vld [vmem:[%s6272_s11 + $0x1c8] sm:$0xff] }
 0x81b   :  { %1639 = vmatpush.msra.mxu0 %v1551_v24  ;;  %v3869_v24 = vld [vmem:[%s6272_s11 + $0x1b8] sm:$0xff] }
 0x81c   :  { %3781 = vmatmul.msk.f32.gmra.mxu0 %vm96_vm0, %v3765_v9  ;;  %3837 = vmatmul.msk.f32.gmra.mxu2 %vm96_vm0, %v3821_v13  ;;  %v3874_v9 = vld [vmem:[%s6272_s11 + $0x1e0] sm:$0xff] }
 0x81d   :  { %1640 = vmatpush.msra.mxu0 %v1548_v21  ;;  %v3867_v21 = vld [vmem:[%s6272_s11 + $0x1a8] sm:$0xff] }
 0x81f   :  { %1641 = vmatpush.msra.mxu0 %v1545_v18 }
 0x821   :  { %v5059_v38 = vpop.f32.mrf.mxu0  ;;  %1642 = vmatpush.msra.mxu0 %v1542_v16  ;;  %v3864_v16 = vld [vmem:[%s6272_s11 + $0x190] sm:$0xff] }
 0x823   :  { %1643 = vmatpush.msra.mxu0 %v1539_v15 }
 0x824   :  { %3782 = vmatmul.msk.f32.vlgmr.msrb.gmra.mxu0 %vm96_vm0, %v1008_v39  ;;  %3838 = vmatmul.msk.f32.gmra.mxu2 %vm96_vm0, %v3822_v40  ;;  %v3875_v40 = vld [vmem:[%s6272_s11 + $0x1e8] sm:$0xff] }
 0x829   :  { %v5069_v33 = vpop.f32.mrf.mxu0 }
 0x82c   :  { %3783 = vmatmul.msk.f32.gmra.mxu0 %vm96_vm0, %v1009_v35  ;;  %3839 = vmatmul.msk.f32.gmra.mxu2 %vm96_vm0, %v3823_v41  ;;  %v3876_v41 = vld [vmem:[%s6272_s11 + $0x1f0] sm:$0xff] }
 0x831   :  { %v5079_v36 = vpop.f32.mrf.mxu0 }
 0x834   :  { %3784 = vmatmul.msk.f32.gmra.mxu0 %vm96_vm0, %v1010_v42  ;;  %3840 = vmatmul.msk.f32.gmra.mxu2 %vm96_vm0, %v3824_v43 }
 0x839   :  { %v5089_v44 = vpop.f32.mrf.mxu0 }
 0x83c   :  { %3785 = vmatmul.msk.f32.gmra.mxu0 %vm96_vm0, %v1011_v45  ;;  %3841 = vmatmul.msk.f32.gmra.mxu2 %vm96_vm0, %v3825_v46  ;;  %v3877_v45 = vld [vmem:[%s6272_s11 + $0x1f8] sm:$0xff] }
 0x841   :  { %v5099_v47 = vpop.f32.mrf.mxu0 }
 0x844   :  { %3786 = vmatmul.msk.f32.gmra.mxu0 %vm96_vm0, %v1012_v48  ;;  %3842 = vmatmul.msk.f32.gmra.mxu2 %vm96_vm0, %v3826_v49 }
 0x849   :  { %v5109_v34 = vpop.f32.mrf.mxu0 }
 0x84c   :  { %3787 = vmatmul.msk.f32.gmra.mxu0 %vm96_vm0, %v1013_v50  ;;  %3843 = vmatmul.msk.f32.gmra.mxu2 %vm96_vm0, %v3827_v51 }
 0x851   :  { %v5119_v52 = vpop.f32.mrf.mxu0 }
 0x854   :  { %3788 = vmatmul.msk.f32.gmra.mxu0 %vm96_vm0, %v1014_v53  ;;  %3844 = vmatmul.msk.f32.gmra.mxu2 %vm96_vm0, %v3828_v54 }
 0x859   :  { %v5129_v56 = vpop.f32.mrf.mxu0 }
 0x85c   :  { %3789 = vmatmul.msk.f32.gmra.mxu0 %vm96_vm0, %v1015_v59  ;;  %3845 = vmatmul.msk.f32.gmra.mxu2 %vm96_vm0, %v3829_v60 }
 0x861   :  { %v5139_v0 = vpop.f32.mrf.mxu0 }
 0x864   :  { %3790 = vmatmul.msk.f32.gmra.mxu0 %vm96_vm0, %v1016_v55 }
 0x867   :  { %v1449_v4 = vpop.f32.mrf.mxu2 }
 0x869   :  { %v5145_v63 = vpop.f32.mrf.mxu0 }
 0x86c   :  { %3791 = vmatmul.msk.f32.gmra.mxu0 %vm96_vm0, %v1017_v2 }
 0x86f   :  { %v1452_v13 = vpop.f32.mrf.mxu2 }
 0x871   :  { %v5151_v3 = vpop.f32.mrf.mxu0 }
 0x874   :  { %3792 = vmatmul.msk.f32.gmra.mxu0 %vm96_vm0, %v1018_v5 }
 0x877   :  { %v1455_v42 = vpop.f32.mrf.mxu2 }
 0x879   :  { %v5157_v6 = vpop.f32.mrf.mxu0 }
 0x87c   :  { %3793 = vmatmul.msk.f32.gmra.mxu0 %vm96_vm0, %v1019_v7 }
 0x87f   :  { %v1458_v46 = vpop.f32.mrf.mxu2 }
 0x881   :  { %v5163_v8 = vpop.f32.mrf.mxu0 }
 0x884   :  { %3794 = vmatmul.msk.f32.gmra.mxu0 %vm96_vm0, %v1020_v10 }
 0x887   :  { %v1461_v49 = vpop.f32.mrf.mxu2 }
 0x889   :  { %v5169_v11 = vpop.f32.mrf.mxu0 }
 0x88c   :  { %3795 = vmatmul.msk.f32.gmra.mxu0 %vm96_vm0, %v1021_v12 }
 0x88f   :  { %v1464_v51 = vpop.f32.mrf.mxu2 }
 0x891   :  { %v5175_v14 = vpop.f32.mrf.mxu0 }
 0x894   :  { %3878 = vmatmul.msk.f32.vlgmr.msra.gmra.mxu0 %vm96_vm0, %v3862_v1 }
 0x897   :  { %v1467_v59 = vpop.f32.mrf.mxu2 }
 0x899   :  { %v5181_v15 = vpop.f32.mrf.mxu0 }
 0x89c   :  { %3879 = vmatmul.msk.f32.gmra.mxu0 %vm96_vm0, %v3863_v57 }
 0x89f   :  { %v1470_v55 = vpop.f32.mrf.mxu2 }
 0x8a1   :  { %v5187_v58 = vpop.f32.mrf.mxu0 }
 0x8a4   :  { %3880 = vmatmul.msk.f32.gmra.mxu0 %vm96_vm0, %v3864_v16 }
 0x8a7   :  { %v1473_v5 = vpop.f32.mrf.mxu2 }
 0x8a9   :  { %v1272_v17 = vpop.f32.mrf.mxu0 }
 0x8ac   :  { %3881 = vmatmul.msk.f32.gmra.mxu0 %vm96_vm0, %v3865_v61 }
 0x8af   :  { %v5261_v10 = vpop.f32.mrf.mxu2 }
 0x8b1   :  { %v1275_v18 = vpop.f32.mrf.mxu0 }
 0x8b4   :  { %3882 = vmatmul.msk.f32.gmra.mxu0 %vm96_vm0, %v3866_v19 }
 0x8b7   :  { %v5263_v57 = vpop.f32.mrf.mxu2 }
 0x8b9   :  { %v1278_v20 = vpop.f32.mrf.mxu0 }
 0x8bc   :  { %3883 = vmatmul.msk.f32.gmra.mxu0 %vm96_vm0, %v3867_v21  ;;  %v1273_v21 = vadd.f32 %v1272_v17, %v5069_v33 }
 0x8bf   :  { %v5267_v61 = vpop.f32.mrf.mxu2 }
 0x8c1   :  { %v1281_v22 = vpop.f32.mrf.mxu0 }
 0x8c4   :  { %3884 = vmatmul.msk.f32.gmra.mxu0 %vm96_vm0, %v3868_v23  ;;  %v1270_v23 = vadd.f32 %v5187_v58, %v5059_v38 }
 0x8c9   :  { %v1284_v62 = vpop.f32.mrf.mxu0 }
 0x8ca   :  { %v1285_v33 = vadd.f32 %v1284_v62, %v5109_v34 }
 0x8cc   :  { %3885 = vmatmul.msk.f32.gmra.mxu0 %vm96_vm0, %v3869_v24  ;;  %v1276_v24 = vadd.f32 %v1275_v18, %v5079_v36  ;;  %v1502_v34 = vadd.f32 %v1464_v51, %v1285_v33 }
 0x8d1   :  { %v5213_v25 = vpop.f32.mrf.mxu0 }
 0x8d2   :  { %v1288_v58 = vadd.f32 %v5213_v25, %v5119_v52 }
 0x8d4   :  { %3886 = vmatmul.msk.f32.gmra.mxu0 %vm96_vm0, %v3870_v26  ;;  %v5275_v26 = vpop.f32.mrf.mxu2 }
 0x8d9   :  { %v5219_v27 = vpop.f32.mrf.mxu0 }
 0x8da   :  { %v1291_v62 = vadd.f32 %v5219_v27, %v5129_v56 }
 0x8dc   :  { %3887 = vmatmul.msk.f32.gmra.mxu0 %vm96_vm0, %v3871_v28  ;;  %v1279_v28 = vadd.f32 %v1278_v20, %v5089_v44  ;;  %v5291_v44 = vld [vmem:[%s6276_s15 + $0x38] sm:$0xff] }
 0x8dd   :  { %1768 = vmatpush.msrb.mxu1 %v5291_v44 }
 0x8de   :  { %v1500_v36 = vadd.f32 %v1458_v46, %v1279_v28 }
 0x8e1   :  { %v5225_v29 = vpop.f32.mrf.mxu0 }
 0x8e2   :  { %v1294_v56 = vadd.f32 %v5225_v29, %v5139_v0 }
 0x8e4   :  { %3888 = vmatmul.msk.f32.gmra.mxu0 %vm96_vm0, %v3872_v30  ;;  %v1498_v30 = vadd.f32 %v1452_v13, %v1273_v21  ;;  %v1488_v13 = vpop.f32.mrf.mxu2 }
 0x8e9   :  { %v5231_v31 = vpop.f32.mrf.mxu0 }
 0x8ec   :  { %3889 = vmatmul.msk.f32.gmra.mxu0 %vm96_vm0, %v3873_v32 }
 0x8f1   :  { %v5237_v37 = vpop.f32.mrf.mxu0 }
 0x8f2   :  { %v1300_v21 = vadd.f32 %v5237_v37, %v5151_v3 }
 0x8f4   :  { %3890 = vmatmul.msk.f32.gmra.mxu0 %vm96_vm0, %v3874_v9  ;;  %v1282_v9 = vadd.f32 %v1281_v22, %v5099_v47  ;;  %v5303_v22 = vld [vmem:[%s6276_s15 + $0x30] sm:$0xff] }
 0x8f5   :  { %1769 = vmatpush.msrb.mxu1 %v5303_v22 }
 0x8f6   :  { %v1501_v20 = vadd.f32 %v1461_v49, %v1282_v9  ;;  %v1712_v9 = vld [vmem:[%s6276_s15 + $0x8] sm:$0xff] }
 0x8f9   :  { %v5243_v39 = vpop.f32.mrf.mxu0 }
 0x8fc   :  { %3891 = vmatmul.msk.f32.gmra.mxu0 %vm96_vm0, %v3875_v40  ;;  %v1497_v40 = vadd.f32 %v1449_v4, %v1270_v23  ;;  %v1505_v23 = vadd.f32 %v1473_v5, %v1294_v56  ;;  %v1311_v5 = vpop.f32.mrf.mxu1 }
 0x901   :  { %v5249_v35 = vpop.f32.mrf.mxu0 }
 0x904   :  { %3892 = vmatmul.msk.f32.gmra.mxu0 %vm96_vm0, %v3876_v41 }
 0x909   :  { %v5255_v43 = vpop.f32.mrf.mxu0 }
 0x90c   :  { %3893 = vmatmul.msk.f32.gmra.mxu0 %vm96_vm0, %v3877_v45  ;;  %v1499_v45 = vadd.f32 %v1455_v42, %v1276_v24  ;;  %v1303_v24 = vadd.f32 %v5243_v39, %v5157_v6  ;;  %v1711_v6 = vld [vmem:[%s6276_s15] sm:$0xff]  ;;  %v1306_v39 = vadd.f32 %v5249_v35, %v5163_v8 }
 0x90e   :  { %v1508_v8 = vadd.f32 %v5267_v61, %v1303_v24 }
 0x911   :  { %v1645_v48 = vpop.f32.mrf.mxu0 }
 0x912   :  { %v5284_v17 = vadd.f32 %v1645_v48, %v1497_v40  ;;  %v5317_v48 = vld [vmem:[%s6276_s15 + $0x28] sm:$0xff]  ;;  %v1507_v40 = vadd.f32 %v5263_v57, %v1300_v21 }
 0x913   :  { %1770 = vmatpush.msrb.mxu1 %v5317_v48 }
 0x914   :  { %v1720_v52 = vsel %vm96_vm0, %v5284_v17, 0.0 }
 0x919   :  { %v1648_v50 = vpop.f32.mrf.mxu0 }
 0x91a   :  { %v5281_v41 = vadd.f32 %v1648_v50, %v1498_v30  ;;  %v1503_v50 = vadd.f32 %v1467_v59, %v1288_v58 }
 0x91c   :  { %v1721_v47 = vsel %vm96_vm0, %v5281_v41, 0.0 }
 0x91d   :  { %v1722_v42 = vadd.f32 %v1721_v47, %v1720_v52 }
 0x921   :  { %v1651_v53 = vpop.f32.mrf.mxu0 }
 0x922   :  { %v5286_v38 = vadd.f32 %v1651_v53, %v1499_v45  ;;  %v5329_v53 = vld [vmem:[%s6276_s15 + $0x20] sm:$0xff]  ;;  %v1491_v45 = vpop.f32.mrf.mxu2 }
 0x923   :  { %1771 = vmatpush.msrb.mxu1 %v5329_v53 }
 0x924   :  { %v1723_v25 = vsel %vm96_vm0, %v5286_v38, 0.0 }
 0x925   :  { %v1724_v51 = vadd.f32 %v1723_v25, %v1722_v42 }
 0x929   :  { %v1654_v54 = vpop.f32.mrf.mxu0 }
 0x92a   :  { %v5297_v18 = vadd.f32 %v1654_v54, %v1500_v36  ;;  %v1297_v54 = vadd.f32 %v5231_v31, %v5145_v63  ;;  %v1309_v36 = vadd.f32 %v5255_v43, %v5169_v11  ;;  %v1312_v11 = vadd.f32 %v1311_v5, %v5175_v14 }
 0x92c   :  { %v1725_v27 = vsel %vm96_vm0, %v5297_v18, 0.0  ;;  %v1511_v25 = vadd.f32 %v1491_v45, %v1312_v11 }
 0x92d   :  { %v1726_v59 = vadd.f32 %v1725_v27, %v1724_v51 }
 0x931   :  { %v1657_v60 = vpop.f32.mrf.mxu0 }
 0x932   :  { %v5311_v4 = vadd.f32 %v1657_v60, %v1501_v20  ;;  %v1504_v60 = vadd.f32 %v1470_v55, %v1291_v62  ;;  %v1509_v20 = vadd.f32 %v5275_v26, %v1306_v39  ;;  %v1510_v62 = vadd.f32 %v1488_v13, %v1309_v36  ;;  %v1719_v39 = vld [vmem:[%s6277_s16] sm:$0xff] }
 0x934   :  { %v1727_v0 = vsel %vm96_vm0, %v5311_v4, 0.0 }
 0x935   :  { %v1728_v55 = vadd.f32 %v1727_v0, %v1726_v59 }
 0x939   :  { %v1660_v2 = vpop.f32.mrf.mxu0 }
 0x93a   :  { %v5323_v49 = vadd.f32 %v1660_v2, %v1502_v34  ;;  %v5341_v2 = vld [vmem:[%s6276_s15 + $0x18] sm:$0xff] }
 0x93b   :  { %1772 = vmatpush.msrb.mxu1 %v5341_v2 }
 0x93c   :  { %v1729_v63 = vsel %vm96_vm0, %v5323_v49, 0.0 }
 0x93d   :  { %v1730_v28 = vadd.f32 %v1729_v63, %v1728_v55 }
 0x941   :  { %v1663_v7 = vpop.f32.mrf.mxu0 }
 0x942   :  { %v5335_v29 = vadd.f32 %v1663_v7, %v1503_v50  ;;  %v5353_v7 = vld [vmem:[%s6276_s15 + $0x10] sm:$0xff]  ;;  %v1494_v50 = vpop.f32.mrf.mxu2 }
 0x943   :  { %1773 = vmatpush.msrb.mxu1 %v5353_v7 }
 0x944   :  { %v1731_v3 = vsel %vm96_vm0, %v5335_v29, 0.0 }
 0x945   :  { %1774 = vmatpush.msrb.mxu1 %v1712_v9  ;;  %v1732_v33 = vadd.f32 %v1731_v3, %v1730_v28 }
 0x947   :  { %1775 = vmatpush.msrb.mxu1 %v1711_v6 }
 0x949   :  { %v1666_v12 = vpop.f32.mrf.mxu0  ;;  %1800 = vmatpush.msra.mxu1 %v1719_v39 }
 0x94a   :  { %v5347_v31 = vadd.f32 %v1666_v12, %v1504_v60  ;;  %v1506_v12 = vadd.f32 %v5261_v10, %v1297_v54 }
 0x951   :  { %v1669_v1 = vpop.f32.mrf.mxu0 }
 0x952   :  { %v5359_v37 = vadd.f32 %v1669_v1, %v1505_v23  ;;  %v1733_v1 = vsel %vm96_vm0, %v5347_v31, 0.0 }
 0x953   :  { %v1734_v35 = vadd.f32 %v1733_v1, %v1732_v33 }
 0x954   :  { %v1735_v58 = vsel %vm96_vm0, %v5359_v37, 0.0 }
 0x955   :  { %v1736_v34 = vadd.f32 %v1735_v58, %v1734_v35 }
 0x959   :  { %v5265_v16 = vpop.f32.mrf.mxu0 }
 0x95a   :  { %v5374_v10 = vadd.f32 %v5265_v16, %v1506_v12 }
 0x95c   :  { %v1737_v16 = vsel %vm96_vm0, %v5374_v10, 0.0 }
 0x95d   :  { %v1738_v61 = vadd.f32 %v1737_v16, %v1736_v34 }
 0x961   :  { %v5269_v19 = vpop.f32.mrf.mxu0 }
 0x962   :  { %v5382_v47 = vadd.f32 %v5269_v19, %v1507_v40 }
 0x964   :  { %v1739_v43 = vsel %vm96_vm0, %v5382_v47, 0.0 }
 0x965   :  { %v1740_v27 = vadd.f32 %v1739_v43, %v1738_v61 }
 0x969   :  { %v5278_v32 = vpop.f32.mrf.mxu0 }
 0x96a   :  { %v5388_v57 = vadd.f32 %v5278_v32, %v1508_v8  ;;  %v1314_v32 = vpop.f32.mrf.mxu1 }
 0x96c   :  { %v1741_v42 = vsel %vm96_vm0, %v5388_v57, 0.0 }
 0x96d   :  { %v1742_v51 = vadd.f32 %v1741_v42, %v1740_v27 }
 0x971   :  { %v1681_v46 = vpop.f32.mrf.mxu0 }
 0x972   :  { %v5394_v19 = vadd.f32 %v1681_v46, %v1509_v20  ;;  %v1315_v46 = vadd.f32 %v1314_v32, %v5181_v15 }
 0x974   :  { %v1743_v26 = vsel %vm96_vm0, %v5394_v19, 0.0  ;;  %v1512_v0 = vadd.f32 %v1494_v50, %v1315_v46 }
 0x975   :  { %v1744_v54 = vadd.f32 %v1743_v26, %v1742_v51 }
 0x979   :  { %v1684_v30 = vpop.f32.mrf.mxu0 }
 0x97a   :  { %v5398_v56 = vadd.f32 %v1684_v30, %v1510_v62 }
 0x97c   :  { %v1745_v13 = vsel %vm96_vm0, %v5398_v56, 0.0 }
 0x97d   :  { %v1746_v59 = vadd.f32 %v1745_v13, %v1744_v54 }
 0x981   :  { %v1687_v52 = vpop.f32.mrf.mxu0 }
 0x982   :  { %v5402_v14 = vadd.f32 %v1687_v52, %v1511_v25 }
 0x984   :  { %v1747_v60 = vsel %vm96_vm0, %v5402_v14, 0.0 }
 0x985   :  { %v1748_v23 = vadd.f32 %v1747_v60, %v1746_v59 }
 0x989   :  { %v1690_v21 = vpop.f32.mrf.mxu0 }
 0x98a   :  { %v5409_v63 = vadd.f32 %v1690_v21, %v1512_v0 }
 0x98c   :  { %v1749_v55 = vsel %vm96_vm0, %v5409_v63, 0.0 }
 0x98d   :  { %v1750_v24 = vadd.f32 %v1749_v55, %v1748_v23 }
 0x98f   :  { %v1751_v3 = vrot.slane %v1750_v24, 4 }
 0x991   :  { %v1752_v12 = vadd.f32 %v1751_v3, %v1750_v24 }
 0x993   :  { %v1753_v15 = vrot.slane %v1752_v12, 2 }
 0x995   :  { %v1754_v5 = vadd.f32 %v1753_v15, %v1752_v12 }
 0x997   :  { %v1755_v28 = vrot.slane %v1754_v5, 1 }
 0x999   :  { %v1756_v30 = vadd.f32 %v1755_v28, %v1754_v5 }
 0x99b   :  { %3894 = vmatmul.msk.f32.vlgmr.msrb.gmra.mxu1 %vm96_vm0, %v1756_v30 }
 0x99c   :  { %1886 = vmatpush.msrb.mxu1 %v5291_v44 }
 0x99e   :  { %1887 = vmatpush.msrb.mxu1 %v5303_v22 }
 0x9a0   :  { %1888 = vmatpush.msrb.mxu1 %v5317_v48 }
 0x9a2   :  { %1889 = vmatpush.msrb.mxu1 %v5329_v53 }
 0x9a4   :  { %1890 = vmatpush.msrb.mxu1 %v5341_v2 }
 0x9a6   :  { %1891 = vmatpush.msrb.mxu1 %v5353_v7 }
 0x9a8   :  { %1892 = vmatpush.msrb.mxu1 %v1712_v9 }
 0x9aa   :  { %1893 = vmatpush.msrb.mxu1 %v1711_v6 }
 0xa18   :  { %v1777_v1 = vpop.f32.mrf.mxu1 }
 0xa19   :  { %v1780_v40 = vmul.f32 0.0009765625, %v1777_v1 }
 0xa1b   :  { %3895 = vmatmul.msk.f32.vlgmr.msra.gmra.mxu1 %vm1781_vm9, %v1780_v40 }
 0xa1c   :  { %1929 = vmatpush.msra.mxu1 %v1719_v39 }
 0xa98   :  { %v1802_v45 = vpop.f32.mrf.mxu1 }
 0xa99   :  { %v1805_v44 = vperm.slane %v1802_v45, 0 }
 0xa9b   :  { %v5425_v22 = vsub.f32 %v5284_v17, %v1805_v44  ;;  %v5428_v48 = vsub.f32 %v5281_v41, %v1805_v44  ;;  %v5431_v53 = vsub.f32 %v5286_v38, %v1805_v44  ;;  %v5434_v2 = vsub.f32 %v5297_v18, %v1805_v44 }
 0xa9c   :  { %v5441_v6 = vsub.f32 %v5311_v4, %v1805_v44  ;;  %v5446_v41 = vsub.f32 %v5323_v49, %v1805_v44  ;;  %v5453_v58 = vsub.f32 %v5335_v29, %v1805_v44  ;;  %v5459_v49 = vsub.f32 %v5347_v31, %v1805_v44 }
 0xa9d   :  { %v1822_v7 = vmul.f32 %v5425_v22, %v5425_v22  ;;  %v1823_v9 = vmul.f32 %v5428_v48, %v5428_v48  ;;  %v1824_v17 = vmul.f32 %v5431_v53, %v5431_v53  ;;  %v1825_v38 = vmul.f32 %v5434_v2, %v5434_v2 }
 0xa9e   :  { %v1826_v4 = vmul.f32 %v5441_v6, %v5441_v6  ;;  %v1827_v16 = vmul.f32 %v5446_v41, %v5446_v41  ;;  %v5465_v11 = vsub.f32 %v5359_v37, %v1805_v44  ;;  %v1828_v29 = vmul.f32 %v5453_v58, %v5453_v58 }
 0xa9f   :  { %v1838_v18 = vsel %vm96_vm0, %v1822_v7, 0.0  ;;  %v1839_v33 = vsel %vm96_vm0, %v1823_v9, 0.0  ;;  %v1841_v8 = vsel %vm96_vm0, %v1824_v17, 0.0  ;;  %v1843_v20 = vsel %vm96_vm0, %v1825_v38, 0.0 }
 0xaa0   :  { %v1840_v36 = vadd.f32 %v1839_v33, %v1838_v18  ;;  %v1845_v43 = vsel %vm96_vm0, %v1826_v4, 0.0  ;;  %v5471_v61 = vsub.f32 %v5374_v10, %v1805_v44  ;;  %v1829_v31 = vmul.f32 %v5459_v49, %v5459_v49  ;;  %v1993_v33 = vld [vmem:[%s6279_s18 + $0x38] sm:$0xff]  ;;  %v1992_v4 = vld [vmem:[%s6279_s18 + $0x30] sm:$0xff] }
 0xaa1   :  { %v1847_v52 = vsel %vm96_vm0, %v1827_v16, 0.0  ;;  %v5477_v42 = vsub.f32 %v5382_v47, %v1805_v44  ;;  %v1830_v37 = vmul.f32 %v5465_v11, %v5465_v11  ;;  %v1849_v32 = vsel %vm96_vm0, %v1828_v29, 0.0  ;;  %2050 = vmatpush.msrb.mxu3 %v1993_v33  ;;  %v3919_v16 = vld [vmem:[%s6279_s18 + $0x68] sm:$0xff] }
 0xaa2   :  { %v1842_v35 = vadd.f32 %v1841_v8, %v1840_v36  ;;  %v5483_v26 = vsub.f32 %v5388_v57, %v1805_v44  ;;  %v1831_v10 = vmul.f32 %v5471_v61, %v5471_v61  ;;  %v1851_v50 = vsel %vm96_vm0, %v1829_v31, 0.0  ;;  %v3921_v36 = vld [vmem:[%s6279_s18 + $0x78] sm:$0xff]  ;;  %v3920_v8 = vld [vmem:[%s6279_s18 + $0x70] sm:$0xff] }
 0xaa3   :  { %v5489_v46 = vsub.f32 %v5394_v19, %v1805_v44  ;;  %v1832_v47 = vmul.f32 %v5477_v42, %v5477_v42  ;;  %v1853_v13 = vsel %vm96_vm0, %v1830_v37, 0.0  ;;  %v5495_v0 = vsub.f32 %v5398_v56, %v1805_v44  ;;  %2156 = vmatpush.msra.mxu2 %v3921_v36  ;;  %2051 = vmatpush.msrb.mxu3 %v1992_v4  ;;  %v1709_v37 = vld [vmem:[%s6274_s13] sm:$0x1] }
 0xaa4   :  { %v1844_v34 = vadd.f32 %v1843_v20, %v1842_v35  ;;  %v1833_v57 = vmul.f32 %v5483_v26, %v5483_v26  ;;  %v1855_v60 = vsel %vm96_vm0, %v1831_v10, 0.0  ;;  %v5501_v21 = vsub.f32 %v5402_v14, %v1805_v44  ;;  %v1991_v35 = vld [vmem:[%s6279_s18 + $0x28] sm:$0xff] }
 0xaa5   :  { %v1834_v19 = vmul.f32 %v5489_v46, %v5489_v46  ;;  %v1857_v23 = vsel %vm96_vm0, %v1832_v47, 0.0  ;;  %v5507_v24 = vsub.f32 %v5409_v63, %v1805_v44  ;;  %v1835_v56 = vmul.f32 %v5495_v0, %v5495_v0  ;;  %2157 = vmatpush.msra.mxu2 %v3920_v8  ;;  %2052 = vmatpush.msrb.mxu3 %v1991_v35  ;;  %v1989_v47 = vld [vmem:[%s6279_s18 + $0x18] sm:$0xff] }
 0xaa6   :  { %v1846_v62 = vadd.f32 %v1845_v43, %v1844_v34  ;;  %v1859_v3 = vsel %vm96_vm0, %v1833_v57, 0.0  ;;  %v1836_v15 = vmul.f32 %v5501_v21, %v5501_v21  ;;  %v3916_v57 = vld [vmem:[%s6279_s18 + $0x50] sm:$0xff] }
 0xaa7   :  { %v1861_v14 = vsel %vm96_vm0, %v1834_v19, 0.0  ;;  %v1837_v28 = vmul.f32 %v5507_v24, %v5507_v24  ;;  %v1863_v30 = vsel %vm96_vm0, %v1835_v56, 0.0  ;;  %2158 = vmatpush.msra.mxu2 %v3919_v16  ;;  %v1986_v19 = vld [vmem:[%s6279_s18] sm:$0xff] }
 0xaa8   :  { %v1848_v25 = vadd.f32 %v1847_v52, %v1846_v62  ;;  %v1865_v63 = vsel %vm96_vm0, %v1836_v15, 0.0 }
 0xaa9   :  { %v1867_v40 = vsel %vm96_vm0, %v1837_v28, 0.0 }
 0xaaa   :  { %v1850_v27 = vadd.f32 %v1849_v32, %v1848_v25 }
 0xaac   :  { %v1852_v51 = vadd.f32 %v1851_v50, %v1850_v27  ;;  %v1990_v50 = vld [vmem:[%s6279_s18 + $0x20] sm:$0xff] }
 0xaad   :  { %2053 = vmatpush.msrb.mxu3 %v1990_v50  ;;  %v3938_v50 = vld [vmem:[%s6279_s18 + $0x80] sm:$0xff] }
 0xaae   :  { %v1854_v54 = vadd.f32 %v1853_v13, %v1852_v51  ;;  %v3918_v51 = vld [vmem:[%s6279_s18 + $0x60] sm:$0xff]  ;;  %v3917_v13 = vld [vmem:[%s6279_s18 + $0x58] sm:$0xff] }
 0xaaf   :  { %2159 = vmatpush.msra.mxu2 %v3918_v51  ;;  %2054 = vmatpush.msrb.mxu3 %v1989_v47 }
 0xab0   :  { %v1856_v59 = vadd.f32 %v1855_v60, %v1854_v54  ;;  %v1988_v54 = vld [vmem:[%s6279_s18 + $0x10] sm:$0xff]  ;;  %v1987_v60 = vld [vmem:[%s6279_s18 + $0x8] sm:$0xff] }
 0xab1   :  { %2160 = vmatpush.msra.mxu2 %v3917_v13  ;;  %2055 = vmatpush.msrb.mxu3 %v1988_v54 }
 0xab2   :  { %v1858_v55 = vadd.f32 %v1857_v23, %v1856_v59  ;;  %v3915_v59 = vld [vmem:[%s6279_s18 + $0x48] sm:$0xff]  ;;  %v3914_v23 = vld [vmem:[%s6279_s18 + $0x40] sm:$0xff] }
 0xab3   :  { %2161 = vmatpush.msra.mxu2 %v3916_v57  ;;  %2056 = vmatpush.msrb.mxu3 %v1987_v60 }
 0xab4   :  { %v1860_v12 = vadd.f32 %v1859_v3, %v1858_v55  ;;  %v4043_v3 = vld [vmem:[%s6275_s14] ss:$0 sm:$0xff] }
 0xab5   :  { %2162 = vmatpush.msra.mxu2 %v3915_v59  ;;  %2057 = vmatpush.msrb.mxu3 %v1986_v19 }
 0xab6   :  { %v1862_v5 = vadd.f32 %v1861_v14, %v1860_v12 }
 0xab7   :  { %2163 = vmatpush.msra.mxu2 %v3914_v23 }
 0xab8   :  { %v1864_v39 = vadd.f32 %v1863_v30, %v1862_v5 }
 0xaba   :  { %v1866_v1 = vadd.f32 %v1865_v63, %v1864_v39 }
 0xabc   :  { %v1868_v45 = vadd.f32 %v1867_v40, %v1866_v1 }
 0xabe   :  { %v1869_v44 = vrot.slane %v1868_v45, 4 }
 0xac0   :  { %v1870_v7 = vadd.f32 %v1869_v44, %v1868_v45 }
 0xac2   :  { %v1871_v9 = vrot.slane %v1870_v7, 2 }
 0xac4   :  { %v1872_v17 = vadd.f32 %v1871_v9, %v1870_v7 }
 0xac6   :  { %v1873_v38 = vrot.slane %v1872_v17, 1 }
 0xac8   :  { %v1874_v18 = vadd.f32 %v1873_v38, %v1872_v17 }
 0xaca   :  { %3896 = vmatmul.msk.f32.vlgmr.msrb.gmra.mxu1 %vm96_vm0, %v1874_v18 }
 0xb47   :  { %v1895_v20 = vpop.f32.mrf.mxu1 }
 0xb48   :  { %v1898_v34 = vmul.f32 0.0009765625, %v1895_v20 }
 0xb4a   :  { %v1899_v29 = vadd.f32 1e-05, %v1898_v34 }
 0xb4c   :  { %4048 = vrsqrt.f32 %v1899_v29  ;;  %vm1906_vm11 = vweird.f32 %v1899_v29 }
 0xb52   :  { %v4049_v43 = vpop.eup %4048 }
 0xb53   :  { %v1901_v62 = vmul.f32 %v4049_v43, %v1899_v29  ;;  %vm1907_vm10 = vweird.f32 %v4049_v43 }
 0xb54   :  { %vm1908_vm12 = vmor %vm1906_vm11, %vm1907_vm10 }
 0xb55   :  { %v1902_v31 = vmul.f32 %v4049_v43, %v1901_v62  ;;  %v3945_v62 = vld [vmem:[%s6279_s18 + $0xb8] sm:$0xff] }
 0xb56   :  { %2489 = vmatpush.msra.mxu3 %v3945_v62 }
 0xb57   :  { %v1903_v52 = vmul.f32 0.5, %v1902_v31  ;;  %v3944_v31 = vld [vmem:[%s6279_s18 + $0xb0] sm:$0xff] }
 0xb58   :  { %2490 = vmatpush.msra.mxu3 %v3944_v31 }
 0xb59   :  { %v1904_v25 = vsub.f32 1.5, %v1903_v52  ;;  %v3943_v52 = vld [vmem:[%s6279_s18 + $0xa8] sm:$0xff] }
 0xb5a   :  { %2491 = vmatpush.msra.mxu3 %v3943_v52 }
 0xb5b   :  { %v1905_v32 = vmul.f32 %v4049_v43, %v1904_v25  ;;  %v3942_v25 = vld [vmem:[%s6279_s18 + $0xa0] sm:$0xff] }
 0xb5c   :  { %2492 = vmatpush.msra.mxu3 %v3942_v25  ;;  %v2215_v25 = vld [vmem:[#allocation2 + $0x108] sm:$0xff] }
 0xb5d   :  { %v1909_v27 = vsel %vm1908_vm12, %v4049_v43, %v1905_v32  ;;  %v3941_v32 = vld [vmem:[%s6279_s18 + $0x98] sm:$0xff] }
 0xb5e   :  { %v1910_v10 = vmul.f32 %v1909_v27, %v1709_v37  ;;  %v3940_v27 = vld [vmem:[%s6279_s18 + $0x90] sm:$0xff]  ;;  %2493 = vmatpush.msra.mxu3 %v3941_v32  ;;  %v2108_v32 = vld [vmem:[#allocation2 + $0x8] sm:$0xff] }
 0xb60   :  { %3897 = vmatmul.msk.f32.vlgmr.msra.gmra.mxu1 %vm1781_vm9, %v1910_v10  ;;  %v3939_v10 = vld [vmem:[%s6279_s18 + $0x88] sm:$0xff]  ;;  %2494 = vmatpush.msra.mxu3 %v3940_v27 }
 0xb62   :  { %2495 = vmatpush.msra.mxu3 %v3939_v10  ;;  %v2216_v10 = vld [vmem:[#allocation2 + $0x110] sm:$0xff] }
 0xb64   :  { %2496 = vmatpush.msra.mxu3 %v3938_v50  ;;  %v2109_v50 = vld [vmem:[#allocation2 + $0x10] sm:$0xff] }
 0xbdd   :  { %v1931_v55 = vpop.f32.mrf.mxu1 }
 0xbde   :  { %v1934_v56 = vperm.slane %v1931_v55, 0 }
 0xbe0   :  { %v1935_v12 = vmul.f32 %v1934_v56, %v5425_v22  ;;  %v1936_v15 = vmul.f32 %v1934_v56, %v5428_v48  ;;  %v1943_v30 = vmul.f32 %v1934_v56, %v5465_v11  ;;  %v1944_v39 = vmul.f32 %v1934_v56, %v5471_v61 }
 0xbe1   :  { %v1945_v63 = vmul.f32 %v1934_v56, %v5477_v42  ;;  %v1946_v22 = vmul.f32 %v1934_v56, %v5483_v26  ;;  %v1947_v48 = vmul.f32 %v1934_v56, %v5489_v46  ;;  %v1948_v1 = vmul.f32 %v1934_v56, %v5495_v0 }
 0xbe2   :  { %v1954_v14 = vadd.f32 %v4043_v3, %v1935_v12  ;;  %v1955_v28 = vadd.f32 %v4043_v3, %v1936_v15  ;;  %v1949_v40 = vmul.f32 %v1934_v56, %v5501_v21  ;;  %v1962_v45 = vadd.f32 %v4043_v3, %v1943_v30 }
 0xbe3   :  { %v1963_v44 = vadd.f32 %v4043_v3, %v1944_v39  ;;  %v1964_v7 = vadd.f32 %v4043_v3, %v1945_v63  ;;  %v1950_v9 = vmul.f32 %v1934_v56, %v5507_v24  ;;  %v1965_v17 = vadd.f32 %v4043_v3, %v1946_v22 }
 0xbe4   :  { %v5578_v5 = vmax.f32 %v1954_v14, 0.0  ;;  %v5592_v38 = vadd.f32 %v4043_v3, %v1947_v48  ;;  %v5594_v11 = vadd.f32 %v4043_v3, %v1948_v1  ;;  %v5596_v61 = vadd.f32 %v4043_v3, %v1949_v40 }
 0xbe5   :  { %v5598_v42 = vadd.f32 %v4043_v3, %v1950_v9  ;;  %v5600_v26 = vmax.f32 %v1955_v28, 0.0  ;;  %v1937_v46 = vmul.f32 %v1934_v56, %v5431_v53  ;;  %v1938_v24 = vmul.f32 %v1934_v56, %v5434_v2 }
 0xbe6   :  { %3898 = vmatmul.msk.f32.vlgmr.msrb.gmra.mxu3 %vm96_vm0, %v5578_v5  ;;  %3922 = vmatmul.msk.f32.vlgmr.msra.gmra.mxu2 %vm96_vm0, %v5578_v5  ;;  %v1939_v53 = vmul.f32 %v1934_v56, %v5441_v6  ;;  %v1940_v2 = vmul.f32 %v1934_v56, %v5446_v41  ;;  %v1941_v6 = vmul.f32 %v1934_v56, %v5453_v58  ;;  %v5648_v58 = vmax.f32 %v1962_v45, 0.0 }
 0xbe7   :  { %v1956_v0 = vadd.f32 %v4043_v3, %v1937_v46  ;;  %v1957_v18 = vadd.f32 %v4043_v3, %v1938_v24  ;;  %v1942_v41 = vmul.f32 %v1934_v56, %v5459_v49  ;;  %v5654_v49 = vmax.f32 %v1963_v44, 0.0  ;;  %v3969_v44 = vld [vmem:[%s6279_s18 + $0xf8] sm:$0xff]  ;;  %v3963_v24 = vld [vmem:[%s6279_s18 + $0xc8] sm:$0xff] }
 0xbe8   :  { %v1958_v36 = vadd.f32 %v4043_v3, %v1939_v53  ;;  %v1959_v8 = vadd.f32 %v4043_v3, %v1940_v2  ;;  %v1960_v16 = vadd.f32 %v4043_v3, %v1941_v6  ;;  %v5660_v43 = vmax.f32 %v1964_v7, 0.0  ;;  %2741 = vmatpush.msrb.mxu3 %v3969_v44 }
 0xbe9   :  { %v5607_v21 = vmax.f32 %v1956_v0, 0.0  ;;  %v5614_v33 = vmax.f32 %v1957_v18, 0.0  ;;  %v1961_v34 = vadd.f32 %v4043_v3, %v1942_v41  ;;  %v5678_v37 = vmax.f32 %v1965_v17, 0.0  ;;  %v3968_v17 = vld [vmem:[%s6279_s18 + $0xf0] sm:$0xff]  ;;  %v3962_v18 = vld [vmem:[%s6279_s18 + $0xc0] sm:$0xff] }
 0xbea   :  { %v5621_v4 = vmax.f32 %v1958_v36, 0.0  ;;  %v5628_v35 = vmax.f32 %v1959_v8, 0.0  ;;  %v5635_v20 = vmax.f32 %v1960_v16, 0.0  ;;  %v5697_v51 = vmax.f32 %v5592_v38, 0.0  ;;  %v3967_v38 = vld [vmem:[%s6279_s18 + $0xe8] sm:$0xff]  ;;  %2742 = vmatpush.msrb.mxu3 %v3968_v17  ;;  %v3964_v0 = vld [vmem:[%s6279_s18 + $0xd0] sm:$0xff] }
 0xbeb   :  { %v5642_v29 = vmax.f32 %v1961_v34, 0.0  ;;  %v5704_v47 = vmax.f32 %v5594_v11, 0.0  ;;  %v5711_v13 = vmax.f32 %v5596_v61, 0.0  ;;  %v5718_v54 = vmax.f32 %v5598_v42, 0.0  ;;  %v3966_v11 = vld [vmem:[%s6279_s18 + $0xe0] sm:$0xff]  ;;  %v3965_v61 = vld [vmem:[%s6279_s18 + $0xd8] sm:$0xff] }
 0xbec   :  { %2743 = vmatpush.msrb.mxu3 %v3967_v38  ;;  %v2121_v17 = vld [vmem:[#allocation2 + $0x70] sm:$0xff]  ;;  %v2229_v38 = vld [vmem:[#allocation2 + $0x178] sm:$0xff] }
 0xbee   :  { %3899 = vmatmul.msk.f32.gmra.mxu3 %vm96_vm0, %v5600_v26  ;;  %3923 = vmatmul.msk.f32.gmra.mxu2 %vm96_vm0, %v5600_v26 }
 0xbef   :  { %2744 = vmatpush.msrb.mxu3 %v3966_v11  ;;  %v2122_v11 = vld [vmem:[#allocation2 + $0x78] sm:$0xff] }
 0xbf1   :  { %2745 = vmatpush.msrb.mxu3 %v3965_v61 }
 0xbf3   :  { %2746 = vmatpush.msrb.mxu3 %v3964_v0  ;;  %v2547_v0 = vld [vmem:[#allocation2 + $0x200] sm:$0xff] }
 0xbf5   :  { %2747 = vmatpush.msrb.mxu3 %v3963_v24  ;;  %v2123_v24 = vld [vmem:[#allocation2 + $0x80] sm:$0xff] }
 0xbf6   :  { %3900 = vmatmul.msk.f32.gmra.mxu3 %vm96_vm0, %v5607_v21  ;;  %3924 = vmatmul.msk.f32.gmra.mxu2 %vm96_vm0, %v5607_v21 }
 0xbf7   :  { %2748 = vmatpush.msrb.mxu3 %v3962_v18 }
 0xbfe   :  { %3901 = vmatmul.msk.f32.gmra.mxu3 %vm96_vm0, %v5614_v33  ;;  %3925 = vmatmul.msk.f32.gmra.mxu2 %vm96_vm0, %v5614_v33 }
 0xc06   :  { %3902 = vmatmul.msk.f32.gmra.mxu3 %vm96_vm0, %v5621_v4  ;;  %3926 = vmatmul.msk.f32.gmra.mxu2 %vm96_vm0, %v5621_v4 }
 0xc0e   :  { %3903 = vmatmul.msk.f32.gmra.mxu3 %vm96_vm0, %v5628_v35  ;;  %3927 = vmatmul.msk.f32.gmra.mxu2 %vm96_vm0, %v5628_v35 }
 0xc16   :  { %3904 = vmatmul.msk.f32.gmra.mxu3 %vm96_vm0, %v5635_v20  ;;  %3928 = vmatmul.msk.f32.gmra.mxu2 %vm96_vm0, %v5635_v20 }
 0xc1e   :  { %3905 = vmatmul.msk.f32.gmra.mxu3 %vm96_vm0, %v5642_v29  ;;  %3929 = vmatmul.msk.f32.gmra.mxu2 %vm96_vm0, %v5642_v29 }
 0xc26   :  { %3906 = vmatmul.msk.f32.gmra.mxu3 %vm96_vm0, %v5648_v58  ;;  %3930 = vmatmul.msk.f32.gmra.mxu2 %vm96_vm0, %v5648_v58 }
 0xc2e   :  { %3907 = vmatmul.msk.f32.gmra.mxu3 %vm96_vm0, %v5654_v49  ;;  %3931 = vmatmul.msk.f32.gmra.mxu2 %vm96_vm0, %v5654_v49 }
 0xc36   :  { %3908 = vmatmul.msk.f32.gmra.mxu3 %vm96_vm0, %v5660_v43  ;;  %3932 = vmatmul.msk.f32.gmra.mxu2 %vm96_vm0, %v5660_v43 }
 0xc3e   :  { %3909 = vmatmul.msk.f32.gmra.mxu3 %vm96_vm0, %v5678_v37  ;;  %3933 = vmatmul.msk.f32.gmra.mxu2 %vm96_vm0, %v5678_v37 }
 0xc46   :  { %3910 = vmatmul.msk.f32.gmra.mxu3 %vm96_vm0, %v5697_v51  ;;  %3934 = vmatmul.msk.f32.gmra.mxu2 %vm96_vm0, %v5697_v51 }
 0xc4e   :  { %3911 = vmatmul.msk.f32.gmra.mxu3 %vm96_vm0, %v5704_v47  ;;  %3935 = vmatmul.msk.f32.gmra.mxu2 %vm96_vm0, %v5704_v47 }
 0xc56   :  { %3912 = vmatmul.msk.f32.gmra.mxu3 %vm96_vm0, %v5711_v13  ;;  %3936 = vmatmul.msk.f32.gmra.mxu2 %vm96_vm0, %v5711_v13 }
 0xc5e   :  { %3913 = vmatmul.msk.f32.gmra.mxu3 %vm96_vm0, %v5718_v54  ;;  %3937 = vmatmul.msk.f32.gmra.mxu2 %vm96_vm0, %v5718_v54 }
 0xc66   :  { %3946 = vmatmul.msk.f32.vlgmr.msra.gmra.mxu3 %vm96_vm0, %v5578_v5 }
 0xc69   :  { %v5726_v57 = vpop.f32.mrf.mxu3  ;;  %v5728_v60 = vpop.f32.mrf.mxu2 }
 0xc6e   :  { %3947 = vmatmul.msk.f32.gmra.mxu3 %vm96_vm0, %v5600_v26 }
 0xc71   :  { %v5732_v59 = vpop.f32.mrf.mxu3  ;;  %v5734_v19 = vpop.f32.mrf.mxu2 }
 0xc76   :  { %3948 = vmatmul.msk.f32.gmra.mxu3 %vm96_vm0, %v5607_v21 }
 0xc79   :  { %v5738_v23 = vpop.f32.mrf.mxu3  ;;  %v5740_v55 = vpop.f32.mrf.mxu2 }
 0xc7e   :  { %3949 = vmatmul.msk.f32.gmra.mxu3 %vm96_vm0, %v5614_v33 }
 0xc81   :  { %v5744_v56 = vpop.f32.mrf.mxu3  ;;  %v5746_v3 = vpop.f32.mrf.mxu2 }
 0xc86   :  { %3950 = vmatmul.msk.f32.gmra.mxu3 %vm96_vm0, %v5621_v4 }
 0xc89   :  { %v5750_v12 = vpop.f32.mrf.mxu3  ;;  %v5752_v15 = vpop.f32.mrf.mxu2 }
 0xc8e   :  { %3951 = vmatmul.msk.f32.gmra.mxu3 %vm96_vm0, %v5628_v35 }
 0xc91   :  { %v5756_v14 = vpop.f32.mrf.mxu3  ;;  %v5758_v28 = vpop.f32.mrf.mxu2 }
 0xc96   :  { %3952 = vmatmul.msk.f32.gmra.mxu3 %vm96_vm0, %v5635_v20 }
 0xc99   :  { %v5762_v30 = vpop.f32.mrf.mxu3  ;;  %v5764_v39 = vpop.f32.mrf.mxu2 }
 0xc9e   :  { %3953 = vmatmul.msk.f32.gmra.mxu3 %vm96_vm0, %v5642_v29 }
 0xca1   :  { %v2080_v63 = vpop.f32.mrf.mxu3  ;;  %v2186_v22 = vpop.f32.mrf.mxu2 }
 0xca6   :  { %3954 = vmatmul.msk.f32.gmra.mxu3 %vm96_vm0, %v5648_v58 }
 0xca9   :  { %v2083_v48 = vpop.f32.mrf.mxu3  ;;  %v2189_v1 = vpop.f32.mrf.mxu2 }
 0xcae   :  { %3955 = vmatmul.msk.f32.gmra.mxu3 %vm96_vm0, %v5654_v49 }
 0xcb1   :  { %v2086_v40 = vpop.f32.mrf.mxu3  ;;  %v2192_v45 = vpop.f32.mrf.mxu2 }
 0xcb6   :  { %3956 = vmatmul.msk.f32.gmra.mxu3 %vm96_vm0, %v5660_v43 }
 0xcb9   :  { %v2089_v7 = vpop.f32.mrf.mxu3  ;;  %v2195_v9 = vpop.f32.mrf.mxu2 }
 0xcbe   :  { %3957 = vmatmul.msk.f32.gmra.mxu3 %vm96_vm0, %v5678_v37 }
 0xcc1   :  { %v2092_v42 = vpop.f32.mrf.mxu3  ;;  %v2198_v46 = vpop.f32.mrf.mxu2 }
 0xcc6   :  { %3958 = vmatmul.msk.f32.gmra.mxu3 %vm96_vm0, %v5697_v51 }
 0xcc9   :  { %v2095_v53 = vpop.f32.mrf.mxu3  ;;  %v2201_v36 = vpop.f32.mrf.mxu2 }
 0xcce   :  { %3959 = vmatmul.msk.f32.gmra.mxu3 %vm96_vm0, %v5704_v47 }
 0xcd1   :  { %v2098_v2 = vpop.f32.mrf.mxu3  ;;  %v2204_v8 = vpop.f32.mrf.mxu2 }
 0xcd6   :  { %3960 = vmatmul.msk.f32.gmra.mxu3 %vm96_vm0, %v5711_v13 }
 0xcd9   :  { %v2101_v6 = vpop.f32.mrf.mxu3  ;;  %v2207_v16 = vpop.f32.mrf.mxu2 }
 0xcde   :  { %3961 = vmatmul.msk.f32.gmra.mxu3 %vm96_vm0, %v5718_v54 }
 0xce1   :  { %v2104_v41 = vpop.f32.mrf.mxu3  ;;  %v2210_v34 = vpop.f32.mrf.mxu2 }
 0xce2   :  { %2246 = vmatpush.msrb.mxu1 %v2210_v34  ;;  %2359 = vmatpush.msrb.mxu0 %v2104_v41  ;;  %v2232_v41 = vld [vmem:[#allocation2 + $0x190] sm:$0xff] }
 0xce3   :  { %v2549_v34 = vld [vmem:[#allocation2 + $0x210] sm:$0xff] }
 0xce4   :  { %2247 = vmatpush.msrb.mxu1 %v2207_v16  ;;  %2360 = vmatpush.msrb.mxu0 %v2101_v6 }
 0xce6   :  { %2248 = vmatpush.msrb.mxu1 %v2204_v8  ;;  %2361 = vmatpush.msrb.mxu0 %v2098_v2  ;;  %v2548_v2 = vld [vmem:[#allocation2 + $0x208] sm:$0xff] }
 0xce7   :  { %3970 = vmatmul.msk.f32.vlgmr.msrb.gmra.mxu3 %vm96_vm0, %v5578_v5  ;;  %v2124_v8 = vld [vmem:[#allocation2 + $0x88] sm:$0xff] }
 0xce8   :  { %2249 = vmatpush.msrb.mxu1 %v2201_v36  ;;  %2362 = vmatpush.msrb.mxu0 %v2095_v53  ;;  %v2231_v36 = vld [vmem:[#allocation2 + $0x188] sm:$0xff] }
 0xce9   :  { %v5810_v62 = vpop.f32.mrf.mxu3 }
 0xcea   :  { %2250 = vmatpush.msrb.mxu1 %v2198_v46  ;;  %2363 = vmatpush.msrb.mxu0 %v2092_v42  ;;  %v2230_v46 = vld [vmem:[#allocation2 + $0x180] sm:$0xff] }
 0xcec   :  { %2251 = vmatpush.msrb.mxu1 %v2195_v9  ;;  %2364 = vmatpush.msrb.mxu0 %v2089_v7  ;;  %v2120_v7 = vld [vmem:[#allocation2 + $0x68] sm:$0xff]  ;;  %v2228_v9 = vld [vmem:[#allocation2 + $0x170] sm:$0xff] }
 0xcee   :  { %2252 = vmatpush.msrb.mxu1 %v2192_v45  ;;  %2365 = vmatpush.msrb.mxu0 %v2086_v40  ;;  %v2119_v45 = vld [vmem:[#allocation2 + $0x60] sm:$0xff] }
 0xcef   :  { %3971 = vmatmul.msk.f32.gmra.mxu3 %vm96_vm0, %v5600_v26  ;;  %v2214_v26 = vld [vmem:[#allocation2 + $0x100] sm:$0xff] }
 0xcf0   :  { %2253 = vmatpush.msrb.mxu1 %v2189_v1  ;;  %2366 = vmatpush.msrb.mxu0 %v2083_v48  ;;  %v2118_v1 = vld [vmem:[#allocation2 + $0x58] sm:$0xff] }
 0xcf1   :  { %v5814_v31 = vpop.f32.mrf.mxu3 }
 0xcf2   :  { %2254 = vmatpush.msrb.mxu1 %v2186_v22  ;;  %2367 = vmatpush.msrb.mxu0 %v2080_v63  ;;  %v2117_v22 = vld [vmem:[#allocation2 + $0x50] sm:$0xff] }
 0xcf4   :  { %2255 = vmatpush.msrb.mxu1 %v5764_v39  ;;  %2368 = vmatpush.msrb.mxu0 %v5762_v30  ;;  %v2116_v39 = vld [vmem:[#allocation2 + $0x48] sm:$0xff] }
 0xcf6   :  { %2256 = vmatpush.msrb.mxu1 %v5758_v28  ;;  %2369 = vmatpush.msrb.mxu0 %v5756_v14  ;;  %v2115_v28 = vld [vmem:[#allocation2 + $0x40] sm:$0xff] }
 0xcf7   :  { %3972 = vmatmul.msk.f32.gmra.mxu3 %vm96_vm0, %v5607_v21  ;;  %v2107_v21 = vld [vmem:[#allocation2] sm:$0xff] }
 0xcf8   :  { %2257 = vmatpush.msrb.mxu1 %v5752_v15  ;;  %2370 = vmatpush.msrb.mxu0 %v5750_v12  ;;  %v2114_v15 = vld [vmem:[#allocation2 + $0x38] sm:$0xff] }
 0xcf9   :  { %v5824_v5 = vpop.f32.mrf.mxu3 }
 0xcfa   :  { %2258 = vmatpush.msrb.mxu1 %v5746_v3  ;;  %2371 = vmatpush.msrb.mxu0 %v5744_v56  ;;  %v2220_v56 = vld [vmem:[#allocation2 + $0x130] sm:$0xff] }
 0xcfb   :  { %v2113_v3 = vld [vmem:[#allocation2 + $0x30] sm:$0xff] }
 0xcfc   :  { %2259 = vmatpush.msrb.mxu1 %v5740_v55  ;;  %2372 = vmatpush.msrb.mxu0 %v5738_v23  ;;  %v2219_v23 = vld [vmem:[#allocation2 + $0x128] sm:$0xff] }
 0xcfd   :  { %v2112_v55 = vld [vmem:[#allocation2 + $0x28] sm:$0xff] }
 0xcfe   :  { %2260 = vmatpush.msrb.mxu1 %v5734_v19  ;;  %2373 = vmatpush.msrb.mxu0 %v5732_v59  ;;  %v2218_v59 = vld [vmem:[#allocation2 + $0x120] sm:$0xff] }
 0xcff   :  { %3973 = vmatmul.msk.f32.gmra.mxu3 %vm96_vm0, %v5614_v33  ;;  %v2111_v19 = vld [vmem:[#allocation2 + $0x20] sm:$0xff] }
 0xd00   :  { %2261 = vmatpush.msrb.mxu1 %v5728_v60  ;;  %2374 = vmatpush.msrb.mxu0 %v5726_v57  ;;  %v2217_v57 = vld [vmem:[#allocation2 + $0x118] sm:$0xff] }
 0xd01   :  { %2262 = vmatmul.f32.vlgmr.msrb.gmra.mxu1 %v2214_v26  ;;  %v5836_v52 = vpop.f32.mrf.mxu3  ;;  %2375 = vmatmul.f32.vlgmr.msrb.gmra.mxu0 %v2107_v21  ;;  %v2110_v60 = vld [vmem:[#allocation2 + $0x18] sm:$0xff] }
 0xd02   :  { %v2233_v26 = vld [vmem:[#allocation2 + $0x198] sm:$0xff] }
 0xd03   :  { %v2550_v21 = vld [vmem:[#allocation2 + $0x218] sm:$0xff] }
 0xd07   :  { %3974 = vmatmul.msk.f32.gmra.mxu3 %vm96_vm0, %v5621_v4 }
 0xd09   :  { %2265 = vmatmul.f32.gmra.mxu1 %v2215_v25  ;;  %v5840_v27 = vpop.f32.mrf.mxu3  ;;  %2378 = vmatmul.f32.gmra.mxu0 %v2108_v32 }
 0xd0f   :  { %3975 = vmatmul.msk.f32.gmra.mxu3 %vm96_vm0, %v5628_v35 }
 0xd11   :  { %2268 = vmatmul.f32.gmra.mxu1 %v2216_v10  ;;  %v5844_v33 = vpop.f32.mrf.mxu3  ;;  %2381 = vmatmul.f32.gmra.mxu0 %v2109_v50  ;;  %v2551_v10 = vld [vmem:[#allocation2 + $0x220] sm:$0xff] }
 0xd12   :  { %v2127_v50 = vld [vmem:[#allocation2 + $0xa0] sm:$0xff] }
 0xd17   :  { %3976 = vmatmul.msk.f32.gmra.mxu3 %vm96_vm0, %v5635_v20 }
 0xd19   :  { %2271 = vmatmul.f32.gmra.mxu1 %v2217_v57  ;;  %v5848_v4 = vpop.f32.mrf.mxu3  ;;  %2384 = vmatmul.f32.gmra.mxu0 %v2110_v60  ;;  %v2235_v60 = vld [vmem:[#allocation2 + $0x1a8] sm:$0xff] }
 0xd1f   :  { %3977 = vmatmul.msk.f32.gmra.mxu3 %vm96_vm0, %v5642_v29  ;;  %v2221_v29 = vld [vmem:[#allocation2 + $0x138] sm:$0xff] }
 0xd21   :  { %2274 = vmatmul.f32.gmra.mxu1 %v2218_v59  ;;  %v5852_v35 = vpop.f32.mrf.mxu3  ;;  %2387 = vmatmul.f32.gmra.mxu0 %v2111_v19  ;;  %v2128_v59 = vld [vmem:[#allocation2 + $0xa8] sm:$0xff] }
 0xd27   :  { %3978 = vmatmul.msk.f32.gmra.mxu3 %vm96_vm0, %v5648_v58  ;;  %v2222_v58 = vld [vmem:[#allocation2 + $0x140] sm:$0xff] }
 0xd29   :  { %2277 = vmatmul.f32.gmra.mxu1 %v2219_v23  ;;  %v2522_v20 = vpop.f32.mrf.mxu3  ;;  %2390 = vmatmul.f32.gmra.mxu0 %v2112_v55  ;;  %v2236_v23 = vld [vmem:[#allocation2 + $0x1b0] sm:$0xff] }
 0xd2a   :  { %v2553_v55 = vld [vmem:[#allocation2 + $0x230] sm:$0xff] }
 0xd2f   :  { %3979 = vmatmul.msk.f32.gmra.mxu3 %vm96_vm0, %v5654_v49  ;;  %v2223_v49 = vld [vmem:[#allocation2 + $0x148] sm:$0xff] }
 0xd31   :  { %2280 = vmatmul.f32.gmra.mxu1 %v2220_v56  ;;  %v2525_v12 = vpop.f32.mrf.mxu3  ;;  %2393 = vmatmul.f32.gmra.mxu0 %v2113_v3 }
 0xd37   :  { %3980 = vmatmul.msk.f32.gmra.mxu3 %vm96_vm0, %v5660_v43  ;;  %v2224_v43 = vld [vmem:[#allocation2 + $0x150] sm:$0xff] }
 0xd39   :  { %2283 = vmatmul.f32.gmra.mxu1 %v2221_v29  ;;  %v2528_v14 = vpop.f32.mrf.mxu3  ;;  %2396 = vmatmul.f32.gmra.mxu0 %v2114_v15  ;;  %v2237_v29 = vld [vmem:[#allocation2 + $0x1b8] sm:$0xff] }
 0xd3a   :  { %v2554_v15 = vld [vmem:[#allocation2 + $0x238] sm:$0xff] }
 0xd3f   :  { %3981 = vmatmul.msk.f32.gmra.mxu3 %vm96_vm0, %v5678_v37  ;;  %v2225_v37 = vld [vmem:[#allocation2 + $0x158] sm:$0xff] }
 0xd41   :  { %2286 = vmatmul.f32.gmra.mxu1 %v2222_v58  ;;  %v2531_v30 = vpop.f32.mrf.mxu3  ;;  %2399 = vmatmul.f32.gmra.mxu0 %v2115_v28 }
 0xd47   :  { %3982 = vmatmul.msk.f32.gmra.mxu3 %vm96_vm0, %v5697_v51  ;;  %v2226_v51 = vld [vmem:[#allocation2 + $0x160] sm:$0xff] }
 0xd49   :  { %2289 = vmatmul.f32.gmra.mxu1 %v2223_v49  ;;  %v2534_v63 = vpop.f32.mrf.mxu3  ;;  %2402 = vmatmul.f32.gmra.mxu0 %v2116_v39  ;;  %v2555_v49 = vld [vmem:[#allocation2 + $0x240] sm:$0xff] }
 0xd4f   :  { %3983 = vmatmul.msk.f32.gmra.mxu3 %vm96_vm0, %v5704_v47  ;;  %v2227_v47 = vld [vmem:[#allocation2 + $0x168] sm:$0xff] }
 0xd51   :  { %2292 = vmatmul.f32.gmra.mxu1 %v2224_v43  ;;  %v2537_v48 = vpop.f32.mrf.mxu3  ;;  %2405 = vmatmul.f32.gmra.mxu0 %v2117_v22 }
 0xd57   :  { %3984 = vmatmul.msk.f32.gmra.mxu3 %vm96_vm0, %v5711_v13 }
 0xd59   :  { %2295 = vmatmul.f32.gmra.mxu1 %v2225_v37  ;;  %v2540_v40 = vpop.f32.mrf.mxu3  ;;  %2408 = vmatmul.f32.gmra.mxu0 %v2118_v1  ;;  %v2556_v37 = vld [vmem:[#allocation2 + $0x248] sm:$0xff] }
 0xd5a   :  { %v2132_v1 = vld [vmem:[#allocation2 + $0xc8] sm:$0xff] }
 0xd5f   :  { %3985 = vmatmul.msk.f32.gmra.mxu3 %vm96_vm0, %v5718_v54  ;;  %vm3584_vm0 = vcmask 113664  }
 0xd61   :  { %2298 = vmatmul.f32.gmra.mxu1 %v2226_v51  ;;  %v2543_v44 = vpop.f32.mrf.mxu3  ;;  %2411 = vmatmul.f32.gmra.mxu0 %v2119_v45 }
 0xd62   :  { %2579 = vmatpush.msrb.mxu2 %v2543_v44  ;;  %v2240_v44 = vld [vmem:[#allocation2 + $0x1d0] sm:$0xff] }
 0xd64   :  { %2580 = vmatpush.msrb.mxu2 %v2540_v40 }
 0xd66   :  { %2581 = vmatpush.msrb.mxu2 %v2537_v48  ;;  %v2239_v48 = vld [vmem:[#allocation2 + $0x1c8] sm:$0xff] }
 0xd68   :  { %2582 = vmatpush.msrb.mxu2 %v2534_v63  ;;  %v2131_v63 = vld [vmem:[#allocation2 + $0xc0] sm:$0xff] }
 0xd69   :  { %2301 = vmatmul.f32.gmra.mxu1 %v2227_v47  ;;  %2414 = vmatmul.f32.gmra.mxu0 %v2120_v7  ;;  %v2557_v47 = vld [vmem:[#allocation2 + $0x250] sm:$0xff] }
 0xd6a   :  { %v5870_v13 = vpop.f32.mrf.mxu3  ;;  %2583 = vmatpush.msrb.mxu2 %v2531_v30  ;;  %v2238_v30 = vld [vmem:[#allocation2 + $0x1c0] sm:$0xff]  ;;  %v2133_v7 = vld [vmem:[#allocation2 + $0xd0] sm:$0xff] }
 0xd6c   :  { %2584 = vmatpush.msrb.mxu2 %v2528_v14  ;;  %v2130_v14 = vld [vmem:[#allocation2 + $0xb8] sm:$0xff] }
 0xd6e   :  { %2585 = vmatpush.msrb.mxu2 %v2525_v12 }
 0xd70   :  { %2586 = vmatpush.msrb.mxu2 %v2522_v20  ;;  %v2129_v20 = vld [vmem:[#allocation2 + $0xb0] sm:$0xff] }
 0xd71   :  { %2304 = vmatmul.f32.gmra.mxu1 %v2228_v9  ;;  %2417 = vmatmul.f32.gmra.mxu0 %v2121_v17 }
 0xd72   :  { %v5872_v54 = vpop.f32.mrf.mxu3  ;;  %2587 = vmatpush.msrb.mxu2 %v5852_v35 }
 0xd74   :  { %2588 = vmatpush.msrb.mxu2 %v5848_v4  ;;  %v2552_v4 = vld [vmem:[#allocation2 + $0x228] sm:$0xff] }
 0xd76   :  { %2589 = vmatpush.msrb.mxu2 %v5844_v33 }
 0xd78   :  { %2590 = vmatpush.msrb.mxu2 %v5840_v27  ;;  %v2234_v27 = vld [vmem:[#allocation2 + $0x1a0] sm:$0xff] }
 0xd79   :  { %2307 = vmatmul.f32.gmra.mxu1 %v2229_v38  ;;  %2420 = vmatmul.f32.gmra.mxu0 %v2122_v11  ;;  %v2241_v11 = vld [vmem:[#allocation2 + $0x1d8] sm:$0xff] }
 0xd7a   :  { %v5878_v61 = vpop.f32.mrf.mxu3  ;;  %2591 = vmatpush.msrb.mxu2 %v5836_v52  ;;  %v2126_v52 = vld [vmem:[#allocation2 + $0x98] sm:$0xff] }
 0xd7c   :  { %2592 = vmatpush.msrb.mxu2 %v5824_v5 }
 0xd7e   :  { %v5882_v42 = vpop.f32.mrf.mxu1  ;;  %2593 = vmatpush.msrb.mxu2 %v5814_v31  ;;  %v5912_v3 = vpop.f32.mrf.mxu0 }
 0xd80   :  { %2594 = vmatpush.msrb.mxu2 %v5810_v62  ;;  %v2125_v62 = vld [vmem:[#allocation2 + $0x90] sm:$0xff] }
 0xd81   :  { %2310 = vmatmul.f32.gmra.mxu1 %v2230_v46  ;;  %2595 = vmatmul.f32.vlgmr.msrb.gmra.mxu2 %v2547_v0  ;;  %v2558_v46 = vld [vmem:[#allocation2 + $0x258] sm:$0xff] }
 0xd82   :  { %v5886_v18 = vpop.f32.mrf.mxu3  ;;  %2423 = vmatmul.f32.gmra.mxu0 %v2123_v24  ;;  %v2134_v0 = vld [vmem:[#allocation2 + $0xd8] sm:$0xff] }
 0xd86   :  { %v5888_v53 = vpop.f32.mrf.mxu1  ;;  %v5918_v39 = vpop.f32.mrf.mxu0 }
 0xd89   :  { %2313 = vmatmul.f32.gmra.mxu1 %v2231_v36  ;;  %2598 = vmatmul.f32.gmra.mxu2 %v2548_v2 }
 0xd8a   :  { %v5890_v6 = vpop.f32.mrf.mxu3  ;;  %2426 = vmatmul.f32.gmra.mxu0 %v2124_v8  ;;  %v2242_v8 = vld [vmem:[#allocation2 + $0x1e0] sm:$0xff] }
 0xd8e   :  { %v5892_v16 = vpop.f32.mrf.mxu1  ;;  %v5922_v40 = vpop.f32.mrf.mxu0 }
 0xd91   :  { %2316 = vmatmul.f32.gmra.mxu1 %v2232_v41  ;;  %2601 = vmatmul.f32.gmra.mxu2 %v2549_v34  ;;  %v2559_v41 = vld [vmem:[#allocation2 + $0x260] sm:$0xff] }
 0xd92   :  { %v5894_v31 = vpop.f32.mrf.mxu3  ;;  %2429 = vmatmul.f32.gmra.mxu0 %v2125_v62  ;;  %v2135_v34 = vld [vmem:[#allocation2 + $0xe0] sm:$0xff] }
 0xd96   :  { %v5896_v5 = vpop.f32.mrf.mxu1  ;;  %v5926_v17 = vpop.f32.mrf.mxu0 }
 0xd99   :  { %2319 = vmatmul.f32.gmra.mxu1 %v2233_v26  ;;  %2604 = vmatmul.f32.gmra.mxu2 %v2550_v21  ;;  %v2560_v21 = vld [vmem:[#allocation2 + $0x268] sm:$0xff] }
 0xd9a   :  { %v5898_v25 = vpop.f32.mrf.mxu3  ;;  %2432 = vmatmul.f32.gmra.mxu0 %v2126_v52 }
 0xd9e   :  { %v5900_v32 = vpop.f32.mrf.mxu1  ;;  %v5930_v36 = vpop.f32.mrf.mxu0 }
 0xda1   :  { %2322 = vmatmul.f32.gmra.mxu1 %v2234_v27  ;;  %2607 = vmatmul.f32.gmra.mxu2 %v2551_v10  ;;  %v2243_v27 = vld [vmem:[#allocation2 + $0x1e8] sm:$0xff] }
 0xda2   :  { %v5902_v33 = vpop.f32.mrf.mxu3  ;;  %2435 = vmatmul.f32.gmra.mxu0 %v2127_v50  ;;  %v2136_v10 = vld [vmem:[#allocation2 + $0xe8] sm:$0xff] }
 0xda6   :  { %v5904_v57 = vpop.f32.mrf.mxu1  ;;  %v5936_v52 = vpop.f32.mrf.mxu0 }
 0xda9   :  { %2325 = vmatmul.f32.gmra.mxu1 %v2235_v60  ;;  %2610 = vmatmul.f32.gmra.mxu2 %v2552_v4  ;;  %v2561_v60 = vld [vmem:[#allocation2 + $0x270] sm:$0xff] }
 0xdaa   :  { %v5906_v19 = vpop.f32.mrf.mxu3  ;;  %2438 = vmatmul.f32.gmra.mxu0 %v2128_v59  ;;  %v2244_v4 = vld [vmem:[#allocation2 + $0x1f0] sm:$0xff] }
 0xdab   :  { %v2137_v59 = vld [vmem:[#allocation2 + $0xf0] sm:$0xff] }
 0xdae   :  { %v5908_v35 = vpop.f32.mrf.mxu1 }
 0xdb1   :  { %2328 = vmatmul.f32.gmra.mxu1 %v2236_v23  ;;  %2613 = vmatmul.f32.gmra.mxu2 %v2553_v55  ;;  %v5941_v23 = vpop.f32.mrf.mxu0 }
 0xdb2   :  { %v5910_v56 = vpop.f32.mrf.mxu3  ;;  %2441 = vmatmul.f32.gmra.mxu0 %v2129_v20  ;;  %v2562_v20 = vld [vmem:[#allocation2 + $0x278] sm:$0xff] }
 0xdb6   :  { %v5914_v12 = vpop.f32.mrf.mxu1 }
 0xdb9   :  { %2331 = vmatmul.f32.gmra.mxu1 %v2237_v29  ;;  %2616 = vmatmul.f32.gmra.mxu2 %v2554_v15  ;;  %v2245_v29 = vld [vmem:[#allocation2 + $0x1f8] sm:$0xff]  ;;  %v5950_v15 = vpop.f32.mrf.mxu0 }
 0xdba   :  { %v2780_v58 = vpop.f32.mrf.mxu3  ;;  %2444 = vmatmul.f32.gmra.mxu0 %v2130_v14  ;;  %v2800_v14 = vld [vmem:[#allocation2 + $0x308] sm:$0xff] }
 0xdbe   :  { %v5916_v28 = vpop.f32.mrf.mxu1 }
 0xdc1   :  { %2334 = vmatmul.f32.gmra.mxu1 %v2238_v30  ;;  %2619 = vmatmul.f32.gmra.mxu2 %v2555_v49  ;;  %v2802_v49 = vld [vmem:[#allocation2 + $0x318] sm:$0xff] }
 0xdc2   :  { %v2783_v43 = vpop.f32.mrf.mxu3  ;;  %2447 = vmatmul.f32.gmra.mxu0 %v2131_v63  ;;  %v2567_v63 = vld [vmem:[#allocation2 + $0x2a0] sm:$0xff] }
 0xdc6   :  { %v5920_v22 = vpop.f32.mrf.mxu1 }
 0xdc9   :  { %2337 = vmatmul.f32.gmra.mxu1 %v2239_v48  ;;  %2622 = vmatmul.f32.gmra.mxu2 %v2556_v37  ;;  %v2568_v37 = vld [vmem:[#allocation2 + $0x2a8] sm:$0xff] }
 0xdca   :  { %v2786_v51 = vpop.f32.mrf.mxu3  ;;  %2450 = vmatmul.f32.gmra.mxu0 %v2132_v1  ;;  %v2804_v1 = vld [vmem:[#allocation2 + $0x328] sm:$0xff] }
 0xdce   :  { %v5924_v45 = vpop.f32.mrf.mxu1 }
 0xdd1   :  { %2340 = vmatmul.f32.gmra.mxu1 %v2240_v44  ;;  %2625 = vmatmul.f32.gmra.mxu2 %v2557_v47  ;;  %v2569_v44 = vld [vmem:[#allocation2 + $0x2b0] sm:$0xff] }
 0xdd2   :  { %v2789_v9 = vpop.f32.mrf.mxu3  ;;  %2453 = vmatmul.f32.gmra.mxu0 %v2133_v7  ;;  %v2805_v47 = vld [vmem:[#allocation2 + $0x330] sm:$0xff] }
 0xdd6   :  { %v5928_v38 = vpop.f32.mrf.mxu1 }
 0xdd9   :  { %2343 = vmatmul.f32.gmra.mxu1 %v2241_v11  ;;  %2628 = vmatmul.f32.gmra.mxu2 %v2558_v46  ;;  %v2570_v11 = vld [vmem:[#allocation2 + $0x2b8] sm:$0xff] }
 0xdda   :  { %v2792_v24 = vpop.f32.mrf.mxu3  ;;  %2456 = vmatmul.f32.gmra.mxu0 %v2134_v0  ;;  %v2806_v46 = vld [vmem:[#allocation2 + $0x338] sm:$0xff] }
 0xdde   :  { %v5932_v2 = vpop.f32.mrf.mxu1 }
 0xde1   :  { %2346 = vmatmul.f32.gmra.mxu1 %v2242_v8  ;;  %2631 = vmatmul.f32.gmra.mxu2 %v2559_v41  ;;  %v2571_v8 = vld [vmem:[#allocation2 + $0x2c0] sm:$0xff] }
 0xde2   :  { %v2795_v62 = vpop.f32.mrf.mxu3  ;;  %2459 = vmatmul.f32.gmra.mxu0 %v2135_v34  ;;  %v2807_v41 = vld [vmem:[#allocation2 + $0x340] sm:$0xff] }
 0xde3   :  { %2831 = vmatpush.msra.mxu1 %v2795_v62  ;;  %v2572_v62 = vld [vmem:[#allocation2 + $0x2c8] sm:$0xff] }
 0xde5   :  { %2832 = vmatpush.msra.mxu1 %v2792_v24 }
 0xde6   :  { %v5934_v26 = vpop.f32.mrf.mxu1 }
 0xde7   :  { %2833 = vmatpush.msra.mxu1 %v2789_v9 }
 0xde9   :  { %2834 = vmatpush.msra.mxu1 %v2786_v51  ;;  %2634 = vmatmul.f32.gmra.mxu2 %v2560_v21  ;;  %v2808_v21 = vld [vmem:[#allocation2 + $0x348] sm:$0xff] }
 0xdea   :  { %2349 = vmatmul.f32.gmra.mxu1 %v2243_v27  ;;  %2462 = vmatmul.f32.gmra.mxu0 %v2136_v10 }
 0xdeb   :  { %2835 = vmatpush.msra.mxu1 %v2783_v43  ;;  %v2803_v43 = vld [vmem:[#allocation2 + $0x320] sm:$0xff] }
 0xded   :  { %2836 = vmatpush.msra.mxu1 %v2780_v58 }
 0xdee   :  { %v5938_v50 = vpop.f32.mrf.mxu1 }
 0xdef   :  { %2837 = vmatpush.msra.mxu1 %v5910_v56  ;;  %v2138_v56 = vld [vmem:[#allocation2 + $0xf8] sm:$0xff] }
 0xdf1   :  { %2838 = vmatpush.msra.mxu1 %v5906_v19  ;;  %2637 = vmatmul.f32.gmra.mxu2 %v2561_v60  ;;  %v2799_v19 = vld [vmem:[#allocation2 + $0x300] sm:$0xff]  ;;  %v2573_v60 = vld [vmem:[#allocation2 + $0x2d0] sm:$0xff] }
 0xdf2   :  { %2352 = vmatmul.f32.gmra.mxu1 %v2244_v4  ;;  %2465 = vmatmul.f32.gmra.mxu0 %v2137_v59  ;;  %v2809_v4 = vld [vmem:[#allocation2 + $0x350] sm:$0xff] }
 0xdf3   :  { %2839 = vmatpush.msra.mxu1 %v5902_v33 }
 0xdf5   :  { %2840 = vmatpush.msra.mxu1 %v5898_v25  ;;  %v2563_v25 = vld [vmem:[#allocation2 + $0x280] sm:$0xff] }
 0xdf6   :  { %v5946_v55 = vpop.f32.mrf.mxu1 }
 0xdf7   :  { %2841 = vmatpush.msra.mxu1 %v5894_v31  ;;  %v2564_v31 = vld [vmem:[#allocation2 + $0x288] sm:$0xff] }
 0xdf9   :  { %2842 = vmatpush.msra.mxu1 %v5890_v6  ;;  %2640 = vmatmul.f32.gmra.mxu2 %v2562_v20 }
 0xdfa   :  { %2355 = vmatmul.f32.gmra.mxu1 %v2245_v29  ;;  %2468 = vmatmul.f32.gmra.mxu0 %v2138_v56  ;;  %v2574_v29 = vld [vmem:[#allocation2 + $0x2d8] sm:$0xff] }
 0xdfb   :  { %2843 = vmatpush.msra.mxu1 %v5886_v18  ;;  %v2565_v18 = vld [vmem:[#allocation2 + $0x290] sm:$0xff]  ;;  %v2810_v56 = vld [vmem:[#allocation2 + $0x358] sm:$0xff] }
 0xdfd   :  { %2844 = vmatpush.msra.mxu1 %v5878_v61  ;;  %v2801_v61 = vld [vmem:[#allocation2 + $0x310] sm:$0xff] }
 0xdfe   :  { %v5954_v33 = vpop.f32.mrf.mxu1 }
 0xdff   :  { %2845 = vmatpush.msra.mxu1 %v5872_v54  ;;  %v2566_v54 = vld [vmem:[#allocation2 + $0x298] sm:$0xff] }
 0xe01   :  { %2846 = vmatpush.msra.mxu1 %v5870_v13  ;;  %2643 = vmatmul.f32.gmra.mxu2 %v2563_v25 }
 0xe02   :  { %2847 = vmatmul.f32.vlgmr.msra.gmra.mxu1 %v2799_v19 }
 0xe04   :  { %v2596_v7 = vpop.f32.mrf.mxu2 }
 0xe06   :  { %v5958_v6 = vpop.f32.mrf.mxu1 }
 0xe09   :  { %2646 = vmatmul.f32.gmra.mxu2 %v2564_v31  ;;  %v2575_v31 = vld [vmem:[#allocation2 + $0x2e0] sm:$0xff] }
 0xe0a   :  { %2850 = vmatmul.f32.gmra.mxu1 %v2800_v14  ;;  %v2811_v14 = vld [vmem:[#allocation2 + $0x360] sm:$0xff] }
 0xe0c   :  { %v2599_v0 = vpop.f32.mrf.mxu2 }
 0xe0e   :  { %v5960_v58 = vpop.f32.mrf.mxu1 }
 0xe11   :  { %2649 = vmatmul.f32.gmra.mxu2 %v2565_v18 }
 0xe12   :  { %2853 = vmatmul.f32.gmra.mxu1 %v2801_v61  ;;  %v2576_v61 = vld [vmem:[#allocation2 + $0x2e8] sm:$0xff] }
 0xe14   :  { %v2602_v27 = vpop.f32.mrf.mxu2 }
 0xe16   :  { %v5962_v30 = vpop.f32.mrf.mxu1 }
 0xe19   :  { %2652 = vmatmul.f32.gmra.mxu2 %v2566_v54 }
 0xe1a   :  { %2856 = vmatmul.f32.gmra.mxu1 %v2802_v49  ;;  %v2812_v49 = vld [vmem:[#allocation2 + $0x368] sm:$0xff] }
 0xe1c   :  { %v5978_v59 = vpop.f32.mrf.mxu2 }
 0xe1e   :  { %v5964_v13 = vpop.f32.mrf.mxu1 }
 0xe21   :  { %2655 = vmatmul.f32.gmra.mxu2 %v2567_v63  ;;  %v2577_v63 = vld [vmem:[#allocation2 + $0x2f0] sm:$0xff] }
 0xe22   :  { %2859 = vmatmul.f32.gmra.mxu1 %v2803_v43 }
 0xe24   :  { %v5982_v25 = vpop.f32.mrf.mxu2 }
 0xe26   :  { %v5966_v48 = vpop.f32.mrf.mxu1 }
 0xe29   :  { %2658 = vmatmul.f32.gmra.mxu2 %v2568_v37  ;;  %v2813_v37 = vld [vmem:[#allocation2 + $0x370] sm:$0xff] }
 0xe2a   :  { %2862 = vmatmul.f32.gmra.mxu1 %v2804_v1 }
 0xe2c   :  { %v5986_v18 = vpop.f32.mrf.mxu2 }
 0xe2e   :  { %v5968_v51 = vpop.f32.mrf.mxu1 }
 0xe31   :  { %2661 = vmatmul.f32.gmra.mxu2 %v2569_v44  ;;  %v2578_v44 = vld [vmem:[#allocation2 + $0x2f8] sm:$0xff] }
 0xe32   :  { %2865 = vmatmul.f32.gmra.mxu1 %v2805_v47 }
 0xe34   :  { %v5992_v1 = vpop.f32.mrf.mxu2 }
 0xe36   :  { %v5970_v9 = vpop.f32.mrf.mxu1 }
 0xe39   :  { %2664 = vmatmul.f32.gmra.mxu2 %v2570_v11  ;;  %v2814_v11 = vld [vmem:[#allocation2 + $0x378] sm:$0xff] }
 0xe3a   :  { %2868 = vmatmul.f32.gmra.mxu1 %v2806_v46 }
 0xe3c   :  { %v5996_v46 = vpop.f32.mrf.mxu2 }
 0xe3e   :  { %v5972_v24 = vpop.f32.mrf.mxu1 }
 0xe41   :  { %2667 = vmatmul.f32.gmra.mxu2 %v2571_v8  ;;  %v2377_v8 = vadd.f32 %v5912_v3, %v5882_v42  ;;  %v2383_v3 = vadd.f32 %v5922_v40, %v5892_v16 }
 0xe42   :  { %2871 = vmatmul.f32.gmra.mxu1 %v2807_v41 }
 0xe43   :  { %v2692_v41 = vadd.f32 %v2596_v7, %v2377_v8 }
 0xe44   :  { %v6006_v7 = vpop.f32.mrf.mxu2 }
 0xe46   :  { %v5974_v34 = vpop.f32.mrf.mxu1 }
 0xe49   :  { %2670 = vmatmul.f32.gmra.mxu2 %v2572_v62 }
 0xe4a   :  { %2874 = vmatmul.f32.gmra.mxu1 %v2808_v21  ;;  %v2815_v21 = vld [vmem:[#allocation2 + $0x380] sm:$0xff] }
 0xe4e   :  { %v5976_v10 = vpop.f32.mrf.mxu1 }
 0xe51   :  { %2673 = vmatmul.f32.gmra.mxu2 %v2573_v60 }
 0xe52   :  { %2877 = vmatmul.f32.gmra.mxu1 %v2809_v4 }
 0xe56   :  { %v5980_v20 = vpop.f32.mrf.mxu1 }
 0xe59   :  { %2676 = vmatmul.f32.gmra.mxu2 %v2574_v29  ;;  %v2380_v29 = vadd.f32 %v5918_v39, %v5888_v53  ;;  %v2817_v39 = vld [vmem:[#allocation2 + $0x390] sm:$0xff] }
 0xe5a   :  { %2880 = vmatmul.f32.gmra.mxu1 %v2810_v56 }
 0xe5b   :  { %v2693_v56 = vadd.f32 %v2599_v0, %v2380_v29 }
 0xe5e   :  { %v5984_v19 = vpop.f32.mrf.mxu1 }
 0xe61   :  { %2679 = vmatmul.f32.gmra.mxu2 %v2575_v31 }
 0xe62   :  { %2883 = vmatmul.f32.gmra.mxu1 %v2811_v14  ;;  %v2816_v14 = vld [vmem:[#allocation2 + $0x388] sm:$0xff] }
 0xe67   :  { %v5988_v54 = vpop.f32.mrf.mxu1 }
 0xe69   :  { %2682 = vmatmul.f32.gmra.mxu2 %v2576_v61 }
 0xe6a   :  { %2886 = vmatmul.f32.gmra.mxu1 %v2812_v49 }
 0xe6f   :  { %v5990_v43 = vpop.f32.mrf.mxu1 }
 0xe71   :  { %2685 = vmatmul.f32.gmra.mxu2 %v2577_v63 }
 0xe72   :  { %2889 = vmatmul.f32.gmra.mxu1 %v2813_v37  ;;  %v6002_v37 = vpop.f32.mrf.mxu0 }
 0xe77   :  { %v5994_v47 = vpop.f32.mrf.mxu1 }
 0xe79   :  { %2688 = vmatmul.f32.gmra.mxu2 %v2578_v44  ;;  %v2694_v44 = vadd.f32 %v2602_v27, %v2383_v3 }
 0xe7a   :  { %2892 = vmatmul.f32.gmra.mxu1 %v2814_v11 }
 0xe7f   :  { %v2848_v62 = vpop.f32.mrf.mxu1 }
 0xe80   :  { %v2944_v60 = vadd.f32 %v2848_v62, %v2692_v41 }
 0xe82   :  { %v3986_v4 = vmul.f32 -1.442695, %v2944_v60  ;;  %2895 = vmatmul.f32.gmra.mxu1 %v2815_v21  ;;  %v2386_v21 = vadd.f32 %v5926_v17, %v5896_v5 }
 0xe84   :  { %4050 = vpow2.f32 %v3986_v4  ;;  %v6010_v4 = vpop.f32.mrf.mxu0  ;;  %v2695_v16 = vadd.f32 %v5978_v59, %v2386_v21  ;;  %v2389_v59 = vadd.f32 %v5930_v36, %v5900_v32  ;;  %v2819_v32 = vld [vmem:[#allocation2 + $0x3a0] sm:$0xff] }
 0xe87   :  { %v2851_v31 = vpop.f32.mrf.mxu1 }
 0xe88   :  { %v2945_v61 = vadd.f32 %v2851_v31, %v2693_v56  ;;  %v2818_v56 = vld [vmem:[#allocation2 + $0x398] sm:$0xff]  ;;  %v6013_v31 = vpop.f32.mrf.mxu2 }
 0xe8a   :  { %v4051_v49 = vpop.eup %4050  ;;  %v3987_v63 = vmul.f32 -1.442695, %v2945_v61  ;;  %2898 = vmatmul.f32.gmra.mxu1 %v2816_v14 }
 0xe8b   :  { %v3072_v42 = vadd.f32 1.0, %v4051_v49 }
 0xe8c   :  { %4052 = vpow2.f32 %v3987_v63  ;;  %v6022_v21 = vpop.f32.mrf.mxu0 }
 0xe8d   :  { %4054 = vrcp.f32 %v3072_v42  ;;  %v3115_v27 = vand.u32 2147483648, %v3072_v42  ;;  %v3113_v61 = vand.u32 2147483647, %v3072_v42  ;;  %vm3109_vm14 = vweird.f32 %v3072_v42 }
 0xe8f   :  { %v2854_v53 = vpop.f32.mrf.mxu1  ;;  %vm3114_vm1 = vcmp.eq.f32.partialorder %v3113_v61, 8.507059e+37 }
 0xe90   :  { %v2946_v0 = vadd.f32 %v2854_v53, %v2694_v44  ;;  %v3116_v44 = vor.u32 1.1754944e-38, %v3115_v27  ;;  %v6024_v27 = vpop.f32.mrf.mxu2 }
 0xe92   :  { %v4053_v11 = vpop.eup %4052  ;;  %v3988_v8 = vmul.f32 -1.442695, %v2946_v0  ;;  %2901 = vmatmul.f32.gmra.mxu1 %v2817_v39 }
 0xe93   :  { %v4055_v41 = vpop.eup %4054  ;;  %v3073_v62 = vadd.f32 1.0, %v4053_v11 }
 0xe94   :  { %v3105_v60 = vmul.f32 %v4055_v41, %v3072_v42  ;;  %4056 = vpow2.f32 %v3988_v8  ;;  %vm3110_vm13 = vweird.f32 %v4055_v41  ;;  %v2696_v42 = vadd.f32 %v5982_v25, %v2389_v59 }
 0xe95   :  { %4058 = vrcp.f32 %v3073_v62  ;;  %vm3111_vm15 = vmor %vm3109_vm14, %vm3110_vm13  ;;  %vm3124_vm3 = vweird.f32 %v3073_v62 }
 0xe96   :  { %v3106_v40 = vsub.f32 1.0, %v3105_v60  ;;  %v3130_v60 = vand.u32 2147483648, %v3073_v62 }
 0xe97   :  { %v2857_v29 = vpop.f32.mrf.mxu1 }
 0xe98   :  { %v3107_v14 = vmul.f32 %v4055_v41, %v3106_v40  ;;  %v2947_v49 = vadd.f32 %v2857_v29, %v2695_v16  ;;  %v3131_v25 = vor.u32 1.1754944e-38, %v3130_v60 }
 0xe9a   :  { %v4057_v63 = vpop.eup %4056  ;;  %v3108_v3 = vadd.f32 %v4055_v41, %v3107_v14  ;;  %v3989_v5 = vmul.f32 -1.442695, %v2947_v49  ;;  %2904 = vmatmul.f32.gmra.mxu1 %v2818_v56  ;;  %v2392_v49 = vadd.f32 %v5936_v52, %v5904_v57 }
 0xe9b   :  { %v4059_v17 = vpop.eup %4058  ;;  %v3074_v53 = vadd.f32 1.0, %v4057_v63 }
 0xe9c   :  { %v3112_v39 = vsel %vm3111_vm15, %v4055_v41, %v3108_v3  ;;  %v3120_v0 = vmul.f32 %v4059_v17, %v3073_v62  ;;  %4060 = vpow2.f32 %v3989_v5  ;;  %vm3125_vm2 = vweird.f32 %v4059_v17 }
 0xe9d   :  { %v3117_v11 = vsel %vm3114_vm1, %v3116_v44, %v3112_v39  ;;  %4062 = vrcp.f32 %v3074_v53  ;;  %v3128_v41 = vand.u32 2147483647, %v3073_v62  ;;  %vm3126_vm4 = vmor %vm3124_vm3, %vm3125_vm2  ;;  %v2697_v62 = vadd.f32 %v5986_v18, %v2392_v49 }
 0xe9e   :  { %3585 = vst.msk [vmem:[%s6280_s19] sm:$0xff] %vm3584_vm0, %v3117_v11  ;;  %v3121_v8 = vsub.f32 1.0, %v3120_v0  ;;  %v3145_v39 = vand.u32 2147483648, %v3074_v53  ;;  %v2820_v11 = vld [vmem:[#allocation2 + $0x3a8] sm:$0xff]  ;;  %v3143_v57 = vand.u32 2147483647, %v3074_v53  ;;  %vm3139_vm7 = vweird.f32 %v3074_v53 }
 0xe9f   :  { %v2860_v16 = vpop.f32.mrf.mxu1  ;;  %vm3129_vm5 = vcmp.eq.f32.partialorder %v3128_v41, 8.507059e+37  ;;  %v2395_v18 = vadd.f32 %v5941_v23, %v5908_v35  ;;  %v2821_v35 = vld [vmem:[#allocation2 + $0x3b0] sm:$0xff] }
 0xea0   :  { %v3122_v36 = vmul.f32 %v4059_v17, %v3121_v8  ;;  %v2948_v40 = vadd.f32 %v2860_v16, %v2696_v42  ;;  %vm3144_vm9 = vcmp.eq.f32.partialorder %v3143_v57, 8.507059e+37 }
 0xea2   :  { %v4061_v29 = vpop.eup %4060  ;;  %v3123_v56 = vadd.f32 %v4059_v17, %v3122_v36  ;;  %v3990_v14 = vmul.f32 -1.442695, %v2948_v40  ;;  %2907 = vmatmul.f32.gmra.mxu1 %v2819_v32  ;;  %v3146_v36 = vor.u32 1.1754944e-38, %v3145_v39  ;;  %v6037_v40 = vpop.f32.mrf.mxu2 }
 0xea3   :  { %v4063_v61 = vpop.eup %4062  ;;  %v3075_v63 = vadd.f32 1.0, %v4061_v29 }
 0xea4   :  { %v3127_v3 = vsel %vm3126_vm4, %v4059_v17, %v3123_v56  ;;  %v3135_v5 = vmul.f32 %v4063_v61, %v3074_v53  ;;  %4064 = vpow2.f32 %v3990_v14  ;;  %vm3140_vm6 = vweird.f32 %v4063_v61  ;;  %v6033_v17 = vpop.f32.mrf.mxu0 }
 0xea5   :  { %v3132_v44 = vsel %vm3129_vm5, %v3131_v25, %v3127_v3  ;;  %4066 = vrcp.f32 %v3075_v63  ;;  %vm3141_vm8 = vmor %vm3139_vm7, %vm3140_vm6  ;;  %v2698_v53 = vadd.f32 %v5992_v1, %v2395_v18  ;;  %v3160_v49 = vand.u32 2147483648, %v3075_v63 }
 0xea6   :  { %3586 = vst.msk [vmem:[%s6280_s19 + $0x8] sm:$0xff] %vm3584_vm0, %v3132_v44  ;;  %v3136_v59 = vsub.f32 1.0, %v3135_v5  ;;  %v3158_v5 = vand.u32 2147483647, %v3075_v63  ;;  %vm3154_vm11 = vweird.f32 %v3075_v63  ;;  %v2398_v1 = vadd.f32 %v5950_v15, %v5914_v12  ;;  %v2822_v12 = vld [vmem:[#allocation2 + $0x3b8] sm:$0xff] }
 0xea7   :  { %v2863_v0 = vpop.f32.mrf.mxu1 }
 0xea8   :  { %v3137_v42 = vmul.f32 %v4063_v61, %v3136_v59  ;;  %v2949_v52 = vadd.f32 %v2863_v0, %v2697_v62  ;;  %vm3159_vm13 = vcmp.eq.f32.partialorder %v3158_v5, 8.507059e+37 }
 0xeaa   :  { %v4065_v8 = vpop.eup %4064  ;;  %v3138_v60 = vadd.f32 %v4063_v61, %v3137_v42  ;;  %v3991_v16 = vmul.f32 -1.442695, %v2949_v52  ;;  %2910 = vmatmul.f32.gmra.mxu1 %v2820_v11  ;;  %v3161_v11 = vor.u32 1.1754944e-38, %v3160_v49 }
 0xeab   :  { %v4067_v32 = vpop.eup %4066  ;;  %v3076_v41 = vadd.f32 1.0, %v4065_v8 }
 0xeac   :  { %v3142_v29 = vsel %vm3141_vm8, %v4063_v61, %v3138_v60  ;;  %v3150_v56 = vmul.f32 %v4067_v32, %v3075_v63  ;;  %4068 = vpow2.f32 %v3991_v16  ;;  %vm3155_vm10 = vweird.f32 %v4067_v32  ;;  %v6044_v39 = vpop.f32.mrf.mxu0  ;;  %v6048_v60 = vpop.f32.mrf.mxu2 }
 0xead   :  { %v3147_v14 = vsel %vm3144_vm9, %v3146_v36, %v3142_v29  ;;  %4070 = vrcp.f32 %v3076_v41  ;;  %vm3156_vm12 = vmor %vm3154_vm11, %vm3155_vm10  ;;  %v2699_v63 = vadd.f32 %v5996_v46, %v2398_v1  ;;  %v3175_v36 = vand.u32 2147483648, %v3076_v41 }
 0xeae   :  { %3587 = vst.msk [vmem:[%s6280_s19 + $0x10] sm:$0xff] %vm3584_vm0, %v3147_v14  ;;  %v3151_v25 = vsub.f32 1.0, %v3150_v56  ;;  %vm3169_vm15 = vweird.f32 %v3076_v41 }
 0xeaf   :  { %v2866_v3 = vpop.f32.mrf.mxu1  ;;  %v3176_v49 = vor.u32 1.1754944e-38, %v3175_v36 }
 0xeb0   :  { %v3152_v23 = vmul.f32 %v4067_v32, %v3151_v25  ;;  %v2950_v61 = vadd.f32 %v2866_v3, %v2698_v53  ;;  %v2401_v3 = vadd.f32 %v6002_v37, %v5916_v28  ;;  %v2823_v28 = vld [vmem:[#allocation2 + $0x3c0] sm:$0xff] }
 0xeb2   :  { %v4069_v44 = vpop.eup %4068  ;;  %v3153_v62 = vadd.f32 %v4067_v32, %v3152_v23  ;;  %v3992_v59 = vmul.f32 -1.442695, %v2950_v61  ;;  %2913 = vmatmul.f32.gmra.mxu1 %v2821_v35 }
 0xeb3   :  { %v4071_v0 = vpop.eup %4070  ;;  %v3077_v42 = vadd.f32 1.0, %v4069_v44 }
 0xeb4   :  { %v3157_v57 = vsel %vm3156_vm12, %v4067_v32, %v3153_v62  ;;  %v3165_v52 = vmul.f32 %v4071_v0, %v3076_v41  ;;  %4072 = vpow2.f32 %v3992_v59  ;;  %vm3170_vm14 = vweird.f32 %v4071_v0  ;;  %v6057_v5 = vpop.f32.mrf.mxu0  ;;  %v6064_v37 = vpop.f32.mrf.mxu2 }
 0xeb5   :  { %v3162_v8 = vsel %vm3159_vm13, %v3161_v11, %v3157_v57  ;;  %4074 = vrcp.f32 %v3077_v42  ;;  %v3173_v32 = vand.u32 2147483647, %v3076_v41  ;;  %vm3171_vm1 = vmor %vm3169_vm15, %vm3170_vm14  ;;  %v2700_v41 = vadd.f32 %v6006_v7, %v2401_v3 }
 0xeb6   :  { %3588 = vst.msk [vmem:[%s6280_s19 + $0x18] sm:$0xff] %vm3584_vm0, %v3162_v8  ;;  %v3166_v16 = vsub.f32 1.0, %v3165_v52  ;;  %v3190_v62 = vand.u32 2147483648, %v3077_v42  ;;  %v3188_v11 = vand.u32 2147483647, %v3077_v42  ;;  %vm3184_vm4 = vweird.f32 %v3077_v42 }
 0xeb7   :  { %v2869_v18 = vpop.f32.mrf.mxu1  ;;  %vm3174_vm2 = vcmp.eq.f32.partialorder %v3173_v32, 8.507059e+37  ;;  %v2404_v7 = vadd.f32 %v6010_v4, %v5920_v22  ;;  %v2824_v22 = vld [vmem:[#allocation2 + $0x3c8] sm:$0xff] }
 0xeb8   :  { %v3167_v15 = vmul.f32 %v4071_v0, %v3166_v16  ;;  %v2951_v29 = vadd.f32 %v2869_v18, %v2699_v63  ;;  %v3191_v16 = vor.u32 1.1754944e-38, %v3190_v62  ;;  %vm3189_vm6 = vcmp.eq.f32.partialorder %v3188_v11, 8.507059e+37 }
 0xeba   :  { %v4073_v56 = vpop.eup %4072  ;;  %v3168_v14 = vadd.f32 %v4071_v0, %v3167_v15  ;;  %v3993_v53 = vmul.f32 -1.442695, %v2951_v29  ;;  %2916 = vmatmul.f32.gmra.mxu1 %v2822_v12 }
 0xebb   :  { %v4075_v25 = vpop.eup %4074  ;;  %v3078_v46 = vadd.f32 1.0, %v4073_v56 }
 0xebc   :  { %v3172_v35 = vsel %vm3171_vm1, %v4071_v0, %v3168_v14  ;;  %v3180_v23 = vmul.f32 %v4075_v25, %v3077_v42  ;;  %4076 = vpow2.f32 %v3993_v53  ;;  %vm3185_vm3 = vweird.f32 %v4075_v25  ;;  %v6073_v29 = vpop.f32.mrf.mxu0 }
 0xebd   :  { %v3177_v61 = vsel %vm3174_vm2, %v3176_v49, %v3172_v35  ;;  %4078 = vrcp.f32 %v3078_v46  ;;  %vm3186_vm5 = vmor %vm3184_vm4, %vm3185_vm3  ;;  %v2701_v42 = vadd.f32 %v6013_v31, %v2404_v7  ;;  %v3205_v56 = vand.u32 2147483648, %v3078_v46  ;;  %v6075_v49 = vpop.f32.mrf.mxu2 }
 0xebe   :  { %3589 = vst.msk [vmem:[%s6280_s19 + $0x20] sm:$0xff] %vm3584_vm0, %v3177_v61  ;;  %v3181_v44 = vsub.f32 1.0, %v3180_v23  ;;  %v3203_v53 = vand.u32 2147483647, %v3078_v46  ;;  %vm3199_vm8 = vweird.f32 %v3078_v46 }
 0xebf   :  { %v2872_v59 = vpop.f32.mrf.mxu1  ;;  %v3206_v31 = vor.u32 1.1754944e-38, %v3205_v56 }
 0xec0   :  { %v3182_v0 = vmul.f32 %v4075_v25, %v3181_v44  ;;  %v2952_v1 = vadd.f32 %v2872_v59, %v2700_v41  ;;  %v2407_v41 = vadd.f32 %v6022_v21, %v5924_v45  ;;  %vm3204_vm10 = vcmp.eq.f32.partialorder %v3203_v53, 8.507059e+37 }
 0xec2   :  { %v4077_v57 = vpop.eup %4076  ;;  %v3183_v52 = vadd.f32 %v4075_v25, %v3182_v0  ;;  %v3994_v8 = vmul.f32 -1.442695, %v2952_v1  ;;  %2919 = vmatmul.f32.gmra.mxu1 %v2823_v28 }
 0xec3   :  { %v4079_v63 = vpop.eup %4078  ;;  %v3079_v36 = vadd.f32 1.0, %v4077_v57  ;;  %v2825_v57 = vld [vmem:[#allocation2 + $0x3d0] sm:$0xff] }
 0xec4   :  { %v3187_v18 = vsel %vm3186_vm5, %v4075_v25, %v3183_v52  ;;  %v3195_v12 = vmul.f32 %v4079_v63, %v3078_v46  ;;  %4080 = vpow2.f32 %v3994_v8  ;;  %vm3200_vm7 = vweird.f32 %v4079_v63  ;;  %v6084_v8 = vpop.f32.mrf.mxu0 }
 0xec5   :  { %v3192_v15 = vsel %vm3189_vm6, %v3191_v16, %v3187_v18  ;;  %4082 = vrcp.f32 %v3079_v36  ;;  %vm3201_vm9 = vmor %vm3199_vm8, %vm3200_vm7  ;;  %v2702_v46 = vadd.f32 %v6024_v27, %v2407_v41  ;;  %v3220_v11 = vand.u32 2147483648, %v3079_v36 }
 0xec6   :  { %3590 = vst.msk [vmem:[%s6280_s19 + $0x28] sm:$0xff] %vm3584_vm0, %v3192_v15  ;;  %v3196_v32 = vsub.f32 1.0, %v3195_v12  ;;  %v3218_v45 = vand.u32 2147483647, %v3079_v36  ;;  %vm3214_vm12 = vweird.f32 %v3079_v36  ;;  %v2410_v27 = vadd.f32 %v6033_v17, %v5928_v38  ;;  %v2826_v38 = vld [vmem:[#allocation2 + $0x3d8] sm:$0xff] }
 0xec7   :  { %v2875_v14 = vpop.f32.mrf.mxu1  ;;  %v3221_v12 = vor.u32 1.1754944e-38, %v3220_v11 }
 0xec8   :  { %v3197_v4 = vmul.f32 %v4079_v63, %v3196_v32  ;;  %v2953_v25 = vadd.f32 %v2875_v14, %v2701_v42  ;;  %v6088_v42 = vpop.f32.mrf.mxu2  ;;  %vm3219_vm14 = vcmp.eq.f32.partialorder %v3218_v45, 8.507059e+37 }
 0xeca   :  { %v4081_v3 = vpop.eup %4080  ;;  %v3198_v35 = vadd.f32 %v4079_v63, %v3197_v4  ;;  %v3995_v23 = vmul.f32 -1.442695, %v2953_v25  ;;  %2922 = vmatmul.f32.gmra.mxu1 %v2824_v22 }
 0xecb   :  { %v4083_v61 = vpop.eup %4082  ;;  %v3080_v44 = vadd.f32 1.0, %v4081_v3 }
 0xecc   :  { %v3202_v62 = vsel %vm3201_vm9, %v4079_v63, %v3198_v35  ;;  %v3210_v59 = vmul.f32 %v4083_v61, %v3079_v36  ;;  %4084 = vpow2.f32 %v3995_v23  ;;  %vm3215_vm11 = vweird.f32 %v4083_v61 }
 0xecd   :  { %v3207_v28 = vsel %vm3204_vm10, %v3206_v31, %v3202_v62  ;;  %4086 = vrcp.f32 %v3080_v44  ;;  %vm3216_vm13 = vmor %vm3214_vm12, %vm3215_vm11  ;;  %v2703_v36 = vadd.f32 %v6037_v40, %v2410_v27  ;;  %v3235_v4 = vand.u32 2147483648, %v3080_v44  ;;  %v6095_v31 = vpop.f32.mrf.mxu0 }
 0xece   :  { %3591 = vst.msk [vmem:[%s6280_s19 + $0x30] sm:$0xff] %vm3584_vm0, %v3207_v28  ;;  %v3211_v0 = vsub.f32 1.0, %v3210_v59  ;;  %v3233_v25 = vand.u32 2147483647, %v3080_v44  ;;  %vm3229_vm1 = vweird.f32 %v3080_v44  ;;  %v2413_v40 = vadd.f32 %v6044_v39, %v5932_v2  ;;  %v2827_v2 = vld [vmem:[#allocation2 + $0x3e0] sm:$0xff] }
 0xecf   :  { %v2878_v1 = vpop.f32.mrf.mxu1  ;;  %v3236_v62 = vor.u32 1.1754944e-38, %v3235_v4  ;;  %v2416_v27 = vadd.f32 %v6057_v5, %v5934_v26  ;;  %v2828_v5 = vld [vmem:[#allocation2 + $0x3e8] sm:$0xff] }
 0xed0   :  { %v3212_v52 = vmul.f32 %v4083_v61, %v3211_v0  ;;  %v2954_v21 = vadd.f32 %v2878_v1, %v2702_v46  ;;  %vm3234_vm3 = vcmp.eq.f32.partialorder %v3233_v25, 8.507059e+37  ;;  %v6099_v11 = vpop.f32.mrf.mxu2 }
 0xed2   :  { %v4085_v63 = vpop.eup %4084  ;;  %v3213_v16 = vadd.f32 %v4083_v61, %v3212_v52  ;;  %v3996_v7 = vmul.f32 -1.442695, %v2954_v21  ;;  %2925 = vmatmul.f32.gmra.mxu1 %v2825_v57 }
 0xed3   :  { %v4087_v18 = vpop.eup %4086  ;;  %v3081_v15 = vadd.f32 1.0, %v4085_v63 }
 0xed4   :  { %v3217_v32 = vsel %vm3216_vm13, %v4083_v61, %v3213_v16  ;;  %v3225_v56 = vmul.f32 %v4087_v18, %v3080_v44  ;;  %4088 = vpow2.f32 %v3996_v7  ;;  %vm3230_vm15 = vweird.f32 %v4087_v18 }
 0xed5   :  { %v3222_v14 = vsel %vm3219_vm14, %v3221_v12, %v3217_v32  ;;  %4090 = vrcp.f32 %v3081_v15  ;;  %vm3231_vm2 = vmor %vm3229_vm1, %vm3230_vm15  ;;  %v2704_v44 = vadd.f32 %v6048_v60, %v2413_v40  ;;  %v3250_v57 = vand.u32 2147483648, %v3081_v15 }
 0xed6   :  { %3592 = vst.msk [vmem:[%s6280_s19 + $0x38] sm:$0xff] %vm3584_vm0, %v3222_v14  ;;  %v3226_v22 = vsub.f32 1.0, %v3225_v56  ;;  %v3248_v45 = vand.u32 2147483647, %v3081_v15  ;;  %vm3244_vm5 = vweird.f32 %v3081_v15  ;;  %v6108_v14 = vpop.f32.mrf.mxu0 }
 0xed7   :  { %v2881_v53 = vpop.f32.mrf.mxu1  ;;  %v3251_v12 = vor.u32 1.1754944e-38, %v3250_v57 }
 0xed8   :  { %v3227_v17 = vmul.f32 %v4087_v18, %v3226_v22  ;;  %v2955_v3 = vadd.f32 %v2881_v53, %v2703_v36  ;;  %vm3249_vm7 = vcmp.eq.f32.partialorder %v3248_v45, 8.507059e+37  ;;  %v6115_v26 = vpop.f32.mrf.mxu2 }
 0xeda   :  { %v4089_v35 = vpop.eup %4088  ;;  %v3228_v23 = vadd.f32 %v4087_v18, %v3227_v17  ;;  %v3997_v61 = vmul.f32 -1.442695, %v2955_v3  ;;  %2928 = vmatmul.f32.gmra.mxu1 %v2826_v38 }
 0xedb   :  { %v4091_v41 = vpop.eup %4090  ;;  %v3082_v59 = vadd.f32 1.0, %v4089_v35 }
 0xedc   :  { %v3232_v28 = vsel %vm3231_vm2, %v4087_v18, %v3228_v23  ;;  %v3240_v46 = vmul.f32 %v4091_v41, %v3081_v15  ;;  %4092 = vpow2.f32 %v3997_v61  ;;  %vm3245_vm4 = vweird.f32 %v4091_v41 }
 0xedd   :  { %v3237_v0 = vsel %vm3234_vm3, %v3236_v62, %v3232_v28  ;;  %4094 = vrcp.f32 %v3082_v59  ;;  %vm3246_vm6 = vmor %vm3244_vm5, %vm3245_vm4  ;;  %v2705_v15 = vadd.f32 %v6064_v37, %v2416_v27  ;;  %v3265_v4 = vand.u32 2147483648, %v3082_v59 }
 0xede   :  { %3593 = vst.msk [vmem:[%s6280_s19 + $0x40] sm:$0xff] %vm3584_vm0, %v3237_v0  ;;  %v3241_v1 = vsub.f32 1.0, %v3240_v46  ;;  %v3263_v17 = vand.u32 2147483647, %v3082_v59  ;;  %vm3259_vm9 = vweird.f32 %v3082_v59  ;;  %v2419_v37 = vadd.f32 %v6073_v29, %v5938_v50  ;;  %v2829_v50 = vld [vmem:[#allocation2 + $0x3f0] sm:$0xff] }
 0xedf   :  { %v2884_v52 = vpop.f32.mrf.mxu1 }
 0xee0   :  { %v3242_v39 = vmul.f32 %v4091_v41, %v3241_v1  ;;  %v2956_v21 = vadd.f32 %v2884_v52, %v2704_v44  ;;  %vm3264_vm11 = vcmp.eq.f32.partialorder %v3263_v17, 8.507059e+37  ;;  %v6124_v44 = vpop.f32.mrf.mxu0 }
 0xee2   :  { %v4093_v63 = vpop.eup %4092  ;;  %v3243_v16 = vadd.f32 %v4091_v41, %v3242_v39  ;;  %v3998_v7 = vmul.f32 -1.442695, %v2956_v21  ;;  %2931 = vmatmul.f32.gmra.mxu1 %v2827_v2  ;;  %v6126_v39 = vpop.f32.mrf.mxu2 }
 0xee3   :  { %v4095_v18 = vpop.eup %4094  ;;  %v3083_v60 = vadd.f32 1.0, %v4093_v63 }
 0xee4   :  { %v3247_v32 = vsel %vm3246_vm6, %v4091_v41, %v3243_v16  ;;  %v3255_v56 = vmul.f32 %v4095_v18, %v3082_v59  ;;  %4096 = vpow2.f32 %v3998_v7  ;;  %vm3260_vm8 = vweird.f32 %v4095_v18 }
 0xee5   :  { %v3252_v36 = vsel %vm3249_vm7, %v3251_v12, %v3247_v32  ;;  %4098 = vrcp.f32 %v3083_v60  ;;  %vm3261_vm10 = vmor %vm3259_vm9, %vm3260_vm8  ;;  %v3266_v41 = vor.u32 1.1754944e-38, %v3265_v4  ;;  %v2706_v59 = vadd.f32 %v6075_v49, %v2419_v37 }
 0xee6   :  { %3594 = vst.msk [vmem:[%s6280_s19 + $0x48] sm:$0xff] %vm3584_vm0, %v3252_v36  ;;  %v3256_v22 = vsub.f32 1.0, %v3255_v56  ;;  %v3280_v1 = vand.u32 2147483648, %v3083_v60  ;;  %v3278_v52 = vand.u32 2147483647, %v3083_v60  ;;  %vm3274_vm13 = vweird.f32 %v3083_v60 }
 0xee7   :  { %v2887_v53 = vpop.f32.mrf.mxu1  ;;  %v2422_v7 = vadd.f32 %v6084_v8, %v5946_v55 }
 0xee8   :  { %v3257_v38 = vmul.f32 %v4095_v18, %v3256_v22  ;;  %v2957_v25 = vadd.f32 %v2887_v53, %v2705_v15  ;;  %v3281_v49 = vor.u32 1.1754944e-38, %v3280_v1  ;;  %vm3279_vm15 = vcmp.eq.f32.partialorder %v3278_v52, 8.507059e+37  ;;  %v2830_v22 = vld [vmem:[#allocation2 + $0x3f8] sm:$0xff]  ;;  %v6135_v53 = vpop.f32.mrf.mxu0 }
 0xeea   :  { %v4097_v3 = vpop.eup %4096  ;;  %v3258_v35 = vadd.f32 %v4095_v18, %v3257_v38  ;;  %v3999_v23 = vmul.f32 -1.442695, %v2957_v25  ;;  %2934 = vmatmul.f32.gmra.mxu1 %v2828_v5 }
 0xeeb   :  { %v4099_v61 = vpop.eup %4098  ;;  %v3084_v62 = vadd.f32 1.0, %v4097_v3 }
 0xeec   :  { %v3262_v40 = vsel %vm3261_vm10, %v4095_v18, %v3258_v35  ;;  %v3270_v28 = vmul.f32 %v4099_v61, %v3083_v60  ;;  %4100 = vpow2.f32 %v3999_v23  ;;  %vm3275_vm12 = vweird.f32 %v4099_v61  ;;  %v6139_v23 = vpop.f32.mrf.mxu2 }
 0xeed   :  { %v3267_v46 = vsel %vm3264_vm11, %v3266_v41, %v3262_v40  ;;  %4102 = vrcp.f32 %v3084_v62  ;;  %vm3276_vm14 = vmor %vm3274_vm13, %vm3275_vm12  ;;  %v2707_v60 = vadd.f32 %v6088_v42, %v2422_v7  ;;  %v3295_v36 = vand.u32 2147483648, %v3084_v62 }
 0xeee   :  { %3595 = vst.msk [vmem:[%s6280_s19 + $0x50] sm:$0xff] %vm3584_vm0, %v3267_v46  ;;  %v3271_v0 = vsub.f32 1.0, %v3270_v28  ;;  %v3293_v55 = vand.u32 2147483647, %v3084_v62  ;;  %vm3289_vm2 = vweird.f32 %v3084_v62  ;;  %v2425_v42 = vadd.f32 %v6095_v31, %v5954_v33 }
 0xeef   :  { %v2890_v57 = vpop.f32.mrf.mxu1  ;;  %v3296_v3 = vor.u32 1.1754944e-38, %v3295_v36 }
 0xef0   :  { %v3272_v29 = vmul.f32 %v4099_v61, %v3271_v0  ;;  %v2958_v2 = vadd.f32 %v2890_v57, %v2706_v59  ;;  %vm3294_vm4 = vcmp.eq.f32.partialorder %v3293_v55, 8.507059e+37 }
 0xef2   :  { %v4101_v45 = vpop.eup %4100  ;;  %v3273_v21 = vadd.f32 %v4099_v61, %v3272_v29  ;;  %v4000_v63 = vmul.f32 -1.442695, %v2958_v2  ;;  %2937 = vmatmul.f32.gmra.mxu1 %v2829_v50  ;;  %v6146_v50 = vpop.f32.mrf.mxu0  ;;  %v2428_v2 = vadd.f32 %v6108_v14, %v5958_v6 }
 0xef3   :  { %v4103_v16 = vpop.eup %4102  ;;  %v3085_v18 = vadd.f32 1.0, %v4101_v45 }
 0xef4   :  { %v3277_v12 = vsel %vm3276_vm14, %v4099_v61, %v3273_v21  ;;  %v3285_v27 = vmul.f32 %v4103_v16, %v3084_v62  ;;  %4104 = vpow2.f32 %v4000_v63  ;;  %vm3290_vm1 = vweird.f32 %v4103_v16 }
 0xef5   :  { %v3282_v32 = vsel %vm3279_vm15, %v3281_v49, %v3277_v12  ;;  %4106 = vrcp.f32 %v3085_v18  ;;  %vm3291_vm3 = vmor %vm3289_vm2, %vm3290_vm1  ;;  %v2708_v62 = vadd.f32 %v6099_v11, %v2425_v42  ;;  %v3310_v28 = vand.u32 2147483648, %v3085_v18 }
 0xef6   :  { %3596 = vst.msk [vmem:[%s6280_s19 + $0x58] sm:$0xff] %vm3584_vm0, %v3282_v32  ;;  %v3286_v56 = vsub.f32 1.0, %v3285_v27  ;;  %v3308_v31 = vand.u32 2147483647, %v3085_v18  ;;  %vm3304_vm6 = vweird.f32 %v3085_v18  ;;  %v2709_v49 = vadd.f32 %v6115_v26, %v2428_v2 }
 0xef7   :  { %v2893_v15 = vpop.f32.mrf.mxu1  ;;  %v3311_v52 = vor.u32 1.1754944e-38, %v3310_v28  ;;  %v2434_v28 = vadd.f32 %v6135_v53, %v5962_v30 }
 0xef8   :  { %v3287_v4 = vmul.f32 %v4103_v16, %v3286_v56  ;;  %v2959_v8 = vadd.f32 %v2893_v15, %v2707_v60  ;;  %vm3309_vm8 = vcmp.eq.f32.partialorder %v3308_v31, 8.507059e+37 }
 0xefa   :  { %v4105_v5 = vpop.eup %4104  ;;  %v3288_v38 = vadd.f32 %v4103_v16, %v3287_v4  ;;  %v4001_v17 = vmul.f32 -1.442695, %v2959_v8  ;;  %2940 = vmatmul.f32.gmra.mxu1 %v2830_v22  ;;  %v2431_v22 = vadd.f32 %v6124_v44, %v5960_v58  ;;  %v6159_v8 = vpop.f32.mrf.mxu0 }
 0xefb   :  { %v4107_v25 = vpop.eup %4106  ;;  %v3086_v35 = vadd.f32 1.0, %v4105_v5 }
 0xefc   :  { %v3292_v61 = vsel %vm3291_vm3, %v4103_v16, %v3288_v38  ;;  %v3300_v41 = vmul.f32 %v4107_v25, %v3085_v18  ;;  %4108 = vpow2.f32 %v4001_v17  ;;  %vm3305_vm5 = vweird.f32 %v4107_v25  ;;  %v6150_v16 = vpop.f32.mrf.mxu2 }
 0xefd   :  { %v3297_v37 = vsel %vm3294_vm4, %v3296_v3, %v3292_v61  ;;  %4110 = vrcp.f32 %v3086_v35  ;;  %vm3306_vm7 = vmor %vm3304_vm6, %vm3305_vm5  ;;  %v3325_v18 = vand.u32 2147483648, %v3086_v35  ;;  %v3323_v14 = vand.u32 2147483647, %v3086_v35 }
 0xefe   :  { %3597 = vst.msk [vmem:[%s6280_s19 + $0x60] sm:$0xff] %vm3584_vm0, %v3297_v37  ;;  %v3301_v40 = vsub.f32 1.0, %v3300_v41  ;;  %vm3319_vm10 = vweird.f32 %v3086_v35  ;;  %v2710_v38 = vadd.f32 %v6126_v39, %v2431_v22 }
 0xeff   :  { %v2896_v46 = vpop.f32.mrf.mxu1  ;;  %v3326_v15 = vor.u32 1.1754944e-38, %v3325_v18  ;;  %vm3324_vm12 = vcmp.eq.f32.partialorder %v3323_v14, 8.507059e+37 }
 0xf00   :  { %v3302_v33 = vmul.f32 %v4107_v25, %v3301_v40  ;;  %v2960_v59 = vadd.f32 %v2896_v46, %v2708_v62 }
 0xf02   :  { %v4109_v0 = vpop.eup %4108  ;;  %v3303_v1 = vadd.f32 %v4107_v25, %v3302_v33  ;;  %v4002_v57 = vmul.f32 -1.442695, %v2960_v59  ;;  %v2711_v59 = vadd.f32 %v6139_v23, %v2434_v28  ;;  %v2437_v23 = vadd.f32 %v6146_v50, %v5964_v13 }
 0xf03   :  { %v4111_v29 = vpop.eup %4110  ;;  %v3087_v11 = vadd.f32 1.0, %v4109_v0 }
 0xf04   :  { %v3307_v45 = vsel %vm3306_vm7, %v4107_v25, %v3303_v1  ;;  %v3315_v21 = vmul.f32 %v4111_v29, %v3086_v35  ;;  %4112 = vpow2.f32 %v4002_v57  ;;  %vm3320_vm9 = vweird.f32 %v4111_v29  ;;  %v6166_v3 = vpop.f32.mrf.mxu2  ;;  %v6175_v1 = vpop.f32.mrf.mxu0 }
 0xf05   :  { %v3312_v63 = vsel %vm3309_vm8, %v3311_v52, %v3307_v45  ;;  %4114 = vrcp.f32 %v3087_v11  ;;  %vm3321_vm11 = vmor %vm3319_vm10, %vm3320_vm9  ;;  %v3340_v25 = vand.u32 2147483648, %v3087_v11  ;;  %v3338_v42 = vand.u32 2147483647, %v3087_v11 }
 0xf06   :  { %3598 = vst.msk [vmem:[%s6280_s19 + $0x68] sm:$0xff] %vm3584_vm0, %v3312_v63  ;;  %v3316_v7 = vsub.f32 1.0, %v3315_v21  ;;  %vm3334_vm14 = vweird.f32 %v3087_v11  ;;  %v2712_v14 = vadd.f32 %v6150_v16, %v2437_v23 }
 0xf07   :  { %v2899_v12 = vpop.f32.mrf.mxu1  ;;  %v3341_v40 = vor.u32 1.1754944e-38, %v3340_v25  ;;  %vm3339_vm1 = vcmp.eq.f32.partialorder %v3338_v42, 8.507059e+37 }
 0xf08   :  { %v3317_v6 = vmul.f32 %v4111_v29, %v3316_v7  ;;  %v2961_v27 = vadd.f32 %v2899_v12, %v2709_v49 }
 0xf0a   :  { %v4113_v32 = vpop.eup %4112  ;;  %v3318_v60 = vadd.f32 %v4111_v29, %v3317_v6  ;;  %v4003_v56 = vmul.f32 -1.442695, %v2961_v27 }
 0xf0b   :  { %v4115_v36 = vpop.eup %4114  ;;  %v3088_v4 = vadd.f32 1.0, %v4113_v32 }
 0xf0c   :  { %v3322_v55 = vsel %vm3321_vm11, %v4111_v29, %v3318_v60  ;;  %v3330_v26 = vmul.f32 %v4115_v36, %v3087_v11  ;;  %4116 = vpow2.f32 %v4003_v56  ;;  %vm3335_vm13 = vweird.f32 %v4115_v36  ;;  %v6177_v2 = vpop.f32.mrf.mxu2  ;;  %v2445_v50 = vpop.f32.mrf.mxu0 }
 0xf0d   :  { %v3327_v5 = vsel %vm3324_vm12, %v3326_v15, %v3322_v55  ;;  %4118 = vrcp.f32 %v3088_v4  ;;  %vm3336_vm15 = vmor %vm3334_vm14, %vm3335_vm13  ;;  %v3355_v57 = vand.u32 2147483648, %v3088_v4  ;;  %v3353_v53 = vand.u32 2147483647, %v3088_v4 }
 0xf0e   :  { %3599 = vst.msk [vmem:[%s6280_s19 + $0x70] sm:$0xff] %vm3584_vm0, %v3327_v5  ;;  %v3331_v17 = vsub.f32 1.0, %v3330_v26  ;;  %vm3349_vm3 = vweird.f32 %v3088_v4  ;;  %v2440_v5 = vadd.f32 %v6159_v8, %v5966_v48 }
 0xf0f   :  { %v2902_v58 = vpop.f32.mrf.mxu1  ;;  %v3356_v49 = vor.u32 1.1754944e-38, %v3355_v57  ;;  %vm3354_vm5 = vcmp.eq.f32.partialorder %v3353_v53, 8.507059e+37 }
 0xf10   :  { %v3332_v44 = vmul.f32 %v4115_v36, %v3331_v17  ;;  %v2962_v35 = vadd.f32 %v2902_v58, %v2710_v38 }
 0xf12   :  { %v4117_v61 = vpop.eup %4116  ;;  %v3333_v41 = vadd.f32 %v4115_v36, %v3332_v44  ;;  %v4004_v37 = vmul.f32 -1.442695, %v2962_v35  ;;  %v2713_v44 = vadd.f32 %v6166_v3, %v2440_v5 }
 0xf13   :  { %v4119_v62 = vpop.eup %4118  ;;  %v3089_v39 = vadd.f32 1.0, %v4117_v61 }
 0xf14   :  { %v3337_v46 = vsel %vm3336_vm15, %v4115_v36, %v3333_v41  ;;  %v3345_v33 = vmul.f32 %v4119_v62, %v3088_v4  ;;  %4120 = vpow2.f32 %v4004_v37  ;;  %vm3350_vm2 = vweird.f32 %v4119_v62  ;;  %v2665_v16 = vpop.f32.mrf.mxu2 }
 0xf15   :  { %v3342_v31 = vsel %vm3339_vm1, %v3341_v40, %v3337_v46  ;;  %4122 = vrcp.f32 %v3089_v39  ;;  %vm3351_vm4 = vmor %vm3349_vm3, %vm3350_vm2  ;;  %v3370_v32 = vand.u32 2147483648, %v3089_v39  ;;  %v3368_v13 = vand.u32 2147483647, %v3089_v39  ;;  %v2448_v40 = vpop.f32.mrf.mxu0 }
 0xf16   :  { %3600 = vst.msk [vmem:[%s6280_s19 + $0x78] sm:$0xff] %vm3584_vm0, %v3342_v31  ;;  %v3346_v0 = vsub.f32 1.0, %v3345_v33  ;;  %vm3364_vm7 = vweird.f32 %v3089_v39  ;;  %v2443_v33 = vadd.f32 %v6175_v1, %v5968_v51  ;;  %v2449_v5 = vadd.f32 %v2448_v40, %v5972_v24 }
 0xf17   :  { %v2905_v29 = vpop.f32.mrf.mxu1  ;;  %v3371_v26 = vor.u32 1.1754944e-38, %v3370_v32  ;;  %vm3369_vm9 = vcmp.eq.f32.partialorder %v3368_v13, 8.507059e+37 }
 0xf18   :  { %v3347_v30 = vmul.f32 %v4119_v62, %v3346_v0  ;;  %v2963_v52 = vadd.f32 %v2905_v29, %v2711_v59  ;;  %v2714_v29 = vadd.f32 %v6177_v2, %v2443_v33 }
 0xf1a   :  { %v4121_v11 = vpop.eup %4120  ;;  %v3348_v45 = vadd.f32 %v4119_v62, %v3347_v30  ;;  %v4005_v21 = vmul.f32 -1.442695, %v2963_v52 }
 0xf1b   :  { %v4123_v63 = vpop.eup %4122  ;;  %v3090_v7 = vadd.f32 1.0, %v4121_v11 }
 0xf1c   :  { %v3352_v18 = vsel %vm3351_vm4, %v4119_v62, %v3348_v45  ;;  %v3360_v12 = vmul.f32 %v4123_v63, %v3089_v39  ;;  %4124 = vpow2.f32 %v4005_v21  ;;  %vm3365_vm6 = vweird.f32 %v4123_v63  ;;  %v2668_v57 = vpop.f32.mrf.mxu2 }
 0xf1d   :  { %v3357_v6 = vsel %vm3354_vm5, %v3356_v49, %v3352_v18  ;;  %4126 = vrcp.f32 %v3090_v7  ;;  %vm3366_vm8 = vmor %vm3364_vm7, %vm3365_vm6  ;;  %v3385_v35 = vand.u32 2147483648, %v3090_v7  ;;  %v3383_v48 = vand.u32 2147483647, %v3090_v7 }
 0xf1e   :  { %3601 = vst.msk [vmem:[%s6280_s19 + $0x80] sm:$0xff] %vm3584_vm0, %v3357_v6  ;;  %v3361_v27 = vsub.f32 1.0, %v3360_v12  ;;  %vm3379_vm11 = vweird.f32 %v3090_v7  ;;  %v2451_v6 = vpop.f32.mrf.mxu0 }
 0xf1f   :  { %v2908_v60 = vpop.f32.mrf.mxu1  ;;  %v3386_v46 = vor.u32 1.1754944e-38, %v3385_v35  ;;  %vm3384_vm13 = vcmp.eq.f32.partialorder %v3383_v48, 8.507059e+37 }
 0xf20   :  { %v3362_v56 = vmul.f32 %v4123_v63, %v3361_v27  ;;  %v2964_v36 = vadd.f32 %v2908_v60, %v2712_v14 }
 0xf22   :  { %v4125_v15 = vpop.eup %4124  ;;  %v3363_v22 = vadd.f32 %v4123_v63, %v3362_v56  ;;  %v4006_v4 = vmul.f32 -1.442695, %v2964_v36 }
 0xf23   :  { %v4127_v55 = vpop.eup %4126  ;;  %v3091_v38 = vadd.f32 1.0, %v4125_v15 }
 0xf24   :  { %v3367_v17 = vsel %vm3366_vm8, %v4123_v63, %v3363_v22  ;;  %v3375_v25 = vmul.f32 %v4127_v55, %v3090_v7  ;;  %4128 = vpow2.f32 %v4006_v4  ;;  %vm3380_vm10 = vweird.f32 %v4127_v55  ;;  %v2671_v56 = vpop.f32.mrf.mxu2 }
 0xf25   :  { %v3372_v58 = vsel %vm3369_vm9, %v3371_v26, %v3367_v17  ;;  %4130 = vrcp.f32 %v3091_v38  ;;  %vm3381_vm12 = vmor %vm3379_vm11, %vm3380_vm10  ;;  %v3400_v53 = vand.u32 2147483648, %v3091_v38  ;;  %v3398_v51 = vand.u32 2147483647, %v3091_v38 }
 0xf26   :  { %3602 = vst.msk [vmem:[%s6280_s19 + $0x88] sm:$0xff] %vm3584_vm0, %v3372_v58  ;;  %v3376_v42 = vsub.f32 1.0, %v3375_v25  ;;  %vm3394_vm15 = vweird.f32 %v3091_v38  ;;  %v2446_v7 = vadd.f32 %v2445_v50, %v5970_v9  ;;  %v2716_v58 = vadd.f32 %v2668_v57, %v2449_v5 }
 0xf27   :  { %v2911_v61 = vpop.f32.mrf.mxu1  ;;  %v3401_v23 = vor.u32 1.1754944e-38, %v3400_v53  ;;  %vm3399_vm2 = vcmp.eq.f32.partialorder %v3398_v51, 8.507059e+37 }
 0xf28   :  { %v3377_v41 = vmul.f32 %v4127_v55, %v3376_v42  ;;  %v2965_v8 = vadd.f32 %v2911_v61, %v2713_v44  ;;  %v2715_v27 = vadd.f32 %v2665_v16, %v2446_v7  ;;  %v2454_v42 = vpop.f32.mrf.mxu0 }
 0xf2a   :  { %v4129_v37 = vpop.eup %4128  ;;  %v3378_v62 = vadd.f32 %v4127_v55, %v3377_v41  ;;  %v4007_v28 = vmul.f32 -1.442695, %v2965_v8 }
 0xf2b   :  { %v4131_v39 = vpop.eup %4130  ;;  %v3092_v31 = vadd.f32 1.0, %v4129_v37 }
 0xf2c   :  { %v3382_v3 = vsel %vm3381_vm12, %v4127_v55, %v3378_v62  ;;  %v3390_v59 = vmul.f32 %v4131_v39, %v3091_v38  ;;  %4132 = vpow2.f32 %v4007_v28  ;;  %vm3395_vm14 = vweird.f32 %v4131_v39  ;;  %v2674_v8 = vpop.f32.mrf.mxu2 }
 0xf2d   :  { %v3387_v0 = vsel %vm3384_vm13, %v3386_v46, %v3382_v3  ;;  %4134 = vrcp.f32 %v3092_v31  ;;  %vm3396_vm1 = vmor %vm3394_vm15, %vm3395_vm14  ;;  %v3415_v60 = vand.u32 2147483648, %v3092_v31  ;;  %v3413_v9 = vand.u32 2147483647, %v3092_v31 }
 0xf2e   :  { %3603 = vst.msk [vmem:[%s6280_s19 + $0x90] sm:$0xff] %vm3584_vm0, %v3387_v0  ;;  %v3391_v30 = vsub.f32 1.0, %v3390_v59  ;;  %vm3409_vm4 = vweird.f32 %v3092_v31  ;;  %v2452_v46 = vadd.f32 %v2451_v6, %v5974_v34 }
 0xf2f   :  { %v2914_v52 = vpop.f32.mrf.mxu1  ;;  %v3416_v26 = vor.u32 1.1754944e-38, %v3415_v60  ;;  %vm3414_vm6 = vcmp.eq.f32.partialorder %v3413_v9, 8.507059e+37 }
 0xf30   :  { %v3392_v11 = vmul.f32 %v4131_v39, %v3391_v30  ;;  %v2966_v1 = vadd.f32 %v2914_v52, %v2714_v29  ;;  %v2717_v0 = vadd.f32 %v2671_v56, %v2452_v46  ;;  %v2457_v34 = vpop.f32.mrf.mxu0 }
 0xf32   :  { %v4133_v45 = vpop.eup %4132  ;;  %v3393_v21 = vadd.f32 %v4131_v39, %v3392_v11  ;;  %v4008_v63 = vmul.f32 -1.442695, %v2966_v1 }
 0xf33   :  { %v4135_v49 = vpop.eup %4134  ;;  %v3093_v18 = vadd.f32 1.0, %v4133_v45 }
 0xf34   :  { %v3397_v12 = vsel %vm3396_vm1, %v4131_v39, %v3393_v21  ;;  %v3405_v2 = vmul.f32 %v4135_v49, %v3092_v31  ;;  %4136 = vpow2.f32 %v4008_v63  ;;  %vm3410_vm3 = vweird.f32 %v4135_v49 }
 0xf35   :  { %v3402_v14 = vsel %vm3399_vm2, %v3401_v23, %v3397_v12  ;;  %4138 = vrcp.f32 %v3093_v18  ;;  %vm3411_vm5 = vmor %vm3409_vm4, %vm3410_vm3  ;;  %v3430_v35 = vand.u32 2147483648, %v3093_v18  ;;  %v3428_v24 = vand.u32 2147483647, %v3093_v18  ;;  %v2677_v23 = vpop.f32.mrf.mxu2 }
 0xf36   :  { %3604 = vst.msk [vmem:[%s6280_s19 + $0x98] sm:$0xff] %vm3584_vm0, %v3402_v14  ;;  %v3406_v32 = vsub.f32 1.0, %v3405_v2  ;;  %vm3424_vm8 = vweird.f32 %v3093_v18 }
 0xf37   :  { %v2917_v13 = vpop.f32.mrf.mxu1  ;;  %v3431_v39 = vor.u32 1.1754944e-38, %v3430_v35  ;;  %vm3429_vm10 = vcmp.eq.f32.partialorder %v3428_v24, 8.507059e+37 }
 0xf38   :  { %v3407_v36 = vmul.f32 %v4135_v49, %v3406_v32  ;;  %v2967_v50 = vadd.f32 %v2917_v13, %v2715_v27  ;;  %v2460_v9 = vpop.f32.mrf.mxu0 }
 0xf3a   :  { %v4137_v15 = vpop.eup %4136  ;;  %v3408_v22 = vadd.f32 %v4135_v49, %v3407_v36  ;;  %v4009_v4 = vmul.f32 -1.442695, %v2967_v50 }
 0xf3b   :  { %v4139_v55 = vpop.eup %4138  ;;  %v3094_v38 = vadd.f32 1.0, %v4137_v15 }
 0xf3c   :  { %v3412_v17 = vsel %vm3411_vm5, %v4135_v49, %v3408_v22  ;;  %v3420_v16 = vmul.f32 %v4139_v55, %v3093_v18  ;;  %4140 = vpow2.f32 %v4009_v4  ;;  %vm3425_vm7 = vweird.f32 %v4139_v55 }
 0xf3d   :  { %v3417_v25 = vsel %vm3414_vm6, %v3416_v26, %v3412_v17  ;;  %4142 = vrcp.f32 %v3094_v38  ;;  %vm3426_vm9 = vmor %vm3424_vm8, %vm3425_vm7  ;;  %v3445_v29 = vand.u32 2147483648, %v3094_v38  ;;  %v3443_v52 = vand.u32 2147483647, %v3094_v38  ;;  %v2680_v17 = vpop.f32.mrf.mxu2 }
 0xf3e   :  { %3605 = vst.msk [vmem:[%s6280_s19 + $0xa0] sm:$0xff] %vm3584_vm0, %v3417_v25  ;;  %v3421_v44 = vsub.f32 1.0, %v3420_v16  ;;  %vm3439_vm12 = vweird.f32 %v3094_v38  ;;  %v2455_v49 = vadd.f32 %v2454_v42, %v5976_v10  ;;  %v2458_v4 = vadd.f32 %v2457_v34, %v5980_v20 }
 0xf3f   :  { %v2920_v61 = vpop.f32.mrf.mxu1  ;;  %v3446_v63 = vor.u32 1.1754944e-38, %v3445_v29  ;;  %vm3444_vm14 = vcmp.eq.f32.partialorder %v3443_v52, 8.507059e+37 }
 0xf40   :  { %v3422_v41 = vmul.f32 %v4139_v55, %v3421_v44  ;;  %v2968_v48 = vadd.f32 %v2920_v61, %v2716_v58  ;;  %v2718_v6 = vadd.f32 %v2674_v8, %v2455_v49  ;;  %v2719_v16 = vadd.f32 %v2677_v23, %v2458_v4 }
 0xf42   :  { %v4141_v37 = vpop.eup %4140  ;;  %v3423_v62 = vadd.f32 %v4139_v55, %v3422_v41  ;;  %v4010_v40 = vmul.f32 -1.442695, %v2968_v48 }
 0xf43   :  { %v4143_v28 = vpop.eup %4142  ;;  %v3095_v33 = vadd.f32 1.0, %v4141_v37  ;;  %v2461_v37 = vadd.f32 %v2460_v9, %v5984_v19 }
 0xf44   :  { %v3427_v31 = vsel %vm3426_vm9, %v4139_v55, %v3423_v62  ;;  %v3435_v3 = vmul.f32 %v4143_v28, %v3094_v38  ;;  %4144 = vpow2.f32 %v4010_v40  ;;  %vm3440_vm11 = vweird.f32 %v4143_v28 }
 0xf45   :  { %v3432_v59 = vsel %vm3429_vm10, %v3431_v39, %v3427_v31  ;;  %4146 = vrcp.f32 %v3095_v33  ;;  %vm3441_vm13 = vmor %vm3439_vm12, %vm3440_vm11  ;;  %v3460_v27 = vand.u32 2147483648, %v3095_v33  ;;  %v3458_v10 = vand.u32 2147483647, %v3095_v33  ;;  %v2463_v39 = vpop.f32.mrf.mxu0 }
 0xf46   :  { %3606 = vst.msk [vmem:[%s6280_s19 + $0xa8] sm:$0xff] %vm3584_vm0, %v3432_v59  ;;  %v3436_v57 = vsub.f32 1.0, %v3435_v3  ;;  %vm3454_vm1 = vweird.f32 %v3095_v33  ;;  %v2683_v59 = vpop.f32.mrf.mxu2 }
 0xf47   :  { %v2923_v30 = vpop.f32.mrf.mxu1  ;;  %v3461_v22 = vor.u32 1.1754944e-38, %v3460_v27  ;;  %vm3459_vm3 = vcmp.eq.f32.partialorder %v3458_v10, 8.507059e+37 }
 0xf48   :  { %v3437_v53 = vmul.f32 %v4143_v28, %v3436_v57  ;;  %v2969_v11 = vadd.f32 %v2923_v30, %v2717_v0 }
 0xf4a   :  { %v4145_v51 = vpop.eup %4144  ;;  %v3438_v1 = vadd.f32 %v4143_v28, %v3437_v53  ;;  %v4011_v45 = vmul.f32 -1.442695, %v2969_v11 }
 0xf4b   :  { %v4147_v21 = vpop.eup %4146  ;;  %v3096_v7 = vadd.f32 1.0, %v4145_v51  ;;  %v2464_v51 = vadd.f32 %v2463_v39, %v5988_v54 }
 0xf4c   :  { %v3442_v18 = vsel %vm3441_vm13, %v4143_v28, %v3438_v1  ;;  %v3450_v12 = vmul.f32 %v4147_v21, %v3095_v33  ;;  %4148 = vpow2.f32 %v4011_v45  ;;  %vm3455_vm15 = vweird.f32 %v4147_v21 }
 0xf4d   :  { %v3447_v2 = vsel %vm3444_vm14, %v3446_v63, %v3442_v18  ;;  %4150 = vrcp.f32 %v3096_v7  ;;  %vm3456_vm2 = vmor %vm3454_vm1, %vm3455_vm15  ;;  %v3475_v58 = vand.u32 2147483648, %v3096_v7  ;;  %v3473_v20 = vand.u32 2147483647, %v3096_v7 }
 0xf4e   :  { %3607 = vst.msk [vmem:[%s6280_s19 + $0xb0] sm:$0xff] %vm3584_vm0, %v3447_v2  ;;  %v3451_v14 = vsub.f32 1.0, %v3450_v12  ;;  %vm3469_vm5 = vweird.f32 %v3096_v7  ;;  %v2720_v33 = vadd.f32 %v2680_v17, %v2461_v37  ;;  %v2721_v49 = vadd.f32 %v2683_v59, %v2464_v51 }
 0xf4f   :  { %v2926_v32 = vpop.f32.mrf.mxu1  ;;  %v3476_v8 = vor.u32 1.1754944e-38, %v3475_v58  ;;  %vm3474_vm7 = vcmp.eq.f32.partialorder %v3473_v20, 8.507059e+37 }
 0xf50   :  { %v3452_v60 = vmul.f32 %v4147_v21, %v3451_v14  ;;  %v2970_v56 = vadd.f32 %v2926_v32, %v2718_v6  ;;  %v2686_v14 = vpop.f32.mrf.mxu2 }
 0xf52   :  { %v4149_v13 = vpop.eup %4148  ;;  %v3453_v36 = vadd.f32 %v4147_v21, %v3452_v60  ;;  %v4012_v50 = vmul.f32 -1.442695, %v2970_v56 }
 0xf53   :  { %v4151_v15 = vpop.eup %4150  ;;  %v3097_v55 = vadd.f32 1.0, %v4149_v13 }
 0xf54   :  { %v3457_v26 = vsel %vm3456_vm2, %v4147_v21, %v3453_v36  ;;  %v3465_v5 = vmul.f32 %v4151_v15, %v3096_v7  ;;  %4152 = vpow2.f32 %v4012_v50  ;;  %vm3470_vm4 = vweird.f32 %v4151_v15  ;;  %v2466_v7 = vpop.f32.mrf.mxu0 }
 0xf55   :  { %v3462_v38 = vsel %vm3459_vm3, %v3461_v22, %v3457_v26  ;;  %4154 = vrcp.f32 %v3097_v55  ;;  %vm3471_vm6 = vmor %vm3469_vm5, %vm3470_vm4  ;;  %v3490_v3 = vand.u32 2147483648, %v3097_v55  ;;  %v3488_v19 = vand.u32 2147483647, %v3097_v55 }
 0xf56   :  { %3608 = vst.msk [vmem:[%s6280_s19 + $0xb8] sm:$0xff] %vm3584_vm0, %v3462_v38  ;;  %v3466_v25 = vsub.f32 1.0, %v3465_v5  ;;  %vm3484_vm9 = vweird.f32 %v3097_v55  ;;  %v2467_v13 = vadd.f32 %v2466_v7, %v5990_v43 }
 0xf57   :  { %v2929_v44 = vpop.f32.mrf.mxu1  ;;  %v3491_v11 = vor.u32 1.1754944e-38, %v3490_v3  ;;  %vm3489_vm11 = vcmp.eq.f32.partialorder %v3488_v19, 8.507059e+37 }
 0xf58   :  { %v3467_v42 = vmul.f32 %v4151_v15, %v3466_v25  ;;  %v2971_v35 = vadd.f32 %v2929_v44, %v2719_v16  ;;  %v2722_v22 = vadd.f32 %v2686_v14, %v2467_v13 }
 0xf5a   :  { %v4153_v61 = vpop.eup %4152  ;;  %v3468_v41 = vadd.f32 %v4151_v15, %v3467_v42  ;;  %v4013_v24 = vmul.f32 -1.442695, %v2971_v35  ;;  %v2689_v35 = vpop.f32.mrf.mxu2 }
 0xf5b   :  { %v4155_v48 = vpop.eup %4154  ;;  %v3098_v62 = vadd.f32 1.0, %v4153_v61 }
 0xf5c   :  { %v3472_v40 = vsel %vm3471_vm6, %v4151_v15, %v3468_v41  ;;  %v3480_v28 = vmul.f32 %v4155_v48, %v3097_v55  ;;  %4156 = vpow2.f32 %v4013_v24  ;;  %vm3485_vm8 = vweird.f32 %v4155_v48  ;;  %v2469_v43 = vpop.f32.mrf.mxu0 }
 0xf5d   :  { %v3477_v46 = vsel %vm3474_vm7, %v3476_v8, %v3472_v40  ;;  %4158 = vrcp.f32 %v3098_v62  ;;  %vm3486_vm10 = vmor %vm3484_vm9, %vm3485_vm8  ;;  %v3505_v18 = vand.u32 2147483648, %v3098_v62  ;;  %v3503_v54 = vand.u32 2147483647, %v3098_v62 }
 0xf5e   :  { %3609 = vst.msk [vmem:[%s6280_s19 + $0xc0] sm:$0xff] %vm3584_vm0, %v3477_v46  ;;  %v3481_v31 = vsub.f32 1.0, %v3480_v28  ;;  %vm3499_vm13 = vweird.f32 %v3098_v62  ;;  %v2470_v20 = vadd.f32 %v2469_v43, %v5994_v47 }
 0xf5f   :  { %v2932_v0 = vpop.f32.mrf.mxu1  ;;  %v3506_v56 = vor.u32 1.1754944e-38, %v3505_v18  ;;  %vm3504_vm15 = vcmp.eq.f32.partialorder %v3503_v54, 8.507059e+37 }
 0xf60   :  { %v3482_v57 = vmul.f32 %v4155_v48, %v3481_v31  ;;  %v2972_v29 = vadd.f32 %v2932_v0, %v2720_v33  ;;  %v2723_v8 = vadd.f32 %v2689_v35, %v2470_v20 }
 0xf62   :  { %v4157_v30 = vpop.eup %4156  ;;  %v3483_v53 = vadd.f32 %v4155_v48, %v3482_v57  ;;  %v4014_v52 = vmul.f32 -1.442695, %v2972_v29 }
 0xf63   :  { %v4159_v34 = vpop.eup %4158  ;;  %v3099_v1 = vadd.f32 1.0, %v4157_v30 }
 0xf64   :  { %v3487_v45 = vsel %vm3486_vm10, %v4155_v48, %v3483_v53  ;;  %v3495_v21 = vmul.f32 %v4159_v34, %v3098_v62  ;;  %4160 = vpow2.f32 %v4014_v52  ;;  %vm3500_vm12 = vweird.f32 %v4159_v34 }
 0xf65   :  { %v3492_v63 = vsel %vm3489_vm11, %v3491_v11, %v3487_v45  ;;  %4162 = vrcp.f32 %v3099_v1  ;;  %vm3501_vm14 = vmor %vm3499_vm13, %vm3500_vm12  ;;  %v3520_v55 = vand.u32 2147483648, %v3099_v1  ;;  %v3518_v38 = vand.u32 2147483647, %v3099_v1 }
 0xf66   :  { %3610 = vst.msk [vmem:[%s6280_s19 + $0xc8] sm:$0xff] %vm3584_vm0, %v3492_v63  ;;  %v3496_v23 = vsub.f32 1.0, %v3495_v21  ;;  %vm3514_vm2 = vweird.f32 %v3099_v1 }
 0xf67   :  { %v2935_v12 = vpop.f32.mrf.mxu1  ;;  %v3521_v42 = vor.u32 1.1754944e-38, %v3520_v55  ;;  %vm3519_vm4 = vcmp.eq.f32.partialorder %v3518_v38, 8.507059e+37 }
 0xf68   :  { %v3497_v2 = vmul.f32 %v4159_v34, %v3496_v23  ;;  %v2973_v6 = vadd.f32 %v2935_v12, %v2721_v49 }
 0xf6a   :  { %v4161_v27 = vpop.eup %4160  ;;  %v3498_v32 = vadd.f32 %v4159_v34, %v3497_v2  ;;  %v4015_v60 = vmul.f32 -1.442695, %v2973_v6 }
 0xf6b   :  { %v4163_v10 = vpop.eup %4162  ;;  %v3100_v36 = vadd.f32 1.0, %v4161_v27 }
 0xf6c   :  { %v3502_v9 = vsel %vm3501_vm14, %v4159_v34, %v3498_v32  ;;  %v3510_v50 = vmul.f32 %v4163_v10, %v3099_v1  ;;  %4164 = vpow2.f32 %v4015_v60  ;;  %vm3515_vm1 = vweird.f32 %v4163_v10 }
 0xf6d   :  { %v3507_v15 = vsel %vm3504_vm15, %v3506_v56, %v3502_v9  ;;  %4166 = vrcp.f32 %v3100_v36  ;;  %vm3516_vm3 = vmor %vm3514_vm2, %vm3515_vm1  ;;  %v3535_v62 = vand.u32 2147483648, %v3100_v36  ;;  %v3533_v47 = vand.u32 2147483647, %v3100_v36 }
 0xf6e   :  { %3611 = vst.msk [vmem:[%s6280_s19 + $0xd0] sm:$0xff] %vm3584_vm0, %v3507_v15  ;;  %v3511_v4 = vsub.f32 1.0, %v3510_v50  ;;  %vm3529_vm6 = vweird.f32 %v3100_v36 }
 0xf6f   :  { %v2938_v26 = vpop.f32.mrf.mxu1  ;;  %v3536_v59 = vor.u32 1.1754944e-38, %v3535_v62  ;;  %vm3534_vm8 = vcmp.eq.f32.partialorder %v3533_v47, 8.507059e+37 }
 0xf70   :  { %v3512_v5 = vmul.f32 %v4163_v10, %v3511_v4  ;;  %v2974_v17 = vadd.f32 %v2938_v26, %v2722_v22 }
 0xf72   :  { %v4165_v16 = vpop.eup %4164  ;;  %v3513_v25 = vadd.f32 %v4163_v10, %v3512_v5  ;;  %v4016_v58 = vmul.f32 -1.442695, %v2974_v17 }
 0xf73   :  { %v4167_v44 = vpop.eup %4166  ;;  %v3101_v61 = vadd.f32 1.0, %v4165_v16 }
 0xf74   :  { %v3517_v41 = vsel %vm3516_vm3, %v4163_v10, %v3513_v25  ;;  %v3525_v24 = vmul.f32 %v4167_v44, %v3100_v36  ;;  %4168 = vpow2.f32 %v4016_v58  ;;  %vm3530_vm5 = vweird.f32 %v4167_v44 }
 0xf75   :  { %v3522_v48 = vsel %vm3519_vm4, %v3521_v42, %v3517_v41  ;;  %4170 = vrcp.f32 %v3101_v61  ;;  %vm3531_vm7 = vmor %vm3529_vm6, %vm3530_vm5  ;;  %v3550_v53 = vand.u32 2147483648, %v3101_v61  ;;  %v3548_v34 = vand.u32 2147483647, %v3101_v61 }
 0xf76   :  { %3612 = vst.msk [vmem:[%s6280_s19 + $0xd8] sm:$0xff] %vm3584_vm0, %v3522_v48  ;;  %v3526_v37 = vsub.f32 1.0, %v3525_v24  ;;  %vm3544_vm10 = vweird.f32 %v3101_v61 }
 0xf77   :  { %v2941_v40 = vpop.f32.mrf.mxu1  ;;  %v3551_v45 = vor.u32 1.1754944e-38, %v3550_v53  ;;  %vm3549_vm12 = vcmp.eq.f32.partialorder %v3548_v34, 8.507059e+37 }
 0xf78   :  { %v3527_v28 = vmul.f32 %v4167_v44, %v3526_v37  ;;  %v2975_v39 = vadd.f32 %v2941_v40, %v2723_v8 }
 0xf7a   :  { %v4169_v46 = vpop.eup %4168  ;;  %v3528_v33 = vadd.f32 %v4167_v44, %v3527_v28  ;;  %v4017_v31 = vmul.f32 -1.442695, %v2975_v39 }
 0xf7b   :  { %v4171_v3 = vpop.eup %4170  ;;  %v3102_v0 = vadd.f32 1.0, %v4169_v46 }
 0xf7c   :  { %v3532_v57 = vsel %vm3531_vm7, %v4167_v44, %v3528_v33  ;;  %v3540_v19 = vmul.f32 %v4171_v3, %v3101_v61  ;;  %4172 = vpow2.f32 %v4017_v31  ;;  %vm3545_vm9 = vweird.f32 %v4171_v3 }
 0xf7d   :  { %v3537_v29 = vsel %vm3534_vm8, %v3536_v59, %v3532_v57  ;;  %4174 = vrcp.f32 %v3102_v0  ;;  %vm3546_vm11 = vmor %vm3544_vm10, %vm3545_vm9  ;;  %v3565_v18 = vand.u32 2147483648, %v3102_v0  ;;  %v3563_v2 = vand.u32 2147483647, %v3102_v0 }
 0xf7e   :  { %3613 = vst.msk [vmem:[%s6280_s19 + $0xe0] sm:$0xff] %vm3584_vm0, %v3537_v29  ;;  %v3541_v30 = vsub.f32 1.0, %v3540_v19  ;;  %vm3559_vm14 = vweird.f32 %v3102_v0 }
 0xf7f   :  { %v3566_v14 = vor.u32 1.1754944e-38, %v3565_v18  ;;  %vm3564_vm1 = vcmp.eq.f32.partialorder %v3563_v2, 8.507059e+37 }
 0xf80   :  { %v3542_v52 = vmul.f32 %v4171_v3, %v3541_v30 }
 0xf82   :  { %v4173_v11 = vpop.eup %4172  ;;  %v3543_v51 = vadd.f32 %v4171_v3, %v3542_v52 }
 0xf83   :  { %v4175_v1 = vpop.eup %4174  ;;  %v3103_v21 = vadd.f32 1.0, %v4173_v11 }
 0xf84   :  { %v3547_v63 = vsel %vm3546_vm11, %v4171_v3, %v3543_v51  ;;  %v3555_v49 = vmul.f32 %v4175_v1, %v3102_v0  ;;  %vm3560_vm13 = vweird.f32 %v4175_v1 }
 0xf85   :  { %v3552_v23 = vsel %vm3549_vm12, %v3551_v45, %v3547_v63  ;;  %4176 = vrcp.f32 %v3103_v21  ;;  %vm3561_vm15 = vmor %vm3559_vm14, %vm3560_vm13  ;;  %v3580_v56 = vand.u32 2147483648, %v3103_v21  ;;  %v3578_v36 = vand.u32 2147483647, %v3103_v21 }
 0xf86   :  { %3614 = vst.msk [vmem:[%s6280_s19 + $0xe8] sm:$0xff] %vm3584_vm0, %v3552_v23  ;;  %v3556_v7 = vsub.f32 1.0, %v3555_v49  ;;  %vm3574_vm3 = vweird.f32 %v3103_v21 }
 0xf87   :  { %v3581_v50 = vor.u32 1.1754944e-38, %v3580_v56  ;;  %vm3579_vm5 = vcmp.eq.f32.partialorder %v3578_v36, 8.507059e+37 }
 0xf88   :  { %v3557_v12 = vmul.f32 %v4175_v1, %v3556_v7 }
 0xf8a   :  { %v3558_v54 = vadd.f32 %v4175_v1, %v3557_v12 }
 0xf8b   :  { %v4177_v6 = vpop.eup %4176 }
 0xf8c   :  { %v3562_v27 = vsel %vm3561_vm15, %v4175_v1, %v3558_v54  ;;  %v3570_v32 = vmul.f32 %v4177_v6, %v3103_v21  ;;  %vm3575_vm2 = vweird.f32 %v4177_v6 }
 0xf8d   :  { %v3567_v60 = vsel %vm3564_vm1, %v3566_v14, %v3562_v27  ;;  %vm3576_vm4 = vmor %vm3574_vm3, %vm3575_vm2 }
 0xf8e   :  { %3615 = vst.msk [vmem:[%s6280_s19 + $0xf0] sm:$0xff] %vm3584_vm0, %v3567_v60  ;;  %v3571_v10 = vsub.f32 1.0, %v3570_v32 }
 0xf90   :  { %v3572_v13 = vmul.f32 %v4177_v6, %v3571_v10 }
 0xf92   :  { %v3573_v9 = vadd.f32 %v4177_v6, %v3572_v13 }
 0xf94   :  { %v3577_v15 = vsel %vm3576_vm4, %v4177_v6, %v3573_v9 }
 0xf95   :  { %v3582_v22 = vsel %vm3579_vm5, %v3581_v50, %v3577_v15 }
 0xf96   :  { %3616 = vst.msk [vmem:[%s6280_s19 + $0xf8] sm:$0xff] %vm3584_vm0, %v3582_v22 }
 0xf97   :  { %3621 = vsyncpa [#allocation3], 1 }

</bundles_post_ra>
